<compile_context>
chip_gen: v5e
topology: v5e:2x2
jax: 0.10.0
libtpu: 0.0.40
codegen_flags: <defaults>
</compile_context>

<pallas_src>
import functools

import jax
import jax.numpy as jnp
from jax.experimental import pallas as pl
from jax.experimental.pallas import tpu as pltpu


# --------------------------------------------------------------------------
# Fused Pallas kernel (one grid step == one image)
# --------------------------------------------------------------------------
def _bottleneck_kernel(x_ref, w1t_ref, sh1_ref, w2rt_ref, sh2_ref, w3_ref,
                       sh3_ref, w4_ref, b4_ref, w5_ref, b5_ref,
                       o_ref, h1s_ref, *, H, W):
    Hp, Wp = H + 2, W + 2
    P = w1t_ref.shape[0]          # planes
    c4 = w3_ref.shape[1]          # planes * 4
    HW = H * W
    L = H * Wp                    # padded-row-stride output row count

    # x_img is both the conv1 input (cast to bf16) and the f32 residual.
    x_img = x_ref[0]                                              # (c4, HW) f32

    # ---- conv1 (1x1) + bn1 + relu (channel-major matmul, then one transpose)
    h1t = jnp.dot(w1t_ref[...], x_img.astype(jnp.bfloat16),
                  preferred_element_type=jnp.float32)             # (P, HW)
    h1t = jnp.maximum(h1t + sh1_ref[...], 0.0)
    a1 = jnp.transpose(h1t)                                       # (HW, P) f32

    # ---- zero-padded h1 with flat row stride Wp, built in VMEM scratch ----
    # halo rows/cols stay zero; interior image rows are W-row chunks at
    # offset (h+1)*Wp + 1 (static shifted stores).
    h1s_ref[...] = jnp.zeros_like(h1s_ref)
    for h in range(H):
        h1s_ref[pl.ds((h + 1) * Wp + 1, W), :] = a1[h * W:(h + 1) * W, :]

    # ---- conv2 (3x3, pad=1) as ONE K=9P matmul ----
    # tap k (dy,dx) for padded-stride output row o is h1_flat[o + dy*Wp + dx];
    # build im2col^T = [tap_0^T; tap_1^T; ...] (sublane-aligned stack) and do
    # h2^T = w2r^T @ im2col^T on the MXU (K = 9*P).
    taps_t = []
    for dy in range(3):
        for dx in range(3):
            tap = h1s_ref[pl.ds(dy * Wp + dx, L), :]              # (L, P) f32
            taps_t.append(jnp.transpose(tap))                     # (P, L) f32
    im2col_t = jnp.concatenate(taps_t, axis=0).astype(jnp.bfloat16)   # (9P, L)
    h2t = jnp.dot(w2rt_ref[...], im2col_t,
                  preferred_element_type=jnp.float32)             # (P, L)
    h2t = jnp.maximum(h2t + sh2_ref[...], 0.0)
    h2 = jnp.transpose(h2t).astype(jnp.bfloat16)                  # (L, P)

    # ---- conv3 (1x1) + bn3 (no relu before the SE gate) ----
    h3p = jnp.dot(h2, w3_ref[...],
                  preferred_element_type=jnp.float32) + sh3_ref[...]   # (L, c4)
    # drop the 2 padded-stride garbage columns per image row -> (HW, c4)
    h3 = h3p.reshape(H, Wp, c4)[:, :W, :].reshape(HW, c4)

    # ---- SE: global average pool + squeeze MLP + sigmoid gate (in-pass) ----
    pool = jnp.mean(h3, axis=0, keepdims=True)                    # (1, c4) f32
    pool8 = jnp.broadcast_to(pool, (8, c4)).astype(jnp.bfloat16)  # >=8 rows for MXU
    z = jnp.dot(pool8, w4_ref[...],
                preferred_element_type=jnp.float32) + b4_ref[...]
    z = jnp.maximum(z, 0.0).astype(jnp.bfloat16)                  # (8, csq)
    g = jax.nn.sigmoid(jnp.dot(z, w5_ref[...],
                               preferred_element_type=jnp.float32)
                       + b5_ref[...])                             # (8, c4) f32

    # ---- gate * h3 + residual (f32), relu; emit NCHW-layout (c4, HW) ----
    gated = h3 * g[0:1, :]                                        # (HW, c4) f32
    o_ref[0] = jnp.maximum(jnp.transpose(gated) + x_img, 0.0)     # (c4, HW)


# --------------------------------------------------------------------------
# pallas_call wrapper
# --------------------------------------------------------------------------
def fused_bottleneck(x, w1t, sh1, w2rt, sh2, w3, sh3, w4, b4, w5, b5, *, H, W):
    N, C, HW = x.shape
    P = w1t.shape[0]
    c4 = w3.shape[1]
    csq = w4.shape[1]
    Hp, Wp = H + 2, W + 2
    L = H * Wp

    flops = 2 * N * (P * C * HW + 9 * P * P * L + L * P * c4
                     + 8 * c4 * csq * 2)
    bytes_accessed = (x.size * 4 + N * c4 * HW * 4
                      + (w1t.size + w2rt.size + w3.size + w4.size + w5.size) * 2
                      + (sh1.size + sh2.size + sh3.size + b4.size + b5.size) * 4)

    kernel = functools.partial(_bottleneck_kernel, H=H, W=W)
    return pl.pallas_call(
        kernel,
        out_shape=jax.ShapeDtypeStruct((N, c4, HW), jnp.float32),
        grid=(N,),
        in_specs=[
            pl.BlockSpec((1, C, HW), lambda b: (b, 0, 0)),   # x (input + residual)
            pl.BlockSpec((P, C), lambda b: (0, 0)),          # w1^T (bn1-folded)
            pl.BlockSpec((P, 1), lambda b: (0, 0)),          # bn1 shift (column)
            pl.BlockSpec((P, 9 * P), lambda b: (0, 0)),      # w2r^T (bn2-folded)
            pl.BlockSpec((P, 1), lambda b: (0, 0)),          # bn2 shift (column)
            pl.BlockSpec((P, c4), lambda b: (0, 0)),         # w3 (bn3-folded)
            pl.BlockSpec((1, c4), lambda b: (0, 0)),         # bn3 shift (row)
            pl.BlockSpec((c4, csq), lambda b: (0, 0)),       # w4
            pl.BlockSpec((1, csq), lambda b: (0, 0)),        # b4
            pl.BlockSpec((csq, c4), lambda b: (0, 0)),       # w5
            pl.BlockSpec((1, c4), lambda b: (0, 0)),         # b5
        ],
        out_specs=pl.BlockSpec((1, c4, HW), lambda b: (b, 0, 0)),
        scratch_shapes=[pltpu.VMEM((Hp * Wp + 8, P), jnp.float32)],  # padded h1
        compiler_params=pltpu.CompilerParams(
            dimension_semantics=("parallel",),
            vmem_limit_bytes=48 * 1024 * 1024),   # fits v7x's 64 MiB, ample for v5e/v6e
        cost_estimate=pl.CostEstimate(flops=int(flops),
                                      transcendentals=int(N * 8 * c4),
                                      bytes_accessed=int(bytes_accessed)),
    )(x, w1t, sh1, w2rt, sh2, w3, sh3, w4, b4, w5, b5)


# --------------------------------------------------------------------------
# Parameters (deterministic synthetic init; shapes follow the PyTorch module)
# --------------------------------------------------------------------------
def init_params(key, inplanes, planes, compress_rate=16):
    c4 = planes * 4
    csq = c4 // compress_rate
    ks = jax.random.split(key, 10)

    def nrm(k, shape, fan_in):
        return jax.random.normal(k, shape, jnp.float32) / jnp.sqrt(float(fan_in))

    def bn_init(k, c):
        k1, k2, k3, k4 = jax.random.split(k, 4)
        gamma = 1.0 + 0.1 * jax.random.normal(k1, (c,), jnp.float32)
        beta = 0.1 * jax.random.normal(k2, (c,), jnp.float32)
        rmean = 0.1 * jax.random.normal(k3, (c,), jnp.float32)
        rvar = jax.random.uniform(k4, (c,), jnp.float32, minval=0.5, maxval=1.5)
        return gamma, beta, rmean, rvar

    return {
        "w1": nrm(ks[0], (inplanes, planes), inplanes),        # conv1 1x1, no bias
        "w2": nrm(ks[1], (3, 3, planes, planes), 9 * planes),  # conv2 3x3 (HWIO), no bias
        "w3": nrm(ks[2], (planes, c4), planes),                # conv3 1x1, no bias
        "w4": nrm(ks[3], (c4, csq), c4),                       # conv4 1x1 + bias
        "b4": 0.1 * jax.random.normal(ks[4], (1, csq), jnp.float32),
        "w5": nrm(ks[5], (csq, c4), csq),                      # conv5 1x1 + bias
        "b5": 0.1 * jax.random.normal(ks[6], (1, c4), jnp.float32),
        "bn1": bn_init(ks[7], planes),
        "bn2": bn_init(ks[8], planes),
        "bn3": bn_init(ks[9], c4),
    }


def fold_bn(bn, eps=1e-5):
    gamma, beta, rmean, rvar = bn
    scale = gamma / jnp.sqrt(rvar + eps)
    shift = beta - rmean * scale
    return scale[None, :], shift[None, :]


# --------------------------------------------------------------------------
# Forward pass (only free reshapes outside the kernel; no pads / transposes)
# --------------------------------------------------------------------------
def bottleneck_forward(x_nchw, p):
    N, Cin, H, W = x_nchw.shape
    planes = p["w1"].shape[1]
    c4 = planes * 4
    assert Cin == c4, "stride=1 / downsample=None requires inplanes == planes*4"
    assert H == W, "SE pooling (avg_pool2d(kernel=H)) assumes square feature maps"

    # Fold BN (inference) scale into the conv weights; only the shift survives.
    s1, t1 = fold_bn(p["bn1"])
    s2, t2 = fold_bn(p["bn2"])
    s3, t3 = fold_bn(p["bn3"])
    w1t = (p["w1"] * s1).T.astype(jnp.bfloat16)                       # (P, Cin)
    sh1 = t1[0][:, None]                                              # (P, 1)
    w2rt = (p["w2"] * s2).reshape(9 * planes, planes).T.astype(jnp.bfloat16)  # (P, 9P)
    sh2 = t2[0][:, None]                                              # (P, 1)
    w3 = (p["w3"] * s3).astype(jnp.bfloat16)                          # (P, c4)
    sh3 = t3                                                          # (1, c4)

    x_flat = x_nchw.reshape(N, Cin, H * W).astype(jnp.float32)        # free reshape
    out = fused_bottleneck(x_flat, w1t, sh1, w2rt, sh2, w3, sh3,
                           p["w4"].astype(jnp.bfloat16), p["b4"],
                           p["w5"].astype(jnp.bfloat16), p["b5"], H=H, W=W)
    return out.reshape(N, c4, H, W)                                   # free reshape


# --------------------------------------------------------------------------
# Pure-JAX reference (independent check; same bf16 rounding points as kernel)
# --------------------------------------------------------------------------
def bottleneck_reference(x_nchw, p):
    hp = jax.lax.Precision.HIGHEST
    bf = lambda a: a.astype(jnp.bfloat16).astype(jnp.float32)
    x = jnp.transpose(x_nchw, (0, 2, 3, 1)).astype(jnp.float32)
    s1, t1 = fold_bn(p["bn1"])
    s2, t2 = fold_bn(p["bn2"])
    s3, t3 = fold_bn(p["bn3"])
    w1, w2, w3 = bf(p["w1"] * s1), bf(p["w2"] * s2), bf(p["w3"] * s3)
    dn = ("NHWC", "HWIO", "NHWC")

    h1 = jax.nn.relu(jnp.einsum("nhwc,cp->nhwp", bf(x), w1, precision=hp) + t1[0])
    h2 = jax.lax.conv_general_dilated(bf(h1), w2, (1, 1), ((1, 1), (1, 1)),
                                      dimension_numbers=dn, precision=hp) + t2[0]
    h2 = jax.nn.relu(h2)
    h3 = jnp.einsum("nhwc,cd->nhwd", bf(h2), w3, precision=hp) + t3[0]

    g = jnp.mean(h3, axis=(1, 2))                                     # (N, c4)
    z = jax.nn.relu(jnp.dot(bf(g), bf(p["w4"]), precision=hp) + p["b4"])
    s = jax.nn.sigmoid(jnp.dot(bf(z), bf(p["w5"]), precision=hp) + p["b5"])
    out = jax.nn.relu(s[:, None, None, :] * h3 + x)
    return jnp.transpose(out, (0, 3, 1, 2))


# --------------------------------------------------------------------------
if __name__ == "__main__":
    # inplanes must equal planes*4 so that `residual = x` is addable
    # (stride=1, downsample=None as in the module defaults).  planes=32 makes
    # c4 = 128, i.e. channel dims are MXU/lane friendly.
    N, planes, H, W = 2, 32, 16, 16
    inplanes = planes * 4
    key = jax.random.PRNGKey(0)
    kx, kp = jax.random.split(key)

    x = jax.random.normal(kx, (N, inplanes, H, W), jnp.float32)       # NCHW like PyTorch
    params = init_params(kp, inplanes, planes)

    fwd = jax.jit(bottleneck_forward)
    out = jax.block_until_ready(fwd(x, params))

    ref = bottleneck_reference(x, params)
    assert out.shape == (N, planes * 4, H, W), out.shape
    max_err = float(jnp.max(jnp.abs(out - ref)))
    assert jnp.allclose(out, ref, atol=1e-3, rtol=1e-3), f"max abs err = {max_err}"

    print("KERNEL_OK")
</pallas_src>

<mosaic_0001>
module attributes {stable_mosaic.version = 11 : i64} {
  func.func @_bottleneck_kernel(%arg0: i32, %arg1: memref<1x128x256xf32, #tpu.memory_space<vmem>>, %arg2: memref<32x128xbf16, #tpu.memory_space<vmem>>, %arg3: memref<32x1xf32, #tpu.memory_space<vmem>>, %arg4: memref<32x288xbf16, #tpu.memory_space<vmem>>, %arg5: memref<32x1xf32, #tpu.memory_space<vmem>>, %arg6: memref<32x128xbf16, #tpu.memory_space<vmem>>, %arg7: memref<1x128xf32, #tpu.memory_space<vmem>>, %arg8: memref<128x8xbf16, #tpu.memory_space<vmem>>, %arg9: memref<1x8xf32, #tpu.memory_space<vmem>>, %arg10: memref<8x128xbf16, #tpu.memory_space<vmem>>, %arg11: memref<1x128xf32, #tpu.memory_space<vmem>>, %arg12: memref<1x128x256xf32, #tpu.memory_space<vmem>>, %arg13: memref<332x32xf32, #tpu.memory_space<vmem>>) attributes {dimension_semantics = [#tpu.dimension_semantics<parallel>], iteration_bounds = array<i64: 2>, scalar_prefetch = 0 : i64, scratch_operands = 1 : i64, tpu.core_type = #tpu.core_type<tc>, window_params = [{transform_indices = @transform_0, window_bounds = array<i64: 1, 128, 256>}, {pipeline_mode = #tpu.pipeline_mode<synchronous>, transform_indices = @transform_1, window_bounds = array<i64: 32, 128>}, {pipeline_mode = #tpu.pipeline_mode<synchronous>, transform_indices = @transform_2, window_bounds = array<i64: 32, 1>}, {pipeline_mode = #tpu.pipeline_mode<synchronous>, transform_indices = @transform_3, window_bounds = array<i64: 32, 288>}, {pipeline_mode = #tpu.pipeline_mode<synchronous>, transform_indices = @transform_4, window_bounds = array<i64: 32, 1>}, {pipeline_mode = #tpu.pipeline_mode<synchronous>, transform_indices = @transform_5, window_bounds = array<i64: 32, 128>}, {pipeline_mode = #tpu.pipeline_mode<synchronous>, transform_indices = @transform_6, window_bounds = array<i64: 1, 128>}, {pipeline_mode = #tpu.pipeline_mode<synchronous>, transform_indices = @transform_7, window_bounds = array<i64: 128, 8>}, {pipeline_mode = #tpu.pipeline_mode<synchronous>, transform_indices = @transform_8, window_bounds = array<i64: 1, 8>}, {pipeline_mode = #tpu.pipeline_mode<synchronous>, transform_indices = @transform_9, window_bounds = array<i64: 8, 128>}, {pipeline_mode = #tpu.pipeline_mode<synchronous>, transform_indices = @transform_10, window_bounds = array<i64: 1, 128>}, {transform_indices = @transform_11, window_bounds = array<i64: 1, 128, 256>}]} {
    %c0 = arith.constant 0 : index
    %c0_0 = arith.constant 0 : index
    %c0_1 = arith.constant 0 : index
    %0 = vector.load %arg1[%c0, %c0_0, %c0_1] : memref<1x128x256xf32, #tpu.memory_space<vmem>>, vector<1x128x256xf32>
    %1 = vector.shape_cast %0 : vector<1x128x256xf32> to vector<128x256xf32>
    %c0_2 = arith.constant 0 : index
    %c0_3 = arith.constant 0 : index
    %2 = vector.load %arg2[%c0_2, %c0_3] : memref<32x128xbf16, #tpu.memory_space<vmem>>, vector<32x128xbf16>
    %3 = arith.truncf %1 : vector<128x256xf32> to vector<128x256xbf16>
    %cst = arith.constant dense<0.000000e+00> : vector<32x256xf32>
    %4 = tpu.matmul %2, %3, %cst {dimension_numbers = #tpu.dot_dimension_numbers<[1], [0], [0], [1], [0, 0, 1, 1], [], []>} : vector<32x128xbf16>, vector<128x256xbf16>, vector<32x256xf32> -> vector<32x256xf32>
    %c0_4 = arith.constant 0 : index
    %c0_5 = arith.constant 0 : index
    %5 = vector.load %arg3[%c0_4, %c0_5] : memref<32x1xf32, #tpu.memory_space<vmem>>, vector<32x1xf32>
    %6 = vector.broadcast %5 : vector<32x1xf32> to vector<32x256xf32>
    %7 = arith.addf %4, %6 : vector<32x256xf32>
    %cst_6 = arith.constant 0.000000e+00 : f32
    %8 = vector.broadcast %cst_6 : f32 to vector<32x256xf32>
    %9 = arith.maximumf %7, %8 : vector<32x256xf32>
    %10 = tpu.transpose %9, [1, 0] : vector<32x256xf32> -> vector<256x32xf32>
    %cst_7 = arith.constant 0.000000e+00 : f32
    %11 = vector.broadcast %cst_7 : f32 to vector<332x32xf32>
    %c0_8 = arith.constant 0 : index
    %c0_9 = arith.constant 0 : index
    %12 = vector.load %arg13[%c0_8, %c0_9] : memref<332x32xf32, #tpu.memory_space<vmem>>, vector<332x32xf32>
    tpu.vector_store %arg13[%c0_8, %c0_9], %11 {strides = array<i32>} : memref<332x32xf32, #tpu.memory_space<vmem>>, vector<332x32xf32>,
    %13 = vector.extract_strided_slice %10 {offsets = [0, 0], sizes = [16, 32], strides = [1, 1]} : vector<256x32xf32> to vector<16x32xf32>
    %c19 = arith.constant 19 : index
    %c0_10 = arith.constant 0 : index
    %14 = vector.load %arg13[%c19, %c0_10] : memref<332x32xf32, #tpu.memory_space<vmem>>, vector<16x32xf32>
    tpu.vector_store %arg13[%c19, %c0_10], %13 {strides = array<i32>} : memref<332x32xf32, #tpu.memory_space<vmem>>, vector<16x32xf32>,
    %15 = vector.extract_strided_slice %10 {offsets = [16, 0], sizes = [16, 32], strides = [1, 1]} : vector<256x32xf32> to vector<16x32xf32>
    %c37 = arith.constant 37 : index
    %c0_11 = arith.constant 0 : index
    %16 = vector.load %arg13[%c37, %c0_11] : memref<332x32xf32, #tpu.memory_space<vmem>>, vector<16x32xf32>
    tpu.vector_store %arg13[%c37, %c0_11], %15 {strides = array<i32>} : memref<332x32xf32, #tpu.memory_space<vmem>>, vector<16x32xf32>,
    %17 = vector.extract_strided_slice %10 {offsets = [32, 0], sizes = [16, 32], strides = [1, 1]} : vector<256x32xf32> to vector<16x32xf32>
    %c55 = arith.constant 55 : index
    %c0_12 = arith.constant 0 : index
    %18 = vector.load %arg13[%c55, %c0_12] : memref<332x32xf32, #tpu.memory_space<vmem>>, vector<16x32xf32>
    tpu.vector_store %arg13[%c55, %c0_12], %17 {strides = array<i32>} : memref<332x32xf32, #tpu.memory_space<vmem>>, vector<16x32xf32>,
    %19 = vector.extract_strided_slice %10 {offsets = [48, 0], sizes = [16, 32], strides = [1, 1]} : vector<256x32xf32> to vector<16x32xf32>
    %c73 = arith.constant 73 : index
    %c0_13 = arith.constant 0 : index
    %20 = vector.load %arg13[%c73, %c0_13] : memref<332x32xf32, #tpu.memory_space<vmem>>, vector<16x32xf32>
    tpu.vector_store %arg13[%c73, %c0_13], %19 {strides = array<i32>} : memref<332x32xf32, #tpu.memory_space<vmem>>, vector<16x32xf32>,
    %21 = vector.extract_strided_slice %10 {offsets = [64, 0], sizes = [16, 32], strides = [1, 1]} : vector<256x32xf32> to vector<16x32xf32>
    %c91 = arith.constant 91 : index
    %c0_14 = arith.constant 0 : index
    %22 = vector.load %arg13[%c91, %c0_14] : memref<332x32xf32, #tpu.memory_space<vmem>>, vector<16x32xf32>
    tpu.vector_store %arg13[%c91, %c0_14], %21 {strides = array<i32>} : memref<332x32xf32, #tpu.memory_space<vmem>>, vector<16x32xf32>,
    %23 = vector.extract_strided_slice %10 {offsets = [80, 0], sizes = [16, 32], strides = [1, 1]} : vector<256x32xf32> to vector<16x32xf32>
    %c109 = arith.constant 109 : index
    %c0_15 = arith.constant 0 : index
    %24 = vector.load %arg13[%c109, %c0_15] : memref<332x32xf32, #tpu.memory_space<vmem>>, vector<16x32xf32>
    tpu.vector_store %arg13[%c109, %c0_15], %23 {strides = array<i32>} : memref<332x32xf32, #tpu.memory_space<vmem>>, vector<16x32xf32>,
    %25 = vector.extract_strided_slice %10 {offsets = [96, 0], sizes = [16, 32], strides = [1, 1]} : vector<256x32xf32> to vector<16x32xf32>
    %c127 = arith.constant 127 : index
    %c0_16 = arith.constant 0 : index
    %26 = vector.load %arg13[%c127, %c0_16] : memref<332x32xf32, #tpu.memory_space<vmem>>, vector<16x32xf32>
    tpu.vector_store %arg13[%c127, %c0_16], %25 {strides = array<i32>} : memref<332x32xf32, #tpu.memory_space<vmem>>, vector<16x32xf32>,
    %27 = vector.extract_strided_slice %10 {offsets = [112, 0], sizes = [16, 32], strides = [1, 1]} : vector<256x32xf32> to vector<16x32xf32>
    %c145 = arith.constant 145 : index
    %c0_17 = arith.constant 0 : index
    %28 = vector.load %arg13[%c145, %c0_17] : memref<332x32xf32, #tpu.memory_space<vmem>>, vector<16x32xf32>
    tpu.vector_store %arg13[%c145, %c0_17], %27 {strides = array<i32>} : memref<332x32xf32, #tpu.memory_space<vmem>>, vector<16x32xf32>,
    %29 = vector.extract_strided_slice %10 {offsets = [128, 0], sizes = [16, 32], strides = [1, 1]} : vector<256x32xf32> to vector<16x32xf32>
    %c163 = arith.constant 163 : index
    %c0_18 = arith.constant 0 : index
    %30 = vector.load %arg13[%c163, %c0_18] : memref<332x32xf32, #tpu.memory_space<vmem>>, vector<16x32xf32>
    tpu.vector_store %arg13[%c163, %c0_18], %29 {strides = array<i32>} : memref<332x32xf32, #tpu.memory_space<vmem>>, vector<16x32xf32>,
    %31 = vector.extract_strided_slice %10 {offsets = [144, 0], sizes = [16, 32], strides = [1, 1]} : vector<256x32xf32> to vector<16x32xf32>
    %c181 = arith.constant 181 : index
    %c0_19 = arith.constant 0 : index
    %32 = vector.load %arg13[%c181, %c0_19] : memref<332x32xf32, #tpu.memory_space<vmem>>, vector<16x32xf32>
    tpu.vector_store %arg13[%c181, %c0_19], %31 {strides = array<i32>} : memref<332x32xf32, #tpu.memory_space<vmem>>, vector<16x32xf32>,
    %33 = vector.extract_strided_slice %10 {offsets = [160, 0], sizes = [16, 32], strides = [1, 1]} : vector<256x32xf32> to vector<16x32xf32>
    %c199 = arith.constant 199 : index
    %c0_20 = arith.constant 0 : index
    %34 = vector.load %arg13[%c199, %c0_20] : memref<332x32xf32, #tpu.memory_space<vmem>>, vector<16x32xf32>
    tpu.vector_store %arg13[%c199, %c0_20], %33 {strides = array<i32>} : memref<332x32xf32, #tpu.memory_space<vmem>>, vector<16x32xf32>,
    %35 = vector.extract_strided_slice %10 {offsets = [176, 0], sizes = [16, 32], strides = [1, 1]} : vector<256x32xf32> to vector<16x32xf32>
    %c217 = arith.constant 217 : index
    %c0_21 = arith.constant 0 : index
    %36 = vector.load %arg13[%c217, %c0_21] : memref<332x32xf32, #tpu.memory_space<vmem>>, vector<16x32xf32>
    tpu.vector_store %arg13[%c217, %c0_21], %35 {strides = array<i32>} : memref<332x32xf32, #tpu.memory_space<vmem>>, vector<16x32xf32>,
    %37 = vector.extract_strided_slice %10 {offsets = [192, 0], sizes = [16, 32], strides = [1, 1]} : vector<256x32xf32> to vector<16x32xf32>
    %c235 = arith.constant 235 : index
    %c0_22 = arith.constant 0 : index
    %38 = vector.load %arg13[%c235, %c0_22] : memref<332x32xf32, #tpu.memory_space<vmem>>, vector<16x32xf32>
    tpu.vector_store %arg13[%c235, %c0_22], %37 {strides = array<i32>} : memref<332x32xf32, #tpu.memory_space<vmem>>, vector<16x32xf32>,
    %39 = vector.extract_strided_slice %10 {offsets = [208, 0], sizes = [16, 32], strides = [1, 1]} : vector<256x32xf32> to vector<16x32xf32>
    %c253 = arith.constant 253 : index
    %c0_23 = arith.constant 0 : index
    %40 = vector.load %arg13[%c253, %c0_23] : memref<332x32xf32, #tpu.memory_space<vmem>>, vector<16x32xf32>
    tpu.vector_store %arg13[%c253, %c0_23], %39 {strides = array<i32>} : memref<332x32xf32, #tpu.memory_space<vmem>>, vector<16x32xf32>,
    %41 = vector.extract_strided_slice %10 {offsets = [224, 0], sizes = [16, 32], strides = [1, 1]} : vector<256x32xf32> to vector<16x32xf32>
    %c271 = arith.constant 271 : index
    %c0_24 = arith.constant 0 : index
    %42 = vector.load %arg13[%c271, %c0_24] : memref<332x32xf32, #tpu.memory_space<vmem>>, vector<16x32xf32>
    tpu.vector_store %arg13[%c271, %c0_24], %41 {strides = array<i32>} : memref<332x32xf32, #tpu.memory_space<vmem>>, vector<16x32xf32>,
    %43 = vector.extract_strided_slice %10 {offsets = [240, 0], sizes = [16, 32], strides = [1, 1]} : vector<256x32xf32> to vector<16x32xf32>
    %c289 = arith.constant 289 : index
    %c0_25 = arith.constant 0 : index
    %44 = vector.load %arg13[%c289, %c0_25] : memref<332x32xf32, #tpu.memory_space<vmem>>, vector<16x32xf32>
    tpu.vector_store %arg13[%c289, %c0_25], %43 {strides = array<i32>} : memref<332x32xf32, #tpu.memory_space<vmem>>, vector<16x32xf32>,
    %c0_26 = arith.constant 0 : index
    %c0_27 = arith.constant 0 : index
    %45 = vector.load %arg13[%c0_26, %c0_27] : memref<332x32xf32, #tpu.memory_space<vmem>>, vector<288x32xf32>
    %46 = tpu.transpose %45, [1, 0] : vector<288x32xf32> -> vector<32x288xf32>
    %c1 = arith.constant 1 : index
    %c0_28 = arith.constant 0 : index
    %47 = vector.load %arg13[%c1, %c0_28] : memref<332x32xf32, #tpu.memory_space<vmem>>, vector<288x32xf32>
    %48 = tpu.transpose %47, [1, 0] : vector<288x32xf32> -> vector<32x288xf32>
    %c2 = arith.constant 2 : index
    %c0_29 = arith.constant 0 : index
    %49 = vector.load %arg13[%c2, %c0_29] : memref<332x32xf32, #tpu.memory_space<vmem>>, vector<288x32xf32>
    %50 = tpu.transpose %49, [1, 0] : vector<288x32xf32> -> vector<32x288xf32>
    %c18 = arith.constant 18 : index
    %c0_30 = arith.constant 0 : index
    %51 = vector.load %arg13[%c18, %c0_30] : memref<332x32xf32, #tpu.memory_space<vmem>>, vector<288x32xf32>
    %52 = tpu.transpose %51, [1, 0] : vector<288x32xf32> -> vector<32x288xf32>
    %c19_31 = arith.constant 19 : index
    %c0_32 = arith.constant 0 : index
    %53 = vector.load %arg13[%c19_31, %c0_32] : memref<332x32xf32, #tpu.memory_space<vmem>>, vector<288x32xf32>
    %54 = tpu.transpose %53, [1, 0] : vector<288x32xf32> -> vector<32x288xf32>
    %c20 = arith.constant 20 : index
    %c0_33 = arith.constant 0 : index
    %55 = vector.load %arg13[%c20, %c0_33] : memref<332x32xf32, #tpu.memory_space<vmem>>, vector<288x32xf32>
    %56 = tpu.transpose %55, [1, 0] : vector<288x32xf32> -> vector<32x288xf32>
    %c36 = arith.constant 36 : index
    %c0_34 = arith.constant 0 : index
    %57 = vector.load %arg13[%c36, %c0_34] : memref<332x32xf32, #tpu.memory_space<vmem>>, vector<288x32xf32>
    %58 = tpu.transpose %57, [1, 0] : vector<288x32xf32> -> vector<32x288xf32>
    %c37_35 = arith.constant 37 : index
    %c0_36 = arith.constant 0 : index
    %59 = vector.load %arg13[%c37_35, %c0_36] : memref<332x32xf32, #tpu.memory_space<vmem>>, vector<288x32xf32>
    %60 = tpu.transpose %59, [1, 0] : vector<288x32xf32> -> vector<32x288xf32>
    %c38 = arith.constant 38 : index
    %c0_37 = arith.constant 0 : index
    %61 = vector.load %arg13[%c38, %c0_37] : memref<332x32xf32, #tpu.memory_space<vmem>>, vector<288x32xf32>
    %62 = tpu.transpose %61, [1, 0] : vector<288x32xf32> -> vector<32x288xf32>
    %63 = tpu.concatenate %46, %48, %50, %52, %54, %56, %58, %60, %62 in 0 : vector<32x288xf32>, vector<32x288xf32>, vector<32x288xf32>, vector<32x288xf32>, vector<32x288xf32>, vector<32x288xf32>, vector<32x288xf32>, vector<32x288xf32>, vector<32x288xf32> -> vector<288x288xf32>
    %64 = arith.truncf %63 : vector<288x288xf32> to vector<288x288xbf16>
    %c0_38 = arith.constant 0 : index
    %c0_39 = arith.constant 0 : index
    %65 = vector.load %arg4[%c0_38, %c0_39] : memref<32x288xbf16, #tpu.memory_space<vmem>>, vector<32x288xbf16>
    %cst_40 = arith.constant dense<0.000000e+00> : vector<32x288xf32>
    %66 = tpu.matmul %65, %64, %cst_40 {dimension_numbers = #tpu.dot_dimension_numbers<[1], [0], [0], [1], [0, 0, 1, 1], [], []>} : vector<32x288xbf16>, vector<288x288xbf16>, vector<32x288xf32> -> vector<32x288xf32>
    %c0_41 = arith.constant 0 : index
    %c0_42 = arith.constant 0 : index
    %67 = vector.load %arg5[%c0_41, %c0_42] : memref<32x1xf32, #tpu.memory_space<vmem>>, vector<32x1xf32>
    %68 = vector.broadcast %67 : vector<32x1xf32> to vector<32x288xf32>
    %69 = arith.addf %66, %68 : vector<32x288xf32>
    %cst_43 = arith.constant 0.000000e+00 : f32
    %70 = vector.broadcast %cst_43 : f32 to vector<32x288xf32>
    %71 = arith.maximumf %69, %70 : vector<32x288xf32>
    %72 = tpu.transpose %71, [1, 0] : vector<32x288xf32> -> vector<288x32xf32>
    %73 = arith.truncf %72 : vector<288x32xf32> to vector<288x32xbf16>
    %c0_44 = arith.constant 0 : index
    %c0_45 = arith.constant 0 : index
    %74 = vector.load %arg6[%c0_44, %c0_45] : memref<32x128xbf16, #tpu.memory_space<vmem>>, vector<32x128xbf16>
    %cst_46 = arith.constant dense<0.000000e+00> : vector<288x128xf32>
    %75 = tpu.matmul %73, %74, %cst_46 {dimension_numbers = #tpu.dot_dimension_numbers<[1], [0], [0], [1], [0, 0, 1, 1], [], []>} : vector<288x32xbf16>, vector<32x128xbf16>, vector<288x128xf32> -> vector<288x128xf32>
    %c0_47 = arith.constant 0 : index
    %c0_48 = arith.constant 0 : index
    %76 = vector.load %arg7[%c0_47, %c0_48] : memref<1x128xf32, #tpu.memory_space<vmem>>, vector<1x128xf32>
    %77 = vector.broadcast %76 : vector<1x128xf32> to vector<288x128xf32>
    %78 = arith.addf %75, %77 : vector<288x128xf32>
    %79 = vector.shape_cast %78 : vector<288x128xf32> to vector<16x18x128xf32>
    %80 = vector.extract_strided_slice %79 {offsets = [0, 0, 0], sizes = [16, 16, 128], strides = [1, 1, 1]} : vector<16x18x128xf32> to vector<16x16x128xf32>
    %81 = vector.shape_cast %80 : vector<16x16x128xf32> to vector<256x128xf32>
    %cst_49 = arith.constant dense<0.000000e+00> : vector<128xf32>
    %82 = vector.multi_reduction <add>, %81, %cst_49 [0] : vector<256x128xf32> to vector<128xf32>
    %83 = vector.shape_cast %82 : vector<128xf32> to vector<1x128xf32>
    %cst_50 = arith.constant 2.560000e+02 : f32
    %84 = vector.broadcast %cst_50 : f32 to vector<1x128xf32>
    %85 = arith.divf %83, %84 : vector<1x128xf32>
    %86 = vector.shape_cast %85 : vector<1x128xf32> to vector<1x128xf32>
    %87 = vector.broadcast %86 : vector<1x128xf32> to vector<8x128xf32>
    %88 = arith.truncf %87 : vector<8x128xf32> to vector<8x128xbf16>
    %c0_51 = arith.constant 0 : index
    %c0_52 = arith.constant 0 : index
    %89 = vector.load %arg8[%c0_51, %c0_52] : memref<128x8xbf16, #tpu.memory_space<vmem>>, vector<128x8xbf16>
    %cst_53 = arith.constant dense<0.000000e+00> : vector<8x8xf32>
    %90 = tpu.matmul %88, %89, %cst_53 {dimension_numbers = #tpu.dot_dimension_numbers<[1], [0], [0], [1], [0, 0, 1, 1], [], []>} : vector<8x128xbf16>, vector<128x8xbf16>, vector<8x8xf32> -> vector<8x8xf32>
    %c0_54 = arith.constant 0 : index
    %c0_55 = arith.constant 0 : index
    %91 = vector.load %arg9[%c0_54, %c0_55] : memref<1x8xf32, #tpu.memory_space<vmem>>, vector<1x8xf32>
    %92 = vector.broadcast %91 : vector<1x8xf32> to vector<8x8xf32>
    %93 = arith.addf %90, %92 : vector<8x8xf32>
    %cst_56 = arith.constant 0.000000e+00 : f32
    %94 = vector.broadcast %cst_56 : f32 to vector<8x8xf32>
    %95 = arith.maximumf %93, %94 : vector<8x8xf32>
    %96 = arith.truncf %95 : vector<8x8xf32> to vector<8x8xbf16>
    %c0_57 = arith.constant 0 : index
    %c0_58 = arith.constant 0 : index
    %97 = vector.load %arg10[%c0_57, %c0_58] : memref<8x128xbf16, #tpu.memory_space<vmem>>, vector<8x128xbf16>
    %cst_59 = arith.constant dense<0.000000e+00> : vector<8x128xf32>
    %98 = tpu.matmul %96, %97, %cst_59 {dimension_numbers = #tpu.dot_dimension_numbers<[1], [0], [0], [1], [0, 0, 1, 1], [], []>} : vector<8x8xbf16>, vector<8x128xbf16>, vector<8x128xf32> -> vector<8x128xf32>
    %c0_60 = arith.constant 0 : index
    %c0_61 = arith.constant 0 : index
    %99 = vector.load %arg11[%c0_60, %c0_61] : memref<1x128xf32, #tpu.memory_space<vmem>>, vector<1x128xf32>
    %100 = vector.broadcast %99 : vector<1x128xf32> to vector<8x128xf32>
    %101 = arith.addf %98, %100 : vector<8x128xf32>
    %102 = arith.negf %101 : vector<8x128xf32>
    %103 = math.exp %102 : vector<8x128xf32>
    %cst_62 = arith.constant 1.000000e+00 : f32
    %104 = vector.broadcast %cst_62 : f32 to vector<8x128xf32>
    %105 = arith.addf %104, %103 : vector<8x128xf32>
    %106 = arith.divf %104, %105 : vector<8x128xf32>
    %107 = vector.extract_strided_slice %106 {offsets = [0, 0], sizes = [1, 128], strides = [1, 1]} : vector<8x128xf32> to vector<1x128xf32>
    %108 = vector.broadcast %107 : vector<1x128xf32> to vector<256x128xf32>
    %109 = arith.mulf %81, %108 : vector<256x128xf32>
    %110 = tpu.transpose %109, [1, 0] : vector<256x128xf32> -> vector<128x256xf32>
    %111 = arith.addf %110, %1 : vector<128x256xf32>
    %cst_63 = arith.constant 0.000000e+00 : f32
    %112 = vector.broadcast %cst_63 : f32 to vector<128x256xf32>
    %113 = arith.maximumf %111, %112 : vector<128x256xf32>
    %c0_64 = arith.constant 0 : index
    %c0_65 = arith.constant 0 : index
    %c0_66 = arith.constant 0 : index
    %114 = vector.load %arg12[%c0_64, %c0_65, %c0_66] : memref<1x128x256xf32, #tpu.memory_space<vmem>>, vector<1x128x256xf32>
    %115 = vector.shape_cast %114 : vector<1x128x256xf32> to vector<128x256xf32>
    %116 = vector.shape_cast %113 : vector<128x256xf32> to vector<1x128x256xf32>
    tpu.vector_store %arg12[%c0_64, %c0_65, %c0_66], %116 {strides = array<i32>} : memref<1x128x256xf32, #tpu.memory_space<vmem>>, vector<1x128x256xf32>,
    return
  }
  func.func @transform_0(%arg0: i32) -> (i32, i32, i32) {
    %c0_i32 = arith.constant 0 : i32
    %c0_i32_0 = arith.constant 0 : i32
    %c0_i32_1 = arith.constant 0 : i32
    return %arg0, %c0_i32, %c0_i32_0 : i32, i32, i32
  }
  func.func @transform_1(%arg0: i32) -> (i32, i32) {
    %c0_i32 = arith.constant 0 : i32
    %c0_i32_0 = arith.constant 0 : i32
    %c0_i32_1 = arith.constant 0 : i32
    return %c0_i32, %c0_i32_0 : i32, i32
  }
  func.func @transform_2(%arg0: i32) -> (i32, i32) {
    %c0_i32 = arith.constant 0 : i32
    %c0_i32_0 = arith.constant 0 : i32
    %c0_i32_1 = arith.constant 0 : i32
    return %c0_i32, %c0_i32_0 : i32, i32
  }
  func.func @transform_3(%arg0: i32) -> (i32, i32) {
    %c0_i32 = arith.constant 0 : i32
    %c0_i32_0 = arith.constant 0 : i32
    %c0_i32_1 = arith.constant 0 : i32
    return %c0_i32, %c0_i32_0 : i32, i32
  }
  func.func @transform_4(%arg0: i32) -> (i32, i32) {
    %c0_i32 = arith.constant 0 : i32
    %c0_i32_0 = arith.constant 0 : i32
    %c0_i32_1 = arith.constant 0 : i32
    return %c0_i32, %c0_i32_0 : i32, i32
  }
  func.func @transform_5(%arg0: i32) -> (i32, i32) {
    %c0_i32 = arith.constant 0 : i32
    %c0_i32_0 = arith.constant 0 : i32
    %c0_i32_1 = arith.constant 0 : i32
    return %c0_i32, %c0_i32_0 : i32, i32
  }
  func.func @transform_6(%arg0: i32) -> (i32, i32) {
    %c0_i32 = arith.constant 0 : i32
    %c0_i32_0 = arith.constant 0 : i32
    %c0_i32_1 = arith.constant 0 : i32
    return %c0_i32, %c0_i32_0 : i32, i32
  }
  func.func @transform_7(%arg0: i32) -> (i32, i32) {
    %c0_i32 = arith.constant 0 : i32
    %c0_i32_0 = arith.constant 0 : i32
    %c0_i32_1 = arith.constant 0 : i32
    return %c0_i32, %c0_i32_0 : i32, i32
  }
  func.func @transform_8(%arg0: i32) -> (i32, i32) {
    %c0_i32 = arith.constant 0 : i32
    %c0_i32_0 = arith.constant 0 : i32
    %c0_i32_1 = arith.constant 0 : i32
    return %c0_i32, %c0_i32_0 : i32, i32
  }
  func.func @transform_9(%arg0: i32) -> (i32, i32) {
    %c0_i32 = arith.constant 0 : i32
    %c0_i32_0 = arith.constant 0 : i32
    %c0_i32_1 = arith.constant 0 : i32
    return %c0_i32, %c0_i32_0 : i32, i32
  }
  func.func @transform_10(%arg0: i32) -> (i32, i32) {
    %c0_i32 = arith.constant 0 : i32
    %c0_i32_0 = arith.constant 0 : i32
    %c0_i32_1 = arith.constant 0 : i32
    return %c0_i32, %c0_i32_0 : i32, i32
  }
  func.func @transform_11(%arg0: i32) -> (i32, i32, i32) {
    %c0_i32 = arith.constant 0 : i32
    %c0_i32_0 = arith.constant 0 : i32
    %c0_i32_1 = arith.constant 0 : i32
    return %arg0, %c0_i32, %c0_i32_0 : i32, i32, i32
  }
}

</mosaic_0001>

<bundles_post_ra>
// kernel: bottleneck_forward.1
= control target key start
LH: loop header
LB: loop body
LE: loop exit
PB: predicated region body
PF: predicated region fallthrough
CT: control target
= control target key end

     0   :  { %s4650_s17 = smov 0   ;;  %s6148_s0 = inlined_call_operand.vmem [shape: f32[2,128,256], index: 0, kind: input, shape index: {}]   ;;  %s6149_s1 = inlined_call_operand.vmem [shape: bf16[32,128], index: 1, kind: input, shape index: {}]   ;;  %s6150_s2 = inlined_call_operand.vmem [shape: f32[32,1], index: 2, kind: input, shape index: {}]   ;;  %s6151_s3 = inlined_call_operand.vmem [shape: bf16[32,288], index: 3, kind: input, shape index: {}]   ;;  %s6152_s4 = inlined_call_operand.vmem [shape: f32[32,1], index: 4, kind: input, shape index: {}]   ;;  %s6153_s5 = inlined_call_operand.vmem [shape: bf16[32,128], index: 5, kind: input, shape index: {}]   ;;  %s6154_s6 = inlined_call_operand.vmem [shape: f32[1,128], index: 6, kind: input, shape index: {}]   ;;  %s6155_s7 = inlined_call_operand.vmem [shape: bf16[128,8], index: 7, kind: input, shape index: {}]   ;;  %s6156_s8 = inlined_call_operand.vmem [shape: f32[1,8], index: 8, kind: input, shape index: {}]   ;;  %s6157_s9 = inlined_call_operand.vmem [shape: bf16[8,128], index: 9, kind: input, shape index: {}]   ;;  %s6158_s10 = inlined_call_operand.vmem [shape: f32[1,128], index: 10, kind: input, shape index: {}]   ;;  %s6159_s11 = inlined_call_operand.vmem [shape: f32[2,128,256], index: 11, kind: output, shape index: {}]  }
   0x1 LB: > { %s3721_s18 = sadd.s32 4294967295, %s4585_s17   ;;  %p3725_p0 = scmp.ge.s32.totalorder %s4585_s17, 1  ;;  %s4585_s17 = sphi %s4650_s17, %s21_s17  }
   0x2   : > { %p337_p1 = scmp.lt.s32.totalorder %s4585_s17, 3 }
   0x4   : > { %p338_p2 = pnand %p3725_p0, %p337_p1 }
   0x6   : > { %341 = sbr.rel (%p338_p2) target bundleno = 2355 (0x933), region = 64 }
   0xb   : > { %p377_p3 = scmp.lt.s32.totalorder %s3721_s18, 1  ;;  %v4587_v6 = vmov 0   ;;  %v440_v9 = vld [vmem:[%s6150_s2] sm:$0xff]  ;;  %v441_v16 = vld [vmem:[%s6150_s2 + $0x8] sm:$0xff]  ;;  %v442_v20 = vld [vmem:[%s6150_s2 + $0x10] sm:$0xff]  ;;  %vm586_vm0 = vcmask 261120  }
   0xc   : > { %3867 = vset.pattern.permute.xlu0 %v4587_v6  ;;  %3868 = vset.pattern.permute.xlu1 %v4587_v6  ;;  %v443_v27 = vld [vmem:[%s6150_s2 + $0x18] sm:$0xff]  ;;  %v3832_v34 = vld [vmem:[%s6149_s1] sm:$0xff]  ;;  %v3833_v47 = vld [vmem:[%s6149_s1 + $0x8] sm:$0xff]  ;;  %vm3007_vm2 = vcmask 1043456   ;;  %vm3003_vm3 = vcmask 64512  }
   0xd   : > { %s6357_s18 = smov (!%p377_p3, %s3721_s18), 1  ;;  %446 = vperm.xlu0 %3867, %v440_v9   ;;  %456 = vperm.xlu1 %3868, %v442_v20  }
   0xe   : > { %s3830_s19 = sshll.u32 %s6357_s18, 8 }
   0xf   : > { %s4666_s22 = scalar_lea.vmem %s6148_s0, %s3830_s19  ;;  %s6080_s21 = scalar_lea.vmem %s6159_s11, %s3830_s19 }
  0x10   : > { %v416_v0 = vld [vmem:[%s4666_s22 + $0xe0] sm:$0xff]  ;;  %v418_v1 = vld [vmem:[%s4666_s22 + $0xf0] sm:$0xff]  ;;  %v417_v28 = vld [vmem:[%s4666_s22 + $0xe8] sm:$0xff] }
  0x11   : > { %v412_v2 = vld [vmem:[%s4666_s22 + $0xc0] sm:$0xff]  ;;  %v438_v3 = vpack.c.bf16 %v418_v1, %v416_v0  ;;  %v414_v4 = vld [vmem:[%s4666_s22 + $0xd0] sm:$0xff]  ;;  %v419_v29 = vld [vmem:[%s4666_s22 + $0xf8] sm:$0xff] }
  0x12   : > { %v436_v5 = vpack.c.bf16 %v414_v4, %v412_v2  ;;  %v408_v7 = vld [vmem:[%s4666_s22 + $0xa0] sm:$0xff]  ;;  %v410_v8 = vld [vmem:[%s4666_s22 + $0xb0] sm:$0xff]  ;;  %v439_v31 = vpack.c.bf16 %v419_v29, %v417_v28  ;;  %v413_v32 = vld [vmem:[%s4666_s22 + $0xc8] sm:$0xff] }
  0x13   : > { %476 = vmatpush.bf16.msra.mxu1 %v438_v3  ;;  %v434_v10 = vpack.c.bf16 %v410_v8, %v408_v7  ;;  %v404_v11 = vld [vmem:[%s4666_s22 + $0x80] sm:$0xff]  ;;  %v406_v12 = vld [vmem:[%s4666_s22 + $0x90] sm:$0xff]  ;;  %v415_v33 = vld [vmem:[%s4666_s22 + $0xd8] sm:$0xff]  ;;  %v4588_v8 = vmov 0.0  }
  0x14   : > { %v432_v13 = vpack.c.bf16 %v406_v12, %v404_v11  ;;  %v400_v14 = vld [vmem:[%s4666_s22 + $0x60] sm:$0xff]  ;;  %v402_v15 = vld [vmem:[%s4666_s22 + $0x70] sm:$0xff]  ;;  %v437_v35 = vpack.c.bf16 %v415_v33, %v413_v32  ;;  %v409_v36 = vld [vmem:[%s4666_s22 + $0xa8] sm:$0xff]  ;;  %589 = vst.msk [vmem:[#allocation2 + $0x10] sm:$0xff] %vm586_vm0, %v4588_v8 }
  0x15   : > { %v430_v17 = vpack.c.bf16 %v402_v15, %v400_v14  ;;  %451 = vperm.xlu0 %3867, %v441_v16   ;;  %v396_v18 = vld [vmem:[%s4666_s22 + $0x40] sm:$0xff]  ;;  %v398_v19 = vld [vmem:[%s4666_s22 + $0x50] sm:$0xff]  ;;  %461 = vperm.xlu1 %3868, %v443_v27   ;;  %v411_v37 = vld [vmem:[%s4666_s22 + $0xb8] sm:$0xff]  ;;  %590 = vst.msk [vmem:[#allocation2 + $0x18] sm:$0xff] %vm586_vm0, %v4588_v8 }
  0x16   : > { %v428_v21 = vpack.c.bf16 %v398_v19, %v396_v18  ;;  %v392_v22 = vld [vmem:[%s4666_s22 + $0x20] sm:$0xff]  ;;  %v394_v23 = vld [vmem:[%s4666_s22 + $0x30] sm:$0xff]  ;;  %v435_v38 = vpack.c.bf16 %v411_v37, %v409_v36  ;;  %v405_v39 = vld [vmem:[%s4666_s22 + $0x88] sm:$0xff]  ;;  %587 = vst.msk [vmem:[#allocation2] sm:$0xff] %vm586_vm0, %v4588_v8 }
  0x17   : > { %477 = vmatpush.bf16.msra.mxu1 %v436_v5  ;;  %v426_v24 = vpack.c.bf16 %v394_v23, %v392_v22  ;;  %v388_v25 = vld [vmem:[%s4666_s22] sm:$0xff]  ;;  %v390_v26 = vld [vmem:[%s4666_s22 + $0x10] sm:$0xff]  ;;  %v407_v40 = vld [vmem:[%s4666_s22 + $0x98] sm:$0xff]  ;;  %588 = vst.msk [vmem:[#allocation2 + $0x8] sm:$0xff] %vm586_vm0, %v4588_v8 }
  0x18   : > { %v424_v30 = vpack.c.bf16 %v390_v26, %v388_v25  ;;  %v433_v41 = vpack.c.bf16 %v407_v40, %v405_v39  ;;  %v401_v42 = vld [vmem:[%s4666_s22 + $0x68] sm:$0xff]  ;;  %v403_v43 = vld [vmem:[%s4666_s22 + $0x78] sm:$0xff]  ;;  %591 = vst.msk [vmem:[#allocation2 + $0x20] sm:$0xff] %vm586_vm0, %v4588_v8 }
  0x19   : > { %v431_v44 = vpack.c.bf16 %v403_v43, %v401_v42  ;;  %v397_v45 = vld [vmem:[%s4666_s22 + $0x48] sm:$0xff]  ;;  %v399_v46 = vld [vmem:[%s4666_s22 + $0x58] sm:$0xff]  ;;  %592 = vst.msk [vmem:[#allocation2 + $0x28] sm:$0xff] %vm586_vm0, %v4588_v8 }
  0x1a   : > { %v429_v48 = vpack.c.bf16 %v399_v46, %v397_v45  ;;  %v393_v49 = vld [vmem:[%s4666_s22 + $0x28] sm:$0xff]  ;;  %v395_v50 = vld [vmem:[%s4666_s22 + $0x38] sm:$0xff]  ;;  %593 = vst.msk [vmem:[#allocation2 + $0x30] sm:$0xff] %vm586_vm0, %v4588_v8 }
  0x1b   : > { %478 = vmatpush.bf16.msra.mxu1 %v434_v10  ;;  %v427_v51 = vpack.c.bf16 %v395_v50, %v393_v49  ;;  %v389_v52 = vld [vmem:[%s4666_s22 + $0x8] sm:$0xff]  ;;  %v391_v53 = vld [vmem:[%s4666_s22 + $0x18] sm:$0xff]  ;;  %594 = vst.msk [vmem:[#allocation2 + $0x38] sm:$0xff] %vm586_vm0, %v4588_v8 }
  0x1c   : > { %v425_v54 = vpack.c.bf16 %v391_v53, %v389_v52  ;;  %595 = vst.msk [vmem:[#allocation2 + $0x40] sm:$0xff] %vm586_vm0, %v4588_v8 }
  0x1d   : > { %596 = vst.msk [vmem:[#allocation2 + $0x48] sm:$0xff] %vm586_vm0, %v4588_v8 }
  0x1e   : > { %597 = vst.msk [vmem:[#allocation2 + $0x50] sm:$0xff] %vm586_vm0, %v4588_v8  ;;  %v926_v29 = vld [vmem:[#allocation2 + $0x2] sm:$0xff] }
  0x1f   : > { %479 = vmatpush.bf16.msra.mxu1 %v432_v13  ;;  %598 = vst.msk [vmem:[#allocation2 + $0x58] sm:$0xff] %vm586_vm0, %v4588_v8 }
  0x20   : > { %599 = vst.msk [vmem:[#allocation2 + $0x60] sm:$0xff] %vm586_vm0, %v4588_v8 }
  0x21   : > { %600 = vst.msk [vmem:[#allocation2 + $0x68] sm:$0xff] %vm586_vm0, %v4588_v8 }
  0x22   : > { %601 = vst.msk [vmem:[#allocation2 + $0x70] sm:$0xff] %vm586_vm0, %v4588_v8 }
  0x23   : > { %480 = vmatpush.bf16.msra.mxu1 %v430_v17  ;;  %602 = vst.msk [vmem:[#allocation2 + $0x78] sm:$0xff] %vm586_vm0, %v4588_v8 }
  0x24   : > { %603 = vst.msk [vmem:[#allocation2 + $0x80] sm:$0xff] %vm586_vm0, %v4588_v8 }
  0x25   : > { %604 = vst.msk [vmem:[#allocation2 + $0x88] sm:$0xff] %vm586_vm0, %v4588_v8 }
  0x26   : > { %605 = vst.msk [vmem:[#allocation2 + $0x90] sm:$0xff] %vm586_vm0, %v4588_v8 }
  0x27   : > { %481 = vmatpush.bf16.msra.mxu1 %v428_v21  ;;  %606 = vst.msk [vmem:[#allocation2 + $0x98] sm:$0xff] %vm586_vm0, %v4588_v8 }
  0x28   : > { %607 = vst.msk [vmem:[#allocation2 + $0xa0] sm:$0xff] %vm586_vm0, %v4588_v8 }
  0x29   : > { %608 = vst.msk [vmem:[#allocation2 + $0xa8] sm:$0xff] %vm586_vm0, %v4588_v8 }
  0x2a   : > { %609 = vst.msk [vmem:[#allocation2 + $0xb0] sm:$0xff] %vm586_vm0, %v4588_v8 }
  0x2b   : > { %482 = vmatpush.bf16.msra.mxu1 %v426_v24  ;;  %610 = vst.msk [vmem:[#allocation2 + $0xb8] sm:$0xff] %vm586_vm0, %v4588_v8 }
  0x2c   : > { %611 = vst.msk [vmem:[#allocation2 + $0xc0] sm:$0xff] %vm586_vm0, %v4588_v8 }
  0x2d   : > { %612 = vst.msk [vmem:[#allocation2 + $0xc8] sm:$0xff] %vm586_vm0, %v4588_v8 }
  0x2e   : > { %613 = vst.msk [vmem:[#allocation2 + $0xd0] sm:$0xff] %vm586_vm0, %v4588_v8 }
  0x2f   : > { %483 = vmatpush.bf16.msra.mxu1 %v424_v30  ;;  %614 = vst.msk [vmem:[#allocation2 + $0xd8] sm:$0xff] %vm586_vm0, %v4588_v8 }
  0x30   : > { %615 = vst.msk [vmem:[#allocation2 + $0xe0] sm:$0xff] %vm586_vm0, %v4588_v8 }
  0x31   : > { %616 = vst.msk [vmem:[#allocation2 + $0xe8] sm:$0xff] %vm586_vm0, %v4588_v8 }
  0x32   : > { %484 = vmatmul.bf16.vlgmr.msra.gmra.mxu1 %v3832_v34  ;;  %617 = vst.msk [vmem:[#allocation2 + $0xf0] sm:$0xff] %vm586_vm0, %v4588_v8 }
  0x33   : > { %495 = vmatpush.bf16.msrb.mxu1 %v439_v31  ;;  %618 = vst.msk [vmem:[#allocation2 + $0xf8] sm:$0xff] %vm586_vm0, %v4588_v8 }
  0x34   : > { %619 = vst.msk [vmem:[#allocation2 + $0x100] sm:$0xff] %vm586_vm0, %v4588_v8 }
  0x35   : > { %620 = vst.msk [vmem:[#allocation2 + $0x108] sm:$0xff] %vm586_vm0, %v4588_v8 }
  0x36   : > { %621 = vst.msk [vmem:[#allocation2 + $0x110] sm:$0xff] %vm586_vm0, %v4588_v8 }
  0x37   : > { %496 = vmatpush.bf16.msrb.mxu1 %v437_v35  ;;  %622 = vst.msk [vmem:[#allocation2 + $0x118] sm:$0xff] %vm586_vm0, %v4588_v8  ;;  %v927_v35 = vld [vmem:[#allocation2 + $0xa] sm:$0xff] }
  0x38   : > { %623 = vst.msk [vmem:[#allocation2 + $0x120] sm:$0xff] %vm586_vm0, %v4588_v8 }
  0x39   : > { %624 = vst.msk [vmem:[#allocation2 + $0x128] sm:$0xff] %vm586_vm0, %v4588_v8 }
  0x3a   : > { %625 = vst.msk [vmem:[#allocation2 + $0x130] sm:$0xff] %vm586_vm0, %v4588_v8 }
  0x3b   : > { %497 = vmatpush.bf16.msrb.mxu1 %v435_v38  ;;  %626 = vst.msk [vmem:[#allocation2 + $0x138] sm:$0xff] %vm586_vm0, %v4588_v8 }
  0x3c   : > { %627 = vst.msk [vmem:[#allocation2 + $0x140] sm:$0xff] %vm586_vm0, %v4588_v8 }
  0x3f   : > { %498 = vmatpush.bf16.msrb.mxu1 %v433_v41 }
  0x42   : > { %489 = vmatmul.bf16.gmra.mxu1 %v3833_v47 }
  0x43   : > { %499 = vmatpush.bf16.msrb.mxu1 %v431_v44 }
  0x47   : > { %500 = vmatpush.bf16.msrb.mxu1 %v429_v48 }
  0x4b   : > { %501 = vmatpush.bf16.msrb.mxu1 %v427_v51 }
  0x4f   : > { %502 = vmatpush.bf16.msrb.mxu1 %v425_v54 }
  0x52   : > { %503 = vmatmul.bf16.vlgmr.msrb.gmra.mxu1 %v3832_v34 }
  0x62   : > { %508 = vmatmul.bf16.gmra.mxu1 %v3833_v47 }
  0x7f   : > { %v447_v55 = vpop.permute.xlu0 %446  ;;  %v457_v63 = vpop.permute.xlu1 %456 }
  0x87   : > { %v452_v59 = vpop.permute.xlu0 %451  ;;  %v462_v3 = vpop.permute.xlu1 %461 }
  0xaf   : > { %v485_v56 = vpop.f32.mrf.mxu1 }
  0xb0   : > { %v486_v57 = vadd.f32 %v485_v56, %v447_v55 }
  0xb2   : > { %v514_v58 = vmax.f32 %v486_v57, 0.0 }
  0xb4   : > { %522 = vxpose.xlu2.b32.start [1/4] (short) %v514_v58, 128 }
  0xb7   : > { %v487_v60 = vpop.f32.mrf.mxu1 }
  0xb8   : > { %v488_v61 = vadd.f32 %v487_v60, %v452_v59 }
  0xba   : > { %v516_v62 = vmax.f32 %v488_v61, 0.0 }
  0xbc   : > { %523 = vxpose.xlu2.b32.cont [2/4] (short) %v516_v62, 128 }
  0xbf   : > { %v490_v0 = vpop.f32.mrf.mxu1 }
  0xc0   : > { %v491_v1 = vadd.f32 %v490_v0, %v457_v63 }
  0xc2   : > { %v518_v2 = vmax.f32 %v491_v1, 0.0 }
  0xc4   : > { %524 = vxpose.xlu2.b32.cont [3/4] (short) %v518_v2, 128 }
  0xc7   : > { %v492_v4 = vpop.f32.mrf.mxu1 }
  0xc8   : > { %v493_v5 = vadd.f32 %v492_v4, %v462_v3 }
  0xca   : > { %v520_v7 = vmax.f32 %v493_v5, 0.0 }
  0xcc   : > { %525 = vxpose.xlu2.b32.end [4/4] (short) %v520_v7, 128 }
  0xcf   : > { %v504_v9 = vpop.f32.mrf.mxu1 }
  0xd0   : > { %v505_v10 = vadd.f32 %v504_v9, %v447_v55 }
  0xd2   : > { %v515_v11 = vmax.f32 %v505_v10, 0.0 }
  0xd4   : > { %554 = vxpose.xlu0.b32.start [1/4] (short) %v515_v11, 128 }
  0xd7   : > { %v506_v12 = vpop.f32.mrf.mxu1 }
  0xd8   : > { %v507_v13 = vadd.f32 %v506_v12, %v452_v59 }
  0xda   : > { %v517_v14 = vmax.f32 %v507_v13, 0.0 }
  0xdc   : > { %555 = vxpose.xlu0.b32.cont [2/4] (short) %v517_v14, 128 }
  0xdf   : > { %v509_v15 = vpop.f32.mrf.mxu1 }
  0xe0   : > { %v510_v16 = vadd.f32 %v509_v15, %v457_v63 }
  0xe2   : > { %v519_v17 = vmax.f32 %v510_v16, 0.0 }
  0xe4   : > { %556 = vxpose.xlu0.b32.cont [3/4] (short) %v519_v17, 128 }
  0xe7   : > { %v511_v18 = vpop.f32.mrf.mxu1 }
  0xe8   : > { %v512_v19 = vadd.f32 %v511_v18, %v462_v3 }
  0xea   : > { %v521_v20 = vmax.f32 %v512_v19, 0.0 }
  0xec   : > { %557 = vxpose.xlu0.b32.end [4/4] (short) %v521_v20, 128 }
 0x14d   : > { %v538_v21 = vpop.trf.xlu2 }
 0x14e   : > { %630 = vst.msk [vmem:[#allocation2 + $0x13] sm:$0xff] %vm586_vm0, %v538_v21 }
 0x155   : > { %v539_v22 = vpop.trf.xlu2  ;;  %v1190_v24 = vld [vmem:[#allocation2 + $0x13] sm:$0xff] }
 0x156   : > { %631 = vst.msk [vmem:[#allocation2 + $0x1b] sm:$0xff] %vm586_vm0, %v539_v22  ;;  %v4766_v42 = vld [vmem:[#allocation2 + $0x12] sm:$0xff] }
 0x15d   : > { %v540_v23 = vpop.trf.xlu2  ;;  %v1322_v25 = vld [vmem:[#allocation2 + $0x14] sm:$0xff]  ;;  %v1323_v28 = vld [vmem:[#allocation2 + $0x1c] sm:$0xff] }
 0x15e   : > { %632 = vst.msk [vmem:[#allocation2 + $0x25] sm:$0xff] %vm586_vm0, %v540_v23  ;;  %v3869_v26 = vpack.i.bf16 %v1190_v24, %v1322_v25  ;;  %v1191_v27 = vld [vmem:[#allocation2 + $0x1b] sm:$0xff] }
 0x15f   : > { %v3871_v32 = vpack.i.bf16 %v1191_v27, %v1323_v28  ;;  %v4771_v49 = vld [vmem:[#allocation2 + $0x1a] sm:$0xff] }
 0x160   : > { %3870 = vxpose.xlu2.b32.start [1/16] (narrow) %v3869_v26, 32 }
 0x165   : > { %v541_v30 = vpop.trf.xlu2  ;;  %v1454_v31 = vld [vmem:[#allocation2 + $0x24] sm:$0xff] }
 0x166   : > { %633 = vst.msk [vmem:[#allocation2 + $0x2d] sm:$0xff] %vm586_vm0, %v541_v30  ;;  %v3973_v33 = vpack.i.bf16 %v1454_v31, %v926_v29  ;;  %v1192_v34 = vld [vmem:[#allocation2 + $0x23] sm:$0xff] }
 0x167   : > { %v3873_v38 = vpack.i.bf16 %v1192_v34, %v1454_v31  ;;  %v4776_v56 = vld [vmem:[#allocation2 + $0x22] sm:$0xff] }
 0x168   : > { %3872 = vxpose.xlu2.b32.cont [2/16] (narrow) %v3871_v32, 32  ;;  %3974 = vxpose.xlu1.b32.start [1/16] (narrow) %v3973_v33, 32 }
 0x16d   : > { %v542_v36 = vpop.trf.xlu2  ;;  %v1455_v37 = vld [vmem:[#allocation2 + $0x2c] sm:$0xff] }
 0x16e   : > { %634 = vst.msk [vmem:[#allocation2 + $0x37] sm:$0xff] %vm586_vm0, %v542_v36  ;;  %v3975_v39 = vpack.i.bf16 %v1455_v37, %v927_v35  ;;  %v1193_v40 = vld [vmem:[#allocation2 + $0x2b] sm:$0xff] }
 0x16f   : > { %v3875_v44 = vpack.i.bf16 %v1193_v40, %v1455_v37  ;;  %v1718_v62 = vld [vmem:[#allocation2 + $0x26] sm:$0xff]  ;;  %v1719_v9 = vld [vmem:[#allocation2 + $0x2e] sm:$0xff] }
 0x170   : > { %3874 = vxpose.xlu2.b32.cont [3/16] (narrow) %v3873_v38, 32  ;;  %3976 = vxpose.xlu1.b32.cont [2/16] (narrow) %v3975_v39, 32  ;;  %v4781_v2 = vld [vmem:[#allocation2 + $0x2a] sm:$0xff] }
 0x175   : > { %v543_v41 = vpop.trf.xlu2  ;;  %v1456_v43 = vld [vmem:[#allocation2 + $0x34] sm:$0xff] }
 0x176   : > { %635 = vst.msk [vmem:[#allocation2 + $0x3f] sm:$0xff] %vm586_vm0, %v543_v41  ;;  %v3977_v45 = vpack.i.bf16 %v1456_v43, %v4766_v42  ;;  %v1194_v47 = vld [vmem:[#allocation2 + $0x33] sm:$0xff] }
 0x177   : > { %v3877_v51 = vpack.i.bf16 %v1194_v47, %v1456_v43  ;;  %v4786_v13 = vld [vmem:[#allocation2 + $0x32] sm:$0xff] }
 0x178   : > { %v570_v46 = vpop.trf.xlu0  ;;  %3876 = vxpose.xlu2.b32.cont [4/16] (narrow) %v3875_v44, 32  ;;  %3978 = vxpose.xlu1.b32.cont [3/16] (narrow) %v3977_v45, 32  ;;  %v1720_v19 = vld [vmem:[#allocation2 + $0x36] sm:$0xff] }
 0x179   : > { %646 = vst.msk [vmem:[#allocation2 + $0xa3] sm:$0xff] %vm586_vm0, %v570_v46 }
 0x17d   : > { %v544_v48 = vpop.trf.xlu2  ;;  %v1457_v50 = vld [vmem:[#allocation2 + $0x3c] sm:$0xff] }
 0x17e   : > { %636 = vst.msk [vmem:[#allocation2 + $0x49] sm:$0xff] %vm586_vm0, %v544_v48  ;;  %v3979_v52 = vpack.i.bf16 %v1457_v50, %v4771_v49  ;;  %v1195_v54 = vld [vmem:[#allocation2 + $0x3b] sm:$0xff] }
 0x17f   : > { %v3879_v58 = vpack.i.bf16 %v1195_v54, %v1457_v50  ;;  %v4791_v23 = vld [vmem:[#allocation2 + $0x3a] sm:$0xff] }
 0x180   : > { %v571_v53 = vpop.trf.xlu0  ;;  %3878 = vxpose.xlu2.b32.cont [5/16] (narrow) %v3877_v51, 32  ;;  %3980 = vxpose.xlu1.b32.cont [4/16] (narrow) %v3979_v52, 32  ;;  %v1721_v29 = vld [vmem:[#allocation2 + $0x3e] sm:$0xff] }
 0x181   : > { %647 = vst.msk [vmem:[#allocation2 + $0xab] sm:$0xff] %vm586_vm0, %v571_v53 }
 0x185   : > { %v545_v55 = vpop.trf.xlu2  ;;  %v1458_v57 = vld [vmem:[#allocation2 + $0x44] sm:$0xff] }
 0x186   : > { %637 = vst.msk [vmem:[#allocation2 + $0x51] sm:$0xff] %vm586_vm0, %v545_v55  ;;  %v3981_v59 = vpack.i.bf16 %v1458_v57, %v4776_v56  ;;  %v1196_v0 = vld [vmem:[#allocation2 + $0x43] sm:$0xff] }
 0x187   : > { %v3881_v4 = vpack.i.bf16 %v1196_v0, %v1458_v57  ;;  %v4796_v33 = vld [vmem:[#allocation2 + $0x42] sm:$0xff] }
 0x188   : > { %v572_v60 = vpop.trf.xlu0  ;;  %3880 = vxpose.xlu2.b32.cont [6/16] (narrow) %v3879_v58, 32  ;;  %3982 = vxpose.xlu1.b32.cont [5/16] (narrow) %v3981_v59, 32  ;;  %v1602_v61 = vld [vmem:[#allocation2 + $0xa5] sm:$0xff]  ;;  %v1603_v7 = vld [vmem:[#allocation2 + $0xad] sm:$0xff] }
 0x189   : > { %648 = vst.msk [vmem:[#allocation2 + $0xb5] sm:$0xff] %vm586_vm0, %v572_v60  ;;  %v4025_v63 = vpack.i.bf16 %v1602_v61, %v1718_v62  ;;  %v4027_v10 = vpack.i.bf16 %v1603_v7, %v1719_v9  ;;  %v1722_v39 = vld [vmem:[#allocation2 + $0x46] sm:$0xff] }
 0x18b   : > { %4026 = vxpose.xlu0.b32.start [1/16] (narrow) %v4025_v63, 32 }
 0x18d   : > { %v546_v1 = vpop.trf.xlu2  ;;  %v1459_v3 = vld [vmem:[#allocation2 + $0x4c] sm:$0xff] }
 0x18e   : > { %638 = vst.msk [vmem:[#allocation2 + $0x5b] sm:$0xff] %vm586_vm0, %v546_v1  ;;  %v3983_v5 = vpack.i.bf16 %v1459_v3, %v4781_v2  ;;  %v1197_v11 = vld [vmem:[#allocation2 + $0x4b] sm:$0xff]  ;;  %v1198_v22 = vld [vmem:[#allocation2 + $0x53] sm:$0xff] }
 0x18f   : > { %v3883_v15 = vpack.i.bf16 %v1197_v11, %v1459_v3  ;;  %v4801_v45 = vld [vmem:[#allocation2 + $0x4a] sm:$0xff]  ;;  %v4806_v57 = vld [vmem:[#allocation2 + $0x52] sm:$0xff] }
 0x190   : > { %v573_v8 = vpop.trf.xlu0  ;;  %3882 = vxpose.xlu2.b32.cont [7/16] (narrow) %v3881_v4, 32  ;;  %3984 = vxpose.xlu1.b32.cont [6/16] (narrow) %v3983_v5, 32  ;;  %v1604_v17 = vld [vmem:[#allocation2 + $0xb5] sm:$0xff] }
 0x191   : > { %649 = vst.msk [vmem:[#allocation2 + $0xbd] sm:$0xff] %vm586_vm0, %v573_v8  ;;  %v4029_v20 = vpack.i.bf16 %v1604_v17, %v1720_v19  ;;  %v1723_v51 = vld [vmem:[#allocation2 + $0x4e] sm:$0xff] }
 0x193   : > { %4028 = vxpose.xlu0.b32.cont [2/16] (narrow) %v4027_v10, 32 }
 0x195   : > { %v547_v12 = vpop.trf.xlu2  ;;  %v1460_v14 = vld [vmem:[#allocation2 + $0x54] sm:$0xff] }
 0x196   : > { %639 = vst.msk [vmem:[#allocation2 + $0x63] sm:$0xff] %vm586_vm0, %v547_v12  ;;  %v3985_v16 = vpack.i.bf16 %v1460_v14, %v4786_v13  ;;  %v3885_v25 = vpack.i.bf16 %v1198_v22, %v1460_v14  ;;  %v1199_v34 = vld [vmem:[#allocation2 + $0x5b] sm:$0xff] }
 0x197   : > { %v1724_v62 = vld [vmem:[#allocation2 + $0x56] sm:$0xff] }
 0x198   : > { %v574_v18 = vpop.trf.xlu0  ;;  %3884 = vxpose.xlu2.b32.cont [8/16] (narrow) %v3883_v15, 32  ;;  %3986 = vxpose.xlu1.b32.cont [7/16] (narrow) %v3985_v16, 32  ;;  %v1605_v27 = vld [vmem:[#allocation2 + $0xbd] sm:$0xff] }
 0x199   : > { %650 = vst.msk [vmem:[#allocation2 + $0xc7] sm:$0xff] %vm586_vm0, %v574_v18  ;;  %v4031_v30 = vpack.i.bf16 %v1605_v27, %v1721_v29  ;;  %v4811_v4 = vld [vmem:[#allocation2 + $0x5a] sm:$0xff] }
 0x19b   : > { %4030 = vxpose.xlu0.b32.cont [3/16] (narrow) %v4029_v20, 32 }
 0x19d   : > { %v548_v21 = vpop.trf.xlu2  ;;  %v1461_v24 = vld [vmem:[#allocation2 + $0x5c] sm:$0xff]  ;;  %v1462_v31 = vld [vmem:[#allocation2 + $0x64] sm:$0xff] }
 0x19e   : > { %640 = vst.msk [vmem:[#allocation2 + $0x6d] sm:$0xff] %vm586_vm0, %v548_v21  ;;  %v3987_v26 = vpack.i.bf16 %v1461_v24, %v4791_v23  ;;  %v3989_v35 = vpack.i.bf16 %v1462_v31, %v4796_v33  ;;  %v3887_v36 = vpack.i.bf16 %v1199_v34, %v1461_v24  ;;  %v1200_v41 = vld [vmem:[#allocation2 + $0x63] sm:$0xff] }
 0x19f   : > { %v3889_v46 = vpack.i.bf16 %v1200_v41, %v1462_v31  ;;  %v1725_v10 = vld [vmem:[#allocation2 + $0x5e] sm:$0xff] }
 0x1a0   : > { %v575_v28 = vpop.trf.xlu0  ;;  %3886 = vxpose.xlu2.b32.cont [9/16] (narrow) %v3885_v25, 32  ;;  %3988 = vxpose.xlu1.b32.cont [8/16] (narrow) %v3987_v26, 32  ;;  %v1606_v37 = vld [vmem:[#allocation2 + $0xc5] sm:$0xff] }
 0x1a1   : > { %651 = vst.msk [vmem:[#allocation2 + $0xcf] sm:$0xff] %vm586_vm0, %v575_v28  ;;  %v4033_v40 = vpack.i.bf16 %v1606_v37, %v1722_v39  ;;  %v4816_v16 = vld [vmem:[#allocation2 + $0x62] sm:$0xff] }
 0x1a3   : > { %4032 = vxpose.xlu0.b32.cont [4/16] (narrow) %v4031_v30, 32 }
 0x1a5   : > { %v549_v32 = vpop.trf.xlu2  ;;  %v1463_v43 = vld [vmem:[#allocation2 + $0x6c] sm:$0xff] }
 0x1a6   : > { %641 = vst.msk [vmem:[#allocation2 + $0x75] sm:$0xff] %vm586_vm0, %v549_v32  ;;  %v3991_v47 = vpack.i.bf16 %v1463_v43, %v4801_v45  ;;  %v1201_v53 = vld [vmem:[#allocation2 + $0x6b] sm:$0xff] }
 0x1a7   : > { %v3891_v58 = vpack.i.bf16 %v1201_v53, %v1463_v43  ;;  %v1726_v21 = vld [vmem:[#allocation2 + $0x66] sm:$0xff] }
 0x1a8   : > { %v576_v38 = vpop.trf.xlu0  ;;  %3990 = vxpose.xlu1.b32.cont [9/16] (narrow) %v3989_v35, 32  ;;  %3888 = vxpose.xlu2.b32.cont [10/16] (narrow) %v3887_v36, 32  ;;  %v1607_v48 = vld [vmem:[#allocation2 + $0xcd] sm:$0xff] }
 0x1a9   : > { %652 = vst.msk [vmem:[#allocation2 + $0xd9] sm:$0xff] %vm586_vm0, %v576_v38  ;;  %v4035_v52 = vpack.i.bf16 %v1607_v48, %v1723_v51  ;;  %v4821_v26 = vld [vmem:[#allocation2 + $0x6a] sm:$0xff] }
 0x1ab   : > { %4034 = vxpose.xlu0.b32.cont [5/16] (narrow) %v4033_v40, 32 }
 0x1ad   : > { %v550_v44 = vpop.trf.xlu2  ;;  %v1464_v54 = vld [vmem:[#allocation2 + $0x74] sm:$0xff] }
 0x1ae   : > { %642 = vst.msk [vmem:[#allocation2 + $0x7f] sm:$0xff] %vm586_vm0, %v550_v44  ;;  %v3993_v59 = vpack.i.bf16 %v1464_v54, %v4806_v57  ;;  %v1202_v0 = vld [vmem:[#allocation2 + $0x73] sm:$0xff]  ;;  %v1586_v44 = vld [vmem:[#allocation2 + $0x25] sm:$0xff] }
 0x1af   : > { %v3893_v5 = vpack.i.bf16 %v1202_v0, %v1464_v54  ;;  %v1727_v31 = vld [vmem:[#allocation2 + $0x6e] sm:$0xff]  ;;  %v1728_v41 = vld [vmem:[#allocation2 + $0x76] sm:$0xff]  ;;  %v3921_v48 = vpack.i.bf16 %v1586_v44, %v4766_v42 }
 0x1b0   : > { %v577_v50 = vpop.trf.xlu0  ;;  %3890 = vxpose.xlu2.b32.cont [11/16] (narrow) %v3889_v46, 32  ;;  %3992 = vxpose.xlu1.b32.cont [10/16] (narrow) %v3991_v47, 32  ;;  %v1608_v60 = vld [vmem:[#allocation2 + $0xd5] sm:$0xff] }
 0x1b1   : > { %653 = vst.msk [vmem:[#allocation2 + $0xe1] sm:$0xff] %vm586_vm0, %v577_v50  ;;  %v4037_v63 = vpack.i.bf16 %v1608_v60, %v1724_v62  ;;  %v4827_v36 = vld [vmem:[#allocation2 + $0x72] sm:$0xff] }
 0x1b3   : > { %4036 = vxpose.xlu0.b32.cont [6/16] (narrow) %v4035_v52, 32 }
 0x1b5   : > { %v551_v55 = vpop.trf.xlu2  ;;  %v1465_v1 = vld [vmem:[#allocation2 + $0x7c] sm:$0xff] }
 0x1b6   : > { %643 = vst.msk [vmem:[#allocation2 + $0x87] sm:$0xff] %vm586_vm0, %v551_v55  ;;  %v3995_v7 = vpack.i.bf16 %v1465_v1, %v4811_v4  ;;  %v1203_v12 = vld [vmem:[#allocation2 + $0x7b] sm:$0xff]  ;;  %v1587_v55 = vld [vmem:[#allocation2 + $0x2d] sm:$0xff] }
 0x1b7   : > { %v3895_v17 = vpack.i.bf16 %v1203_v12, %v1465_v1  ;;  %v4834_v47 = vld [vmem:[#allocation2 + $0x7a] sm:$0xff]  ;;  %v3923_v60 = vpack.i.bf16 %v1587_v55, %v4771_v49 }
 0x1b8   : > { %v578_v61 = vpop.trf.xlu0  ;;  %3892 = vxpose.xlu2.b32.cont [12/16] (narrow) %v3891_v58, 32  ;;  %3994 = vxpose.xlu1.b32.cont [11/16] (narrow) %v3993_v59, 32  ;;  %v1609_v8 = vld [vmem:[#allocation2 + $0xdd] sm:$0xff]  ;;  %v1588_v1 = vld [vmem:[#allocation2 + $0x35] sm:$0xff] }
 0x1b9   : > { %654 = vst.msk [vmem:[#allocation2 + $0xeb] sm:$0xff] %vm586_vm0, %v578_v61  ;;  %v4039_v11 = vpack.i.bf16 %v1609_v8, %v1725_v10  ;;  %v1729_v53 = vld [vmem:[#allocation2 + $0x7e] sm:$0xff] }
 0x1ba   : > { %v662_v58 = vld [vmem:[#allocation2] sm:$0xff] }
 0x1bb   : > { %4038 = vxpose.xlu0.b32.cont [7/16] (narrow) %v4037_v63, 32 }
 0x1bd   : > { %v552_v3 = vpop.trf.xlu2  ;;  %v1466_v14 = vld [vmem:[#allocation2 + $0x84] sm:$0xff] }
 0x1be   : > { %644 = vst.msk [vmem:[#allocation2 + $0x91] sm:$0xff] %vm586_vm0, %v552_v3  ;;  %v3997_v18 = vpack.i.bf16 %v1466_v14, %v4816_v16  ;;  %v1204_v24 = vld [vmem:[#allocation2 + $0x83] sm:$0xff] }
 0x1bf   : > { %v3897_v27 = vpack.i.bf16 %v1204_v24, %v1466_v14  ;;  %v678_v59 = vld [vmem:[#allocation2 + $0x80] sm:$0xff]  ;;  %v663_v3 = vld [vmem:[#allocation2 + $0x8] sm:$0xff]  ;;  %v664_v14 = vld [vmem:[#allocation2 + $0x10] sm:$0xff] }
 0x1c0   : > { %v579_v9 = vpop.trf.xlu0  ;;  %3894 = vxpose.xlu2.b32.cont [13/16] (narrow) %v3893_v5, 32  ;;  %3996 = vxpose.xlu1.b32.cont [12/16] (narrow) %v3995_v7, 32  ;;  %v1610_v19 = vld [vmem:[#allocation2 + $0xe5] sm:$0xff]  ;;  %v4105_v61 = vpack.i.bf16 %v678_v59, %v662_v58  ;;  %v3925_v7 = vpack.i.bf16 %v1588_v1, %v4776_v56  ;;  %v796_v59 = vld [vmem:[#allocation2 + $0x11] sm:$0xff]  ;;  %v797_v1 = vld [vmem:[#allocation2 + $0x19] sm:$0xff] }
 0x1c1   : > { %655 = vst.msk [vmem:[#allocation2 + $0xf3] sm:$0xff] %vm586_vm0, %v579_v9  ;;  %v4041_v22 = vpack.i.bf16 %v1610_v19, %v1726_v21  ;;  %v1730_v63 = vld [vmem:[#allocation2 + $0x86] sm:$0xff] }
 0x1c2   : > { %v679_v5 = vld [vmem:[#allocation2 + $0x88] sm:$0xff] }
 0x1c3   : > { %4040 = vxpose.xlu0.b32.cont [8/16] (narrow) %v4039_v11, 32  ;;  %v4107_v8 = vpack.i.bf16 %v679_v5, %v663_v3  ;;  %v1589_v11 = vld [vmem:[#allocation2 + $0x3d] sm:$0xff]  ;;  %v1590_v56 = vld [vmem:[#allocation2 + $0x45] sm:$0xff] }
 0x1c4   : > { %v3929_v24 = vpack.i.bf16 %v1590_v56, %v4786_v13  ;;  %v1592_v13 = vld [vmem:[#allocation2 + $0x55] sm:$0xff]  ;;  %v686_v5 = vld [vmem:[#allocation2 + $0xc0] sm:$0xff] }
 0x1c5   : > { %v553_v15 = vpop.trf.xlu2  ;;  %v1467_v25 = vld [vmem:[#allocation2 + $0x8c] sm:$0xff] }
 0x1c6   : > { %645 = vst.msk [vmem:[#allocation2 + $0x99] sm:$0xff] %vm586_vm0, %v553_v15  ;;  %v3999_v28 = vpack.i.bf16 %v1467_v25, %v4821_v26  ;;  %v1205_v34 = vld [vmem:[#allocation2 + $0x8b] sm:$0xff]  ;;  %v3927_v15 = vpack.i.bf16 %v1589_v11, %v4781_v2 }
 0x1c7   : > { %v3899_v37 = vpack.i.bf16 %v1205_v34, %v1467_v25  ;;  %v1731_v49 = vld [vmem:[#allocation2 + $0x8e] sm:$0xff] }
 0x1c8   : > { %v580_v20 = vpop.trf.xlu0  ;;  %3896 = vxpose.xlu2.b32.cont [14/16] (narrow) %v3895_v17, 32  ;;  %3998 = vxpose.xlu1.b32.cont [13/16] (narrow) %v3997_v18, 32  ;;  %v1611_v29 = vld [vmem:[#allocation2 + $0xed] sm:$0xff]  ;;  %v1612_v39 = vld [vmem:[#allocation2 + $0xf5] sm:$0xff] }
 0x1c9   : > { %656 = vst.msk [vmem:[#allocation2 + $0xfd] sm:$0xff] %vm586_vm0, %v580_v20  ;;  %v4043_v32 = vpack.i.bf16 %v1611_v29, %v1727_v31  ;;  %v4045_v43 = vpack.i.bf16 %v1612_v39, %v1728_v41  ;;  %v680_v12 = vld [vmem:[#allocation2 + $0x90] sm:$0xff]  ;;  %v666_v31 = vld [vmem:[#allocation2 + $0x20] sm:$0xff]  ;;  %v667_v41 = vld [vmem:[#allocation2 + $0x28] sm:$0xff] }
 0x1ca   : > { %v4109_v17 = vpack.i.bf16 %v680_v12, %v664_v14  ;;  %v1591_v2 = vld [vmem:[#allocation2 + $0x4d] sm:$0xff] }
 0x1cb   : > { %4042 = vxpose.xlu0.b32.cont [9/16] (narrow) %v4041_v22, 32  ;;  %v665_v22 = vld [vmem:[#allocation2 + $0x18] sm:$0xff]  ;;  %v687_v12 = vld [vmem:[#allocation2 + $0xc8] sm:$0xff]  ;;  %v688_v56 = vld [vmem:[#allocation2 + $0xd0] sm:$0xff] }
 0x1cc   : > { %v812_v58 = vld [vmem:[#allocation2 + $0x91] sm:$0xff]  ;;  %v671_v14 = vld [vmem:[#allocation2 + $0x48] sm:$0xff] }
 0x1cd   : > { %v4825_v35 = vld [vmem:[#allocation2 + $0x94] sm:$0xff]  ;;  %v4832_v46 = vld [vmem:[#allocation2 + $0x9c] sm:$0xff] }
 0x1ce   : > { %v4001_v38 = vpack.i.bf16 %v4825_v35, %v4827_v36  ;;  %v4003_v50 = vpack.i.bf16 %v4832_v46, %v4834_v47  ;;  %v1732_v19 = vld [vmem:[#allocation2 + $0x96] sm:$0xff] }
 0x1cf   : > { %v681_v21 = vld [vmem:[#allocation2 + $0x98] sm:$0xff] }
 0x1d0   : > { %v581_v30 = vpop.trf.xlu0  ;;  %3898 = vxpose.xlu2.b32.cont [15/16] (narrow) %v3897_v27, 32  ;;  %4000 = vxpose.xlu1.b32.cont [14/16] (narrow) %v3999_v28, 32  ;;  %v1613_v51 = vld [vmem:[#allocation2 + $0xfd] sm:$0xff]  ;;  %v4111_v25 = vpack.i.bf16 %v681_v21, %v665_v22  ;;  %v672_v22 = vld [vmem:[#allocation2 + $0x50] sm:$0xff] }
 0x1d1   : > { %657 = vst.msk [vmem:[#allocation2 + $0x105] sm:$0xff] %vm586_vm0, %v581_v30  ;;  %v4047_v54 = vpack.i.bf16 %v1613_v51, %v1729_v53  ;;  %v1733_v28 = vld [vmem:[#allocation2 + $0x9e] sm:$0xff]  ;;  %v668_v53 = vld [vmem:[#allocation2 + $0x30] sm:$0xff] }
 0x1d2   : > { %v682_v30 = vld [vmem:[#allocation2 + $0xa0] sm:$0xff] }
 0x1d3   : > { %4044 = vxpose.xlu0.b32.cont [10/16] (narrow) %v4043_v32, 32  ;;  %v3931_v32 = vpack.i.bf16 %v1591_v2, %v4791_v23  ;;  %v4113_v34 = vpack.i.bf16 %v682_v30, %v666_v31  ;;  %v1593_v23 = vld [vmem:[#allocation2 + $0x5d] sm:$0xff] }
 0x1d4   : > { %v689_v2 = vld [vmem:[#allocation2 + $0xd8] sm:$0xff] }
 0x1d5   : > { %v673_v30 = vld [vmem:[#allocation2 + $0x58] sm:$0xff] }
 0x1d8   : > { %v582_v40 = vpop.trf.xlu0  ;;  %3900 = vxpose.xlu2.b32.end [16/16] (narrow) %v3899_v37, 32  ;;  %4002 = vxpose.xlu1.b32.cont [15/16] (narrow) %v4001_v38, 32  ;;  %v1614_v62 = vld [vmem:[#allocation2 + $0x105] sm:$0xff] }
 0x1d9   : > { %658 = vst.msk [vmem:[#allocation2 + $0x10f] sm:$0xff] %vm586_vm0, %v582_v40  ;;  %v4049_v0 = vpack.i.bf16 %v1614_v62, %v1730_v63  ;;  %v794_v37 = vld [vmem:[#allocation2 + $0x1] sm:$0xff]  ;;  %v669_v62 = vld [vmem:[#allocation2 + $0x38] sm:$0xff] }
 0x1da   : > { %v810_v38 = vld [vmem:[#allocation2 + $0x81] sm:$0xff] }
 0x1db   : > { %4046 = vxpose.xlu0.b32.cont [11/16] (narrow) %v4045_v43, 32  ;;  %v4157_v39 = vpack.i.bf16 %v810_v38, %v794_v37  ;;  %v683_v40 = vld [vmem:[#allocation2 + $0xa8] sm:$0xff]  ;;  %v3933_v43 = vpack.i.bf16 %v1592_v13, %v4796_v33  ;;  %v801_v37 = vld [vmem:[#allocation2 + $0x39] sm:$0xff] }
 0x1dc   : > { %v4115_v44 = vpack.i.bf16 %v683_v40, %v667_v41  ;;  %v1594_v33 = vld [vmem:[#allocation2 + $0x65] sm:$0xff] }
 0x1dd   : > { %v674_v13 = vld [vmem:[#allocation2 + $0x60] sm:$0xff] }
 0x1e0   : > { %v583_v52 = vpop.trf.xlu0  ;;  %3922 = vxpose.xlu2.b32.start [1/16] (narrow) %v3921_v48, 32  ;;  %4004 = vxpose.xlu1.b32.end [16/16] (narrow) %v4003_v50, 32  ;;  %v1615_v9 = vld [vmem:[#allocation2 + $0x10d] sm:$0xff] }
 0x1e1   : > { %659 = vst.msk [vmem:[#allocation2 + $0x117] sm:$0xff] %vm586_vm0, %v583_v52  ;;  %v4051_v10 = vpack.i.bf16 %v1615_v9, %v1731_v49  ;;  %v795_v48 = vld [vmem:[#allocation2 + $0x9] sm:$0xff]  ;;  %v814_v49 = vld [vmem:[#allocation2 + $0xa1] sm:$0xff] }
 0x1e2   : > { %v811_v50 = vld [vmem:[#allocation2 + $0x89] sm:$0xff] }
 0x1e3   : > { %4048 = vxpose.xlu0.b32.cont [12/16] (narrow) %v4047_v54, 32  ;;  %v4159_v51 = vpack.i.bf16 %v811_v50, %v795_v48  ;;  %v684_v52 = vld [vmem:[#allocation2 + $0xb0] sm:$0xff]  ;;  %v3935_v54 = vpack.i.bf16 %v1593_v23, %v4801_v45  ;;  %v691_v50 = vld [vmem:[#allocation2 + $0xe8] sm:$0xff] }
 0x1e4   : > { %v4117_v55 = vpack.i.bf16 %v684_v52, %v668_v53  ;;  %v1595_v45 = vld [vmem:[#allocation2 + $0x6d] sm:$0xff] }
 0x1e5   : > { %v675_v23 = vld [vmem:[#allocation2 + $0x68] sm:$0xff] }
 0x1e6   : > { %v4131_v53 = vpack.i.bf16 %v691_v50, %v675_v23  ;;  %v1474_v50 = vld [vmem:[#allocation2 + $0xc4] sm:$0xff] }
 0x1e8   : > { %v584_v42 = vpop.trf.xlu0  ;;  %3924 = vxpose.xlu2.b32.cont [2/16] (narrow) %v3923_v60, 32  ;;  %4106 = vxpose.xlu1.b32.start [1/16] (narrow) %v4105_v61, 32  ;;  %v1616_v18 = vld [vmem:[#allocation2 + $0x115] sm:$0xff]  ;;  %v4161_v60 = vpack.i.bf16 %v812_v58, %v796_v59  ;;  %v1601_v58 = vld [vmem:[#allocation2 + $0x9d] sm:$0xff] }
 0x1e9   : > { %660 = vst.msk [vmem:[#allocation2 + $0x121] sm:$0xff] %vm586_vm0, %v584_v42  ;;  %v4053_v20 = vpack.i.bf16 %v1616_v18, %v1732_v19  ;;  %v685_v61 = vld [vmem:[#allocation2 + $0xb8] sm:$0xff]  ;;  %v3937_v42 = vpack.i.bf16 %v1594_v33, %v4806_v57  ;;  %v815_v18 = vld [vmem:[#allocation2 + $0xa9] sm:$0xff] }
 0x1ea   : > { %v4119_v63 = vpack.i.bf16 %v685_v61, %v669_v62  ;;  %v1596_v57 = vld [vmem:[#allocation2 + $0x75] sm:$0xff]  ;;  %v799_v19 = vld [vmem:[#allocation2 + $0x29] sm:$0xff] }
 0x1eb   : > { %4050 = vxpose.xlu0.b32.cont [13/16] (narrow) %v4049_v0, 32  ;;  %v813_v0 = vld [vmem:[#allocation2 + $0x99] sm:$0xff]  ;;  %v692_v59 = vld [vmem:[#allocation2 + $0xf0] sm:$0xff] }
 0x1ec   : > { %v4163_v3 = vpack.i.bf16 %v813_v0, %v797_v1  ;;  %v676_v33 = vld [vmem:[#allocation2 + $0x70] sm:$0xff]  ;;  %v694_v1 = vld [vmem:[#allocation2 + $0x100] sm:$0xff] }
 0x1ed   : > { %v4133_v62 = vpack.i.bf16 %v692_v59, %v676_v33  ;;  %v1735_v59 = vld [vmem:[#allocation2 + $0xae] sm:$0xff] }
 0x1f0   : > { %3926 = vxpose.xlu2.b32.cont [3/16] (narrow) %v3925_v7, 32  ;;  %4108 = vxpose.xlu1.b32.cont [2/16] (narrow) %v4107_v8, 32  ;;  %v1617_v27 = vld [vmem:[#allocation2 + $0x11d] sm:$0xff]  ;;  %v3939_v8 = vpack.i.bf16 %v1595_v45, %v4811_v4  ;;  %v585_v21 = vpop.trf.xlu0 }
 0x1f1   : > { %v4055_v29 = vpack.i.bf16 %v1617_v27, %v1733_v28  ;;  %v670_v7 = vld [vmem:[#allocation2 + $0x40] sm:$0xff]  ;;  %661 = vst.msk [vmem:[#allocation2 + $0x129] sm:$0xff] %vm586_vm0, %v585_v21  ;;  %v816_v27 = vld [vmem:[#allocation2 + $0xb1] sm:$0xff] }
 0x1f2   : > { %v4121_v9 = vpack.i.bf16 %v686_v5, %v670_v7  ;;  %v1597_v4 = vld [vmem:[#allocation2 + $0x7d] sm:$0xff] }
 0x1f3   : > { %4052 = vxpose.xlu0.b32.cont [14/16] (narrow) %v4051_v10, 32  ;;  %v798_v10 = vld [vmem:[#allocation2 + $0x21] sm:$0xff]  ;;  %v693_v45 = vld [vmem:[#allocation2 + $0xf8] sm:$0xff] }
 0x1f4   : > { %v4165_v11 = vpack.i.bf16 %v814_v49, %v798_v10  ;;  %v677_v7 = vld [vmem:[#allocation2 + $0x78] sm:$0xff] }
 0x1f5   : > { %v805_v49 = vld [vmem:[#allocation2 + $0x59] sm:$0xff] }
 0x1f6   : > { %v1075_v21 = vld [vmem:[#allocation2 + $0x9a] sm:$0xff] }
 0x1f8   : > { %3928 = vxpose.xlu2.b32.cont [4/16] (narrow) %v3927_v15, 32  ;;  %4110 = vxpose.xlu1.b32.cont [3/16] (narrow) %v4109_v17, 32  ;;  %v3941_v15 = vpack.i.bf16 %v1596_v57, %v4816_v16  ;;  %v4123_v17 = vpack.i.bf16 %v687_v12, %v671_v14  ;;  %v800_v16 = vld [vmem:[#allocation2 + $0x31] sm:$0xff]  ;;  %v1470_v14 = vld [vmem:[#allocation2 + $0xa4] sm:$0xff] }
 0x1f9   : > { %v4169_v28 = vpack.i.bf16 %v816_v27, %v800_v16  ;;  %v1619_v57 = vld [vmem:[#allocation2 + $0x12d] sm:$0xff] }
 0x1fa   : > { %v1074_v12 = vld [vmem:[#allocation2 + $0x92] sm:$0xff]  ;;  %v823_v27 = vld [vmem:[#allocation2 + $0xe9] sm:$0xff] }
 0x1fb   : > { %4054 = vxpose.xlu0.b32.cont [15/16] (narrow) %v4053_v20, 32  ;;  %v4167_v20 = vpack.i.bf16 %v815_v18, %v799_v19  ;;  %v822_v18 = vld [vmem:[#allocation2 + $0xe1] sm:$0xff]  ;;  %v807_v16 = vld [vmem:[#allocation2 + $0x69] sm:$0xff] }
 0x1fc   : > { %v806_v19 = vld [vmem:[#allocation2 + $0x61] sm:$0xff] }
 0x200   : > { %3930 = vxpose.xlu2.b32.cont [5/16] (narrow) %v3929_v24, 32  ;;  %4112 = vxpose.xlu1.b32.cont [4/16] (narrow) %v4111_v25, 32  ;;  %v3943_v24 = vpack.i.bf16 %v1597_v4, %v4821_v26  ;;  %v4125_v25 = vpack.i.bf16 %v688_v56, %v672_v22  ;;  %v1599_v26 = vld [vmem:[#allocation2 + $0x8d] sm:$0xff]  ;;  %v1620_v56 = vld [vmem:[#allocation2 + $0x135] sm:$0xff] }
 0x201   : > { %v3947_v40 = vpack.i.bf16 %v1599_v26, %v4834_v47  ;;  %v696_v4 = vld [vmem:[#allocation2 + $0x110] sm:$0xff] }
 0x202   : > { %v1471_v22 = vld [vmem:[#allocation2 + $0xac] sm:$0xff] }
 0x203   : > { %4056 = vxpose.xlu0.b32.end [16/16] (narrow) %v4055_v29, 32  ;;  %v1598_v29 = vld [vmem:[#allocation2 + $0x85] sm:$0xff] }
 0x204   : > { %v3945_v31 = vpack.i.bf16 %v1598_v29, %v4827_v36  ;;  %v1600_v36 = vld [vmem:[#allocation2 + $0x95] sm:$0xff] }
 0x205   : > { %v697_v29 = vld [vmem:[#allocation2 + $0x118] sm:$0xff] }
 0x208   : > { %3932 = vxpose.xlu2.b32.cont [6/16] (narrow) %v3931_v32, 32  ;;  %4114 = vxpose.xlu1.b32.cont [5/16] (narrow) %v4113_v34, 32  ;;  %v4127_v32 = vpack.i.bf16 %v689_v2, %v673_v30  ;;  %v817_v34 = vld [vmem:[#allocation2 + $0xb9] sm:$0xff]  ;;  %v1076_v30 = vld [vmem:[#allocation2 + $0xa2] sm:$0xff] }
 0x209   : > { %v4171_v38 = vpack.i.bf16 %v817_v34, %v801_v37  ;;  %v1621_v2 = vld [vmem:[#allocation2 + $0x13d] sm:$0xff]  ;;  %v824_v37 = vld [vmem:[#allocation2 + $0xf1] sm:$0xff] }
 0x20b   : > { %4158 = vxpose.xlu0.b32.start [1/16] (narrow) %v4157_v39, 32  ;;  %v690_v39 = vld [vmem:[#allocation2 + $0xe0] sm:$0xff] }
 0x20c   : > { %v4129_v41 = vpack.i.bf16 %v690_v39, %v674_v13  ;;  %v1077_v39 = vld [vmem:[#allocation2 + $0xaa] sm:$0xff]  ;;  %v1473_v13 = vld [vmem:[#allocation2 + $0xbc] sm:$0xff] }
 0x210   : > { %3934 = vxpose.xlu2.b32.cont [7/16] (narrow) %v3933_v43, 32  ;;  %4116 = vxpose.xlu1.b32.cont [6/16] (narrow) %v4115_v44, 32  ;;  %v818_v43 = vld [vmem:[#allocation2 + $0xc1] sm:$0xff] }
 0x211   : > { %v802_v44 = vld [vmem:[#allocation2 + $0x41] sm:$0xff] }
 0x212   : > { %v4173_v48 = vpack.i.bf16 %v818_v43, %v802_v44  ;;  %v825_v43 = vld [vmem:[#allocation2 + $0xf9] sm:$0xff] }
 0x213   : > { %4160 = vxpose.xlu0.b32.cont [2/16] (narrow) %v4159_v51, 32  ;;  %v4855_v51 = vld [vmem:[#allocation2 + $0x82] sm:$0xff]  ;;  %v809_v44 = vld [vmem:[#allocation2 + $0x79] sm:$0xff] }
 0x214   : > { %v3949_v52 = vpack.i.bf16 %v1600_v36, %v4855_v51  ;;  %v1078_v36 = vld [vmem:[#allocation2 + $0xb2] sm:$0xff] }
 0x218   : > { %3936 = vxpose.xlu2.b32.cont [8/16] (narrow) %v3935_v54, 32  ;;  %4118 = vxpose.xlu1.b32.cont [7/16] (narrow) %v4117_v55, 32  ;;  %v819_v54 = vld [vmem:[#allocation2 + $0xc9] sm:$0xff] }
 0x219   : > { %v803_v55 = vld [vmem:[#allocation2 + $0x49] sm:$0xff] }
 0x21a   : > { %v4175_v47 = vpack.i.bf16 %v819_v54, %v803_v55  ;;  %v1734_v54 = vld [vmem:[#allocation2 + $0xa6] sm:$0xff] }
 0x21b   : > { %4162 = vxpose.xlu0.b32.cont [3/16] (narrow) %v4161_v60, 32  ;;  %v4858_v60 = vld [vmem:[#allocation2 + $0x8a] sm:$0xff] }
 0x21c   : > { %v3951_v61 = vpack.i.bf16 %v1601_v58, %v4858_v60  ;;  %v4263_v23 = vpack.i.bf16 %v4832_v46, %v4858_v60  ;;  %v1207_v58 = vld [vmem:[#allocation2 + $0x9b] sm:$0xff]  ;;  %v1208_v46 = vld [vmem:[#allocation2 + $0xa3] sm:$0xff] }
 0x21d   : > { %v4315_v33 = vpack.i.bf16 %v1735_v59, %v1207_v58  ;;  %v1736_v60 = vld [vmem:[#allocation2 + $0xb6] sm:$0xff] }
 0x21e   : > { %v1215_v59 = vld [vmem:[#allocation2 + $0xdb] sm:$0xff] }
 0x220   : > { %3938 = vxpose.xlu2.b32.cont [9/16] (narrow) %v3937_v42, 32  ;;  %4120 = vxpose.xlu1.b32.cont [8/16] (narrow) %v4119_v63, 32  ;;  %v820_v42 = vld [vmem:[#allocation2 + $0xd1] sm:$0xff] }
 0x221   : > { %v804_v63 = vld [vmem:[#allocation2 + $0x51] sm:$0xff] }
 0x222   : > { %v4177_v0 = vpack.i.bf16 %v820_v42, %v804_v63  ;;  %v4865_v63 = vpop.trf.xlu2 }
 0x223   : > { %4164 = vxpose.xlu0.b32.cont [4/16] (narrow) %v4163_v3, 32  ;;  %v1618_v3 = vld [vmem:[#allocation2 + $0x125] sm:$0xff] }
 0x224   : > { %v4077_v5 = vpack.i.bf16 %v1618_v3, %v694_v1  ;;  %v1081_v1 = vld [vmem:[#allocation2 + $0xca] sm:$0xff]  ;;  %v1477_v3 = vld [vmem:[#allocation2 + $0xdc] sm:$0xff] }
 0x228   : > { %3940 = vxpose.xlu2.b32.cont [10/16] (narrow) %v3939_v8, 32  ;;  %4122 = vxpose.xlu1.b32.cont [9/16] (narrow) %v4121_v9, 32  ;;  %v4135_v8 = vpack.i.bf16 %v693_v45, %v677_v7  ;;  %v821_v9 = vld [vmem:[#allocation2 + $0xd9] sm:$0xff]  ;;  %v4223_v45 = vpack.i.bf16 %v1477_v3, %v1081_v1  ;;  %v1216_v3 = vld [vmem:[#allocation2 + $0xe3] sm:$0xff] }
 0x229   : > { %v4179_v10 = vpack.i.bf16 %v821_v9, %v805_v49  ;;  %v1737_v7 = vld [vmem:[#allocation2 + $0xbe] sm:$0xff]  ;;  %v1082_v49 = vld [vmem:[#allocation2 + $0xd2] sm:$0xff] }
 0x22b   : > { %4166 = vxpose.xlu0.b32.cont [5/16] (narrow) %v4165_v11, 32  ;;  %v695_v11 = vld [vmem:[#allocation2 + $0x108] sm:$0xff] }
 0x230   : > { %3942 = vxpose.xlu2.b32.cont [11/16] (narrow) %v3941_v15, 32  ;;  %4124 = vxpose.xlu1.b32.cont [10/16] (narrow) %v4123_v17, 32  ;;  %v4079_v15 = vpack.i.bf16 %v1619_v57, %v695_v11  ;;  %v4209_v17 = vpack.i.bf16 %v1470_v14, %v1074_v12  ;;  %v1210_v57 = vld [vmem:[#allocation2 + $0xb3] sm:$0xff]  ;;  %v1738_v12 = vld [vmem:[#allocation2 + $0xc6] sm:$0xff] }
 0x233   : > { %4168 = vxpose.xlu0.b32.cont [6/16] (narrow) %v4167_v20, 32  ;;  %v4181_v20 = vpack.i.bf16 %v822_v18, %v806_v19  ;;  %v1479_v18 = vld [vmem:[#allocation2 + $0xec] sm:$0xff]  ;;  %v4871_v19 = vpop.trf.xlu0 }
 0x238   : > { %3944 = vxpose.xlu2.b32.cont [12/16] (narrow) %v3943_v24, 32  ;;  %4126 = vxpose.xlu1.b32.cont [11/16] (narrow) %v4125_v25, 32  ;;  %v4081_v24 = vpack.i.bf16 %v1620_v56, %v696_v4  ;;  %v4211_v25 = vpack.i.bf16 %v1471_v22, %v1075_v21  ;;  %v1739_v4 = vld [vmem:[#allocation2 + $0xce] sm:$0xff]  ;;  %v4873_v22 = vpop.trf.xlu1 }
 0x23b   : > { %4170 = vxpose.xlu0.b32.cont [7/16] (narrow) %v4169_v28, 32  ;;  %v4183_v28 = vpack.i.bf16 %v823_v27, %v807_v16  ;;  %v1480_v27 = vld [vmem:[#allocation2 + $0xf4] sm:$0xff]  ;;  %v4877_v16 = vpop.trf.xlu0 }
 0x240   : > { %3946 = vxpose.xlu2.b32.cont [13/16] (narrow) %v3945_v31, 32  ;;  %4128 = vxpose.xlu1.b32.cont [12/16] (narrow) %v4127_v32, 32  ;;  %v1472_v31 = vld [vmem:[#allocation2 + $0xb4] sm:$0xff]  ;;  %v4083_v32 = vpack.i.bf16 %v1621_v2, %v697_v29 }
 0x241   : > { %v4213_v34 = vpack.i.bf16 %v1472_v31, %v1076_v30  ;;  %v1740_v29 = vld [vmem:[#allocation2 + $0xd6] sm:$0xff]  ;;  %v4882_v31 = vpop.trf.xlu1 }
 0x243   : > { %4172 = vxpose.xlu0.b32.cont [8/16] (narrow) %v4171_v38, 32  ;;  %v808_v38 = vld [vmem:[#allocation2 + $0x71] sm:$0xff] }
 0x244   : > { %v4185_v26 = vpack.i.bf16 %v824_v37, %v808_v38  ;;  %v1481_v37 = vld [vmem:[#allocation2 + $0xfc] sm:$0xff]  ;;  %v4886_v38 = vpop.trf.xlu0 }
 0x248   : > { %3948 = vxpose.xlu2.b32.cont [14/16] (narrow) %v3947_v40, 32  ;;  %4130 = vxpose.xlu1.b32.cont [13/16] (narrow) %v4129_v41, 32  ;;  %v4261_v40 = vpack.i.bf16 %v4825_v35, %v4855_v51  ;;  %v4215_v41 = vpack.i.bf16 %v1473_v13, %v1077_v39  ;;  %v1079_v35 = vld [vmem:[#allocation2 + $0xba] sm:$0xff]  ;;  %v1475_v51 = vld [vmem:[#allocation2 + $0xcc] sm:$0xff] }
 0x249   : > { %v1741_v39 = vld [vmem:[#allocation2 + $0xde] sm:$0xff] }
 0x24b   : > { %4174 = vxpose.xlu0.b32.cont [9/16] (narrow) %v4173_v48, 32  ;;  %v4187_v48 = vpack.i.bf16 %v825_v43, %v809_v44  ;;  %v1086_v44 = vld [vmem:[#allocation2 + $0xf2] sm:$0xff] }
 0x250   : > { %3950 = vxpose.xlu2.b32.cont [15/16] (narrow) %v3949_v52, 32  ;;  %4132 = vxpose.xlu1.b32.cont [14/16] (narrow) %v4131_v53, 32  ;;  %v4217_v52 = vpack.i.bf16 %v1474_v50, %v1078_v36  ;;  %v1206_v53 = vld [vmem:[#allocation2 + $0x93] sm:$0xff]  ;;  %v4893_v36 = vpop.trf.xlu0 }
 0x251   : > { %v4313_v55 = vpack.i.bf16 %v1734_v54, %v1206_v53  ;;  %v1214_v50 = vld [vmem:[#allocation2 + $0xd3] sm:$0xff] }
 0x253   : > { %4176 = vxpose.xlu0.b32.cont [10/16] (narrow) %v4175_v47, 32  ;;  %v4219_v47 = vpack.i.bf16 %v1475_v51, %v1079_v35  ;;  %v1087_v35 = vld [vmem:[#allocation2 + $0xfa] sm:$0xff]  ;;  %v1483_v51 = vld [vmem:[#allocation2 + $0x10c] sm:$0xff] }
 0x254   : > { %v4900_v58 = vpack.i.bf16 %v1483_v51, %v1087_v35  ;;  %v1746_v35 = vld [vmem:[#allocation2 + $0x106] sm:$0xff] }
 0x258   : > { %3952 = vxpose.xlu2.b32.end [16/16] (narrow) %v3951_v61, 32  ;;  %4134 = vxpose.xlu1.b32.cont [15/16] (narrow) %v4133_v62, 32  ;;  %v1080_v61 = vld [vmem:[#allocation2 + $0xc2] sm:$0xff]  ;;  %v1476_v62 = vld [vmem:[#allocation2 + $0xd4] sm:$0xff] }
 0x259   : > { %v4221_v42 = vpack.i.bf16 %v1476_v62, %v1080_v61 }
 0x25b   : > { %4178 = vxpose.xlu0.b32.cont [11/16] (narrow) %v4177_v0, 32  ;;  %v4317_v0 = vpack.i.bf16 %v1736_v60, %v1208_v46  ;;  %v4905_v46 = vld [vmem:[#allocation2 + $0x102] sm:$0xff]  ;;  %v4907_v60 = vld [vmem:[#allocation2 + $0x114] sm:$0xff] }
 0x25c   : > { %v4237_v1 = vpack.i.bf16 %v4907_v60, %v4905_v46 }
 0x260   : > { %4078 = vxpose.xlu2.b32.start [1/4] (short) (narrow) %v4077_v5, 32  ;;  %4136 = vxpose.xlu1.b32.end [16/16] (narrow) %v4135_v8, 32  ;;  %v1209_v5 = vld [vmem:[#allocation2 + $0xab] sm:$0xff]  ;;  %v4867_v8 = vpop.trf.xlu2 }
 0x261   : > { %v4319_v9 = vpack.i.bf16 %v1737_v7, %v1209_v5 }
 0x263   : > { %4180 = vxpose.xlu0.b32.cont [12/16] (narrow) %v4179_v10, 32  ;;  %v1478_v10 = vld [vmem:[#allocation2 + $0xe4] sm:$0xff] }
 0x264   : > { %v4225_v11 = vpack.i.bf16 %v1478_v10, %v1082_v49  ;;  %v4915_v10 = vld [vmem:[#allocation2 + $0x10a] sm:$0xff] }
 0x268   : > { %4080 = vxpose.xlu2.b32.cont [2/4] (short) (narrow) %v4079_v15, 32  ;;  %4210 = vxpose.xlu1.b32.start [1/16] (narrow) %v4209_v17, 32  ;;  %v4869_v14 = vpop.trf.xlu2  ;;  %v4321_v15 = vpack.i.bf16 %v1738_v12, %v1210_v57 }
 0x26b   : > { %4182 = vxpose.xlu0.b32.cont [13/16] (narrow) %v4181_v20, 32  ;;  %v1211_v20 = vld [vmem:[#allocation2 + $0xbb] sm:$0xff] }
 0x26c   : > { %v4323_v21 = vpack.i.bf16 %v1739_v4, %v1211_v20 }
 0x270   : > { %4082 = vxpose.xlu2.b32.cont [3/4] (short) (narrow) %v4081_v24, 32  ;;  %4212 = vxpose.xlu1.b32.cont [2/16] (narrow) %v4211_v25, 32  ;;  %v4875_v24 = vpop.trf.xlu2 }
 0x273   : > { %4184 = vxpose.xlu0.b32.cont [14/16] (narrow) %v4183_v28, 32  ;;  %v1212_v28 = vld [vmem:[#allocation2 + $0xc3] sm:$0xff] }
 0x274   : > { %v4325_v30 = vpack.i.bf16 %v1740_v29, %v1212_v28  ;;  %v1745_v28 = vld [vmem:[#allocation2 + $0xfe] sm:$0xff] }
 0x278   : > { %4084 = vxpose.xlu2.b32.end [4/4] (short) (narrow) %v4083_v32, 32  ;;  %4214 = vxpose.xlu1.b32.cont [3/16] (narrow) %v4213_v34, 32 }
 0x279   : > { %v4884_v32 = vpop.trf.xlu2 }
 0x27b   : > { %4186 = vxpose.xlu0.b32.cont [15/16] (narrow) %v4185_v26, 32  ;;  %v1213_v26 = vld [vmem:[#allocation2 + $0xcb] sm:$0xff] }
 0x280   : > { %4262 = vxpose.xlu2.b32.start [1/16] (narrow) %v4261_v40, 32  ;;  %4216 = vxpose.xlu1.b32.cont [4/16] (narrow) %v4215_v41, 32  ;;  %v4327_v40 = vpack.i.bf16 %v1741_v39, %v1213_v26 }
 0x281   : > { %v3958_v43 = vpop.trf.xlu2 }
 0x283   : > { %4188 = vxpose.xlu0.b32.end [16/16] (narrow) %v4187_v48, 32  ;;  %v1482_v48 = vld [vmem:[#allocation2 + $0x104] sm:$0xff] }
 0x288   : > { %4264 = vxpose.xlu2.b32.cont [2/16] (narrow) %v4263_v23, 32  ;;  %4218 = vxpose.xlu1.b32.cont [5/16] (narrow) %v4217_v52, 32  ;;  %v1742_v23 = vld [vmem:[#allocation2 + $0xe6] sm:$0xff] }
 0x289   : > { %v4329_v53 = vpack.i.bf16 %v1742_v23, %v1214_v50  ;;  %v4014_v23 = vunpack.i.h.bf16 %v4882_v31 }
 0x28b   : > { %4314 = vxpose.xlu0.b32.start [1/16] (narrow) %v4313_v55, 32  ;;  %v3963_v55 = vpop.trf.xlu2 }
 0x28c   : > { %v3964_v49 = vunpack.i.l.bf16 %v3963_v55  ;;  %v3967_v12 = vunpack.i.h.bf16 %v3963_v55  ;;  %v1218_v55 = vld [vmem:[#allocation2 + $0xf3] sm:$0xff] }
 0x290   : > { %4266 = vxpose.xlu2.b32.cont [3/16] (narrow) %v4209_v17, 32  ;;  %4220 = vxpose.xlu1.b32.cont [6/16] (narrow) %v4219_v47, 32  ;;  %v1083_v17 = vld [vmem:[#allocation2 + $0xda] sm:$0xff] }
 0x291   : > { %v4227_v56 = vpack.i.bf16 %v1479_v18, %v1083_v17  ;;  %v3959_v17 = vunpack.i.l.bf16 %v3958_v43  ;;  %v3954_v18 = vunpack.i.l.bf16 %v4884_v32 }
 0x293   : > { %4316 = vxpose.xlu0.b32.cont [2/16] (narrow) %v4315_v33, 32  ;;  %v1743_v33 = vld [vmem:[#allocation2 + $0xee] sm:$0xff]  ;;  %v3968_v62 = vpop.trf.xlu2  ;;  %v1868_v29 = vpack.c.bf16 %v3959_v17, %v3954_v18 }
 0x294   : > { %v3972_v57 = vunpack.i.h.bf16 %v3968_v62 }
 0x296   : > { %v1895_v4 = vpack.c.bf16 %v3972_v57, %v3967_v12 }
 0x298   : > { %4268 = vxpose.xlu2.b32.cont [4/16] (narrow) %v4211_v25, 32  ;;  %4222 = vxpose.xlu1.b32.cont [7/16] (narrow) %v4221_v42, 32  ;;  %v1084_v25 = vld [vmem:[#allocation2 + $0xe2] sm:$0xff] }
 0x299   : > { %v4879_v2 = vpack.i.bf16 %v1480_v27, %v1084_v25  ;;  %v1217_v27 = vld [vmem:[#allocation2 + $0xeb] sm:$0xff]  ;;  %1991 = vmatpush.bf16.msra.mxu3 %v1895_v4  ;;  %v3920_v4 = vunpack.i.h.bf16 %v4875_v24 }
 0x29b   : > { %4318 = vxpose.xlu0.b32.cont [3/16] (narrow) %v4317_v0, 32 }
 0x2a0   : > { %4270 = vxpose.xlu2.b32.cont [5/16] (narrow) %v4213_v34, 32  ;;  %4224 = vxpose.xlu1.b32.cont [8/16] (narrow) %v4223_v45, 32  ;;  %v1085_v34 = vld [vmem:[#allocation2 + $0xea] sm:$0xff] }
 0x2a1   : > { %v4888_v13 = vpack.i.bf16 %v1481_v37, %v1085_v34  ;;  %v4335_v37 = vpack.i.bf16 %v1745_v28, %v1217_v27  ;;  %v3910_v27 = vunpack.i.h.bf16 %v4867_v8 }
 0x2a3   : > { %4320 = vxpose.xlu0.b32.cont [4/16] (narrow) %v4319_v9, 32  ;;  %v3969_v9 = vunpack.i.l.bf16 %v3968_v62 }
 0x2a5   : > { %v1871_v20 = vpack.c.bf16 %v3969_v9, %v3964_v49  ;;  %v1219_v9 = vld [vmem:[#allocation2 + $0xfb] sm:$0xff]  ;;  %v1747_v49 = vld [vmem:[#allocation2 + $0x10e] sm:$0xff] }
 0x2a6   : > { %v4339_v17 = vpack.i.bf16 %v1747_v49, %v1219_v9 }
 0x2a7   : > { %1972 = vmatpush.bf16.msra.mxu2 %v1871_v20 }
 0x2a8   : > { %4272 = vxpose.xlu2.b32.cont [6/16] (narrow) %v4215_v41, 32  ;;  %4226 = vxpose.xlu1.b32.cont [9/16] (narrow) %v4225_v11, 32  ;;  %v4891_v41 = vpop.trf.xlu1 }
 0x2a9   : > { %v4016_v39 = vunpack.i.l.bf16 %v4891_v41 }
 0x2ab   : > { %4322 = vxpose.xlu0.b32.cont [5/16] (narrow) %v4321_v15, 32  ;;  %1973 = vmatpush.bf16.msra.mxu2 %v1868_v29 }
 0x2b0   : > { %4274 = vxpose.xlu2.b32.cont [7/16] (narrow) %v4217_v52, 32  ;;  %4228 = vxpose.xlu1.b32.cont [10/16] (narrow) %v4227_v56, 32  ;;  %v4895_v52 = vpack.i.bf16 %v1482_v48, %v1086_v44  ;;  %v4020_v54 = vpop.trf.xlu1  ;;  %v4011_v44 = vunpack.i.l.bf16 %v4882_v31  ;;  %v4006_v48 = vunpack.i.l.bf16 %v4873_v22  ;;  %v3917_v31 = vunpack.i.l.bf16 %v4875_v24 }
 0x2b1   : > { %v4021_v26 = vunpack.i.l.bf16 %v4020_v54 }
 0x2b2   : > { %v1862_v51 = vpack.c.bf16 %v4011_v44, %v4006_v48  ;;  %v3742_v44 = vld [vmem:[%s6151_s3 + $0xc] sm:$0xf0]  ;;  %v4068_v48 = vunpack.i.l.bf16 %v4886_v38 }
 0x2b3   : > { %4324 = vxpose.xlu0.b32.cont [6/16] (narrow) %v4323_v21, 32  ;;  %v3957_v21 = vunpack.i.h.bf16 %v4884_v32  ;;  %v4024_v32 = vunpack.i.h.bf16 %v4020_v54 }
 0x2b8   : > { %4276 = vxpose.xlu2.b32.cont [8/16] (narrow) %v4219_v47, 32  ;;  %4230 = vxpose.xlu1.b32.cont [11/16] (narrow) %v4879_v2, 32  ;;  %v4898_v47 = vpop.trf.xlu0  ;;  %v4903_v61 = vpop.trf.xlu1 }
 0x2bb   : > { %4326 = vxpose.xlu0.b32.cont [7/16] (narrow) %v4325_v30, 32 }
 0x2c0   : > { %4278 = vxpose.xlu2.b32.cont [9/16] (narrow) %v4221_v42, 32  ;;  %4232 = vxpose.xlu1.b32.cont [12/16] (narrow) %v4888_v13, 32  ;;  %v4331_v42 = vpack.i.bf16 %v1743_v33, %v1215_v59  ;;  %v4909_v0 = vpop.trf.xlu0  ;;  %v4913_v5 = vpop.trf.xlu1  ;;  %v4337_v59 = vpack.i.bf16 %v1746_v35, %v1218_v55  ;;  %v1221_v55 = vld [vmem:[#allocation2 + $0x10b] sm:$0xff]  ;;  %v1749_v35 = vld [vmem:[#allocation2 + $0x11e] sm:$0xff] }
 0x2c3   : > { %4328 = vxpose.xlu0.b32.cont [8/16] (narrow) %v4327_v40, 32  ;;  %v4019_v40 = vunpack.i.h.bf16 %v4891_v41 }
 0x2c5   : > { %v1889_v50 = vpack.c.bf16 %v4024_v32, %v4019_v40  ;;  %v3834_v32 = vld [vmem:[%s6151_s3 + $0x4] sm:$0xf]  ;;  %v4073_v40 = vunpack.i.l.bf16 %v4893_v36 }
 0x2c8   : > { %4280 = vxpose.xlu2.b32.cont [10/16] (narrow) %v4223_v45, 32  ;;  %4234 = vxpose.xlu1.b32.cont [13/16] (narrow) %v4895_v52, 32  ;;  %v1744_v45 = vld [vmem:[#allocation2 + $0xf6] sm:$0xff]  ;;  %v4919_v15 = vpop.trf.xlu0  ;;  %v4926_v34 = vpop.trf.xlu1 }
 0x2c9   : > { %v4333_v7 = vpack.i.bf16 %v1744_v45, %v1216_v3  ;;  %v4200_v62 = vunpack.i.l.bf16 %v4919_v15  ;;  %v3902_v3 = vunpack.i.l.bf16 %v4865_v63  ;;  %v4148_v20 = vunpack.i.l.bf16 %v4926_v34 }
 0x2cb   : > { %4330 = vxpose.xlu0.b32.cont [9/16] (narrow) %v4329_v53, 32  ;;  %v4009_v53 = vunpack.i.h.bf16 %v4873_v22  ;;  %v3912_v22 = vunpack.i.l.bf16 %v4869_v14 }
 0x2cd   : > { %v1886_v54 = vpack.c.bf16 %v4014_v23, %v4009_v53  ;;  %v4977_v23 = vor.u32 %v3834_v32, %v3742_v44  ;;  %v1901_v53 = vpack.c.bf16 %v4073_v40, %v4068_v48 }
 0x2cf   : > { %2016 = vmatpush.bf16.msra.mxu0 %v1901_v53 }
 0x2d0   : > { %4282 = vxpose.xlu2.b32.cont [11/16] (narrow) %v4225_v11, 32  ;;  %4236 = vxpose.xlu1.b32.cont [14/16] (narrow) %v4900_v58, 32  ;;  %v4917_v11 = vld [vmem:[#allocation2 + $0x11c] sm:$0xff]  ;;  %v4937_v41 = vpop.trf.xlu1 }
 0x2d1   : > { %v4239_v25 = vpack.i.bf16 %v4917_v11, %v4915_v10  ;;  %v4153_v18 = vunpack.i.l.bf16 %v4937_v41 }
 0x2d3   : > { %4332 = vxpose.xlu0.b32.cont [10/16] (narrow) %v4331_v42, 32  ;;  %v4195_v42 = vunpack.i.l.bf16 %v4909_v0  ;;  %v1853_v28 = vpack.c.bf16 %v4153_v18, %v4148_v20  ;;  %v4071_v20 = vunpack.i.h.bf16 %v4886_v38  ;;  %v4151_v38 = vunpack.i.h.bf16 %v4926_v34 }
 0x2d8   : > { %4284 = vxpose.xlu2.b32.cont [12/16] (narrow) %v4227_v56, 32  ;;  %4238 = vxpose.xlu1.b32.cont [15/16] (narrow) %v4237_v1, 32  ;;  %v3962_v56 = vunpack.i.h.bf16 %v3958_v43  ;;  %v4930_v43 = vpop.trf.xlu0  ;;  %v4190_v1 = vunpack.i.l.bf16 %v4898_v47 }
 0x2d9   : > { %v4205_v33 = vunpack.i.l.bf16 %v4930_v43 }
 0x2da   : > { %v1892_v30 = vpack.c.bf16 %v3962_v56, %v3957_v21  ;;  %v1856_v57 = vpack.c.bf16 %v4195_v42, %v4190_v1  ;;  %v3915_v56 = vunpack.i.h.bf16 %v4869_v14  ;;  %v4143_v21 = vunpack.i.l.bf16 %v4913_v5  ;;  %v3752_v42 = vld [vmem:[%s6151_s3 + $0x18] sm:$0xf]  ;;  %v3838_v1 = vld [vmem:[%s6151_s3 + $0x20] sm:$0xf0] }
 0x2db   : > { %4334 = vxpose.xlu0.b32.cont [11/16] (narrow) %v4333_v7, 32  ;;  %v1859_v45 = vpack.c.bf16 %v4205_v33, %v4200_v62  ;;  %v1883_v7 = vpack.c.bf16 %v3917_v31, %v3912_v22  ;;  %v3748_v33 = vld [vmem:[%s6151_s3 + $0x8] sm:$0xf]  ;;  %v3836_v62 = vld [vmem:[%s6151_s3 + $0x10] sm:$0xf0] }
 0x2dc   : > { %1992 = vmatpush.bf16.msra.mxu3 %v1892_v30  ;;  %v1877_v29 = vpack.c.bf16 %v3920_v4, %v3915_v56  ;;  %v1220_v30 = vld [vmem:[#allocation2 + $0x103] sm:$0xff]  ;;  %v4989_v31 = vor.u32 %v3836_v62, %v3748_v33 }
 0x2e0   : > { %4286 = vxpose.xlu2.b32.cont [13/16] (narrow) %v4879_v2, 32  ;;  %4240 = vxpose.xlu1.b32.end [16/16] (narrow) %v4239_v25, 32  ;;  %v1865_v2 = vpack.c.bf16 %v4021_v26, %v4016_v39  ;;  %v4138_v25 = vunpack.i.l.bf16 %v4903_v61 }
 0x2e1   : > { %1993 = vmatpush.bf16.msra.mxu3 %v1889_v50  ;;  %v4058_v50 = vunpack.i.l.bf16 %v4871_v19 }
 0x2e2   : > { %1974 = vmatpush.bf16.msra.mxu2 %v1865_v2  ;;  %v1850_v26 = vpack.c.bf16 %v4143_v21, %v4138_v25  ;;  %v4063_v2 = vunpack.i.l.bf16 %v4877_v16  ;;  %v4066_v21 = vunpack.i.h.bf16 %v4877_v16  ;;  %v4061_v25 = vunpack.i.h.bf16 %v4871_v19 }
 0x2e3   : > { %4336 = vxpose.xlu0.b32.cont [12/16] (narrow) %v4335_v37, 32  ;;  %v1748_v37 = vld [vmem:[#allocation2 + $0x116] sm:$0xff] }
 0x2e4   : > { %v4341_v39 = vpack.i.bf16 %v1748_v37, %v1220_v30  ;;  %v4156_v30 = vunpack.i.h.bf16 %v4937_v41 }
 0x2e5   : > { %1994 = vmatpush.bf16.msra.mxu3 %v1886_v54 }
 0x2e6   : > { %1975 = vmatpush.bf16.msra.mxu2 %v1862_v51  ;;  %v1898_v51 = vpack.c.bf16 %v4063_v2, %v4058_v50 }
 0x2e8   : > { %4288 = vxpose.xlu2.b32.cont [14/16] (narrow) %v4888_v13, 32  ;;  %v3907_v13 = vunpack.i.l.bf16 %v4867_v8  ;;  %v3740_v8 = vld [vmem:[%s6151_s3] sm:$0xf]  ;;  %2017 = vmatpush.bf16.msra.mxu0 %v1898_v51 }
 0x2e9   : > { %1995 = vmatpush.bf16.msra.mxu3 %v1883_v7 }
 0x2ea   : > { %1976 = vmatpush.bf16.msra.mxu2 %v1859_v45  ;;  %v1880_v12 = vpack.c.bf16 %v3907_v13, %v3902_v3  ;;  %v3837_v13 = vld [vmem:[%s6151_s3 + $0x1c] sm:$0xf]  ;;  %v5004_v3 = vor.u32 %v3838_v1, %v3752_v42  ;;  %v3754_v45 = vld [vmem:[%s6151_s3 + $0x24] sm:$0xf0] }
 0x2eb   : > { %4338 = vxpose.xlu0.b32.cont [13/16] (narrow) %v4337_v59, 32  ;;  %v4343_v59 = vpack.i.bf16 %v1749_v35, %v1221_v55  ;;  %3762 = vmatmul.msk.bf16.vlgmr.msra.gmra.mxu0 %vm586_vm0, %v4989_v31  ;;  %v5009_v9 = vor.u32 %v3837_v13, %v3754_v45 }
 0x2ed   : > { %1996 = vmatpush.bf16.msra.mxu3 %v1880_v12  ;;  %v3839_v12 = vld [vmem:[%s6151_s3 + $0x28] sm:$0xf0] }
 0x2ee   : > { %1977 = vmatpush.bf16.msra.mxu2 %v1856_v57  ;;  %v3760_v57 = vld [vmem:[%s6151_s3 + $0x20] sm:$0xf] }
 0x2ef   : > { %v5022_v18 = vor.u32 %v3839_v12, %v3760_v57  ;;  %v4203_v57 = vunpack.i.h.bf16 %v4919_v15  ;;  %v4208_v12 = vunpack.i.h.bf16 %v4930_v43  ;;  %v1915_v15 = vld [vmem:[%s6152_s4 + $0x18] sm:$0xff] }
 0x2f0   : > { %4290 = vxpose.xlu2.b32.cont [15/16] (narrow) %v4895_v52, 32  ;;  %v3905_v52 = vunpack.i.h.bf16 %v4865_v63  ;;  %v3835_v63 = vld [vmem:[%s6151_s3 + $0x8] sm:$0xf0] }
 0x2f1   : > { %1997 = vmatpush.bf16.msra.mxu3 %v1877_v29  ;;  %v4198_v29 = vunpack.i.h.bf16 %v4909_v0 }
 0x2f2   : > { %1978 = vmatpush.bf16.msra.mxu2 %v1853_v28  ;;  %v1874_v24 = vpack.c.bf16 %v3910_v27, %v3905_v52  ;;  %v1893_v52 = vpack.c.bf16 %v4066_v21, %v4061_v25  ;;  %v1860_v21 = vpack.c.bf16 %v4208_v12, %v4203_v57  ;;  %v826_v57 = vld [vmem:[#allocation2 + $0x101] sm:$0xff] }
 0x2f3   : > { %4340 = vxpose.xlu0.b32.cont [14/16] (narrow) %v4339_v17, 32  ;;  %v4076_v17 = vunpack.i.h.bf16 %v4893_v36  ;;  %v4193_v36 = vunpack.i.h.bf16 %v4898_v47  ;;  %v4422_v12 = vpack.i.bf16 %v826_v57, %v4905_v46 }
 0x2f5   : > { %1998 = vmatpush.bf16.msra.mxu3 %v1874_v24  ;;  %v1896_v56 = vpack.c.bf16 %v4076_v17, %v4071_v20  ;;  %v4146_v24 = vunpack.i.h.bf16 %v4913_v5  ;;  %v1857_v19 = vpack.c.bf16 %v4198_v29, %v4193_v36 }
 0x2f6   : > { %1979 = vmatpush.bf16.msra.mxu2 %v1850_v26  ;;  %v4141_v26 = vunpack.i.h.bf16 %v4903_v61 }
 0x2f8   : > { %4292 = vxpose.xlu2.b32.end [16/16] (narrow) %v4900_v58, 32  ;;  %v4969_v58 = vor.u32 %v3835_v63, %v3740_v8  ;;  %1999 = vmatmul.bf16.vlgmr.msra.gmra.mxu3 %v4977_v23  ;;  %v1854_v8 = vpack.c.bf16 %v4156_v30, %v4151_v38  ;;  %v1851_v50 = vpack.c.bf16 %v4146_v24, %v4141_v26 }
 0x2f9   : > { %v4957_v14 = vpop.trf.xlu2 }
 0x2fa   : > { %1980 = vmatmul.bf16.vlgmr.msra.gmra.mxu2 %v4969_v58 }
 0x2fb   : > { %4342 = vxpose.xlu0.b32.cont [15/16] (narrow) %v4341_v39, 32  ;;  %3763 = vmatmul.msk.bf16.gmra.mxu0 %vm586_vm0, %v5022_v18 }
 0x2fc   : > { %2048 = vmatpush.bf16.msrb.mxu2 %v1896_v56 }
 0x300   : > { %2049 = vmatpush.bf16.msrb.mxu2 %v1893_v52 }
 0x301   : > { %v4981_v54 = vpop.trf.xlu2 }
 0x303   : > { %4344 = vxpose.xlu0.b32.end [16/16] (narrow) %v4343_v59, 32 }
 0x308   : > { %2004 = vmatmul.bf16.gmra.mxu3 %v5009_v9 }
 0x309   : > { %v4993_v22 = vpop.trf.xlu2 }
 0x30a   : > { %1985 = vmatmul.bf16.gmra.mxu2 %v5004_v3 }
 0x30c   : > { %v4241_v7 = vpop.trf.xlu1 }
 0x30d   : > { %v4242_v63 = vunpack.i.l.bf16 %v4241_v7  ;;  %v4245_v47 = vunpack.i.h.bf16 %v4241_v7 }
 0x311   : > { %v5013_v49 = vpop.trf.xlu2 }
 0x314   : > { %v4246_v4 = vpop.trf.xlu1 }
 0x315   : > { %v4247_v32 = vunpack.i.l.bf16 %v4246_v4  ;;  %v4250_v44 = vunpack.i.h.bf16 %v4246_v4  ;;  %v1912_v4 = vld [vmem:[%s6152_s4] sm:$0xff] }
 0x317   : > { %v1869_v53 = vpack.c.bf16 %v4247_v32, %v4242_v63  ;;  %v1887_v61 = vpack.c.bf16 %v4250_v44, %v4245_v47  ;;  %v4104_v63 = vunpack.i.h.bf16 %v5013_v49  ;;  %v4089_v32 = vunpack.i.h.bf16 %v4957_v14  ;;  %v1486_v47 = vld [vmem:[#allocation2 + $0x124] sm:$0xff] }
 0x319   : > { %v4293_v27 = vpop.trf.xlu2 }
 0x31a   : > { %v4294_v51 = vunpack.i.l.bf16 %v4293_v27  ;;  %v4297_v13 = vunpack.i.h.bf16 %v4293_v27 }
 0x31c   : > { %v4251_v28 = vpop.trf.xlu1 }
 0x31d   : > { %v4252_v16 = vunpack.i.l.bf16 %v4251_v28  ;;  %v4255_v39 = vunpack.i.h.bf16 %v4251_v28 }
 0x321   : > { %v4298_v37 = vpop.trf.xlu2 }
 0x322   : > { %v4299_v59 = vunpack.i.l.bf16 %v4298_v37  ;;  %v4302_v1 = vunpack.i.h.bf16 %v4298_v37 }
 0x324   : > { %v4256_v40 = vpop.trf.xlu1  ;;  %v1863_v17 = vpack.c.bf16 %v4299_v59, %v4294_v51  ;;  %v1881_v56 = vpack.c.bf16 %v4302_v1, %v4297_v13  ;;  %v1091_v51 = vld [vmem:[#allocation2 + $0x11a] sm:$0xff]  ;;  %v1225_v1 = vld [vmem:[#allocation2 + $0x12b] sm:$0xff] }
 0x325   : > { %v4257_v48 = vunpack.i.l.bf16 %v4256_v40  ;;  %v4260_v0 = vunpack.i.h.bf16 %v4256_v40  ;;  %v4094_v40 = vunpack.i.h.bf16 %v4981_v54  ;;  %v1223_v59 = vld [vmem:[#allocation2 + $0x11b] sm:$0xff] }
 0x327   : > { %v1872_v2 = vpack.c.bf16 %v4257_v48, %v4252_v16  ;;  %v1890_v34 = vpack.c.bf16 %v4260_v0, %v4255_v39  ;;  %v1894_v48 = vpack.c.bf16 %v4094_v40, %v4089_v32  ;;  %v4366_v0 = vpack.i.bf16 %v4907_v60, %v1486_v47  ;;  %v1092_v60 = vld [vmem:[#allocation2 + $0x122] sm:$0xff] }
 0x329   : > { %v4303_v41 = vpop.trf.xlu2  ;;  %2029 = vmatpush.bf16.msra.mxu1 %v1872_v2  ;;  %2050 = vmatpush.bf16.msrb.mxu2 %v1890_v34  ;;  %v1487_v2 = vld [vmem:[#allocation2 + $0x12c] sm:$0xff] }
 0x32a   : > { %v4304_v55 = vunpack.i.l.bf16 %v4303_v41  ;;  %v4307_v35 = vunpack.i.h.bf16 %v4303_v41  ;;  %v4368_v34 = vpack.i.bf16 %v4917_v11, %v1487_v2  ;;  %v1093_v11 = vld [vmem:[#allocation2 + $0x12a] sm:$0xff] }
 0x32b   : > { %v4400_v13 = vpack.i.bf16 %v1225_v1, %v1093_v11  ;;  %v1752_v11 = vld [vmem:[#allocation2 + $0x136] sm:$0xff] }
 0x32d   : > { %2030 = vmatpush.bf16.msra.mxu1 %v1869_v53  ;;  %2051 = vmatpush.bf16.msrb.mxu2 %v1887_v61  ;;  %v1489_v53 = vld [vmem:[#allocation2 + $0x13c] sm:$0xff] }
 0x32e   : > { %v4372_v61 = vpack.i.bf16 %v1487_v2, %v1489_v53 }
 0x32f   : > { %v4345_v5 = vpop.trf.xlu0 }
 0x330   : > { %v4346_v36 = vunpack.i.l.bf16 %v4345_v5  ;;  %v4349_v38 = vunpack.i.h.bf16 %v4345_v5  ;;  %v1090_v5 = vld [vmem:[#allocation2 + $0x112] sm:$0xff] }
 0x331   : > { %v4308_v33 = vpop.trf.xlu2 }
 0x332   : > { %v4309_v62 = vunpack.i.l.bf16 %v4308_v33  ;;  %v4312_v42 = vunpack.i.h.bf16 %v4308_v33  ;;  %v4396_v33 = vpack.i.bf16 %v1223_v59, %v1091_v51 }
 0x334   : > { %v1866_v45 = vpack.c.bf16 %v4309_v62, %v4304_v55  ;;  %v1884_v7 = vpack.c.bf16 %v4312_v42, %v4307_v35  ;;  %v1222_v55 = vld [vmem:[#allocation2 + $0x113] sm:$0xff]  ;;  %v1224_v62 = vld [vmem:[#allocation2 + $0x123] sm:$0xff] }
 0x335   : > { %v4394_v35 = vpack.i.bf16 %v1222_v55, %v1090_v5  ;;  %v4398_v42 = vpack.i.bf16 %v1224_v62, %v1092_v60 }
 0x336   : > { %2031 = vmatpush.bf16.msra.mxu1 %v1866_v45  ;;  %2052 = vmatpush.bf16.msrb.mxu2 %v1884_v7 }
 0x337   : > { %v4350_v20 = vpop.trf.xlu0 }
 0x338   : > { %v4351_v28 = vunpack.i.l.bf16 %v4350_v20  ;;  %v4354_v29 = vunpack.i.h.bf16 %v4350_v20 }
 0x33a   : > { %1918 = vperm.xlu1 %3868, %v1912_v4   ;;  %2032 = vmatpush.bf16.msra.mxu1 %v1863_v17  ;;  %v1875_v16 = vpack.c.bf16 %v4351_v28, %v4346_v36  ;;  %v1899_v39 = vpack.c.bf16 %v4354_v29, %v4349_v38  ;;  %v827_v4 = vld [vmem:[#allocation2 + $0x109] sm:$0xff] }
 0x33b   : > { %2053 = vmatpush.bf16.msrb.mxu2 %v1881_v56  ;;  %v4424_v56 = vpack.i.bf16 %v827_v4, %v4915_v10 }
 0x33e   : > { %2033 = vmatpush.bf16.msra.mxu1 %v1860_v21  ;;  %v828_v21 = vld [vmem:[#allocation2 + $0x111] sm:$0xff] }
 0x33f   : > { %v4355_v25 = vpop.trf.xlu0 }
 0x340   : > { %v4356_v43 = vunpack.i.l.bf16 %v4355_v25  ;;  %v4359_v27 = vunpack.i.h.bf16 %v4355_v25 }
 0x342   : > { %1933 = vperm.xlu1 %3868, %v1915_v15   ;;  %2034 = vmatpush.bf16.msra.mxu1 %v1857_v19  ;;  %v1913_v19 = vld [vmem:[%s6152_s4 + $0x8] sm:$0xff] }
 0x346   : > { %2035 = vmatpush.bf16.msra.mxu1 %v1854_v8  ;;  %v4099_v8 = vunpack.i.h.bf16 %v4993_v22 }
 0x347   : > { %v4360_v52 = vpop.trf.xlu0 }
 0x348   : > { %v4361_v30 = vunpack.i.l.bf16 %v4360_v52  ;;  %v4364_v37 = vunpack.i.h.bf16 %v4360_v52  ;;  %v1897_v44 = vpack.c.bf16 %v4104_v63, %v4099_v8 }
 0x34a   : > { %2036 = vmatpush.bf16.msra.mxu1 %v1851_v50  ;;  %v1878_v26 = vpack.c.bf16 %v4361_v30, %v4356_v43  ;;  %v1902_v24 = vpack.c.bf16 %v4364_v37, %v4359_v27  ;;  %v1488_v50 = vld [vmem:[#allocation2 + $0x134] sm:$0xff]  ;;  %v4426_v43 = vpack.i.bf16 %v828_v21, %v1090_v5 }
 0x34b   : > { %v4370_v41 = vpack.i.bf16 %v1486_v47, %v1488_v50  ;;  %v829_v27 = vld [vmem:[#allocation2 + $0x119] sm:$0xff] }
 0x34c   : > { %2054 = vmatpush.bf16.msrb.mxu2 %v1878_v26  ;;  %2073 = vmatpush.bf16.msrb.mxu3 %v1902_v24  ;;  %v4428_v29 = vpack.i.bf16 %v829_v27, %v1091_v51 }
 0x34d   : > { %2037 = vmatmul.bf16.vlgmr.msra.gmra.mxu1 %v4969_v58 }
 0x34e   : > { %2105 = vmatpush.bf16.msrb.mxu1 %v1897_v44 }
 0x350   : > { %2055 = vmatpush.bf16.msrb.mxu2 %v1875_v16  ;;  %2074 = vmatpush.bf16.msrb.mxu3 %v1899_v39 }
 0x352   : > { %2106 = vmatpush.bf16.msrb.mxu1 %v1894_v48 }
 0x353   : > { %2056 = vmatmul.bf16.vlgmr.msrb.gmra.mxu2 %v4977_v23  ;;  %3764 = vmatmul.msk.bf16.vlgmr.msrb.gmra.mxu3 %vm586_vm0, %v4989_v31 }
 0x35a   : > { %4365 = vset.pattern.permute.xlu2 %v4587_v6  ;;  %v1914_v6 = vld [vmem:[%s6152_s4 + $0x10] sm:$0xff] }
 0x35d   : > { %2042 = vmatmul.bf16.gmra.mxu1 %v5004_v3 }
 0x361   : > { %1923 = vperm.xlu2 %4365, %v1913_v19   ;;  %v1750_v19 = vld [vmem:[#allocation2 + $0x126] sm:$0xff] }
 0x363   : > { %2061 = vmatmul.bf16.gmra.mxu2 %v5009_v9  ;;  %3765 = vmatmul.msk.bf16.gmra.mxu3 %vm586_vm0, %v5022_v18 }
 0x368   : > { %v2019_v36 = vpop.f32.mrf.mxu0 }
 0x370   : > { %v2021_v32 = vpop.f32.mrf.mxu0 }
 0x371   : > { %1928 = vperm.xlu0 %3867, %v1914_v6  }
 0x377   : > { %4367 = vxpose.xlu1.b32.start [1/4] (short) (narrow) %v4366_v0, 32 }
 0x378   : > { %v2024_v51 = vpop.f32.mrf.mxu0 }
 0x37b   : > { %v2000_v7 = vpop.f32.mrf.mxu3 }
 0x37d   : > { %v1981_v45 = vpop.f32.mrf.mxu2 }
 0x37f   : > { %4369 = vxpose.xlu1.b32.cont [2/4] (short) (narrow) %v4368_v34, 32 }
 0x380   : > { %v2026_v27 = vpop.f32.mrf.mxu0 }
 0x383   : > { %v2002_v20 = vpop.f32.mrf.mxu3 }
 0x385   : > { %v1983_v17 = vpop.f32.mrf.mxu2 }
 0x387   : > { %4371 = vxpose.xlu1.b32.cont [3/4] (short) (narrow) %v4370_v41, 32  ;;  %v1751_v41 = vld [vmem:[#allocation2 + $0x12e] sm:$0xff] }
 0x38b   : > { %v2005_v15 = vpop.f32.mrf.mxu3 }
 0x38d   : > { %v1986_v25 = vpop.f32.mrf.mxu2 }
 0x38f   : > { %4373 = vxpose.xlu1.b32.end [4/4] (short) (narrow) %v4372_v61, 32 }
 0x393   : > { %v2007_v46 = vpop.f32.mrf.mxu3 }
 0x395   : > { %v1988_v38 = vpop.f32.mrf.mxu2 }
 0x397   : > { %4395 = vxpose.xlu1.b32.start [1/4] (short) (narrow) %v4394_v35, 32 }
 0x39f   : > { %4397 = vxpose.xlu1.b32.cont [2/4] (short) (narrow) %v4396_v33, 32 }
 0x3a7   : > { %4399 = vxpose.xlu1.b32.cont [3/4] (short) (narrow) %v4398_v42, 32 }
 0x3ac   : > { %v5066_v28 = vpop.permute.xlu1 %1918 }
 0x3ad   : > { %v1982_v30 = vadd.f32 %v1981_v45, %v5066_v28 }
 0x3af   : > { %4401 = vxpose.xlu1.b32.end [4/4] (short) (narrow) %v4400_v13, 32  ;;  %v2001_v10 = vadd.f32 %v2000_v7, %v1982_v30 }
 0x3b1   : > { %v2020_v6 = vadd.f32 %v2019_v36, %v2001_v10 }
 0x3b3   : > { %v2143_v47 = vmax.f32 %v2020_v6, 0.0 }
 0x3b4   : > { %v5076_v60 = vpop.permute.xlu1 %1933 }
 0x3b5   : > { %v1989_v57 = vadd.f32 %v1988_v38, %v5076_v60 }
 0x3b7   : > { %4423 = vxpose.xlu1.b32.start [1/4] (short) (narrow) %v4422_v12, 32  ;;  %v2008_v21 = vadd.f32 %v2007_v46, %v1989_v57 }
 0x3b9   : > { %v2027_v30 = vadd.f32 %v2026_v27, %v2008_v21 }
 0x3bb   : > { %v5069_v37 = vpop.permute.xlu2 %1923 }
 0x3bc   : > { %v1984_v16 = vadd.f32 %v1983_v17, %v5069_v37 }
 0x3be   : > { %v2003_v44 = vadd.f32 %v2002_v20, %v1984_v16 }
 0x3bf   : > { %4425 = vxpose.xlu1.b32.cont [2/4] (short) (narrow) %v4424_v56, 32 }
 0x3c0   : > { %v2022_v34 = vadd.f32 %v2021_v32, %v2003_v44 }
 0x3c2   : > { %v2146_v35 = vmax.f32 %v2022_v34, 0.0 }
 0x3c7   : > { %4427 = vxpose.xlu1.b32.cont [3/4] (short) (narrow) %v4426_v43, 32 }
 0x3ca   : > { %v2038_v52 = vpop.f32.mrf.mxu1 }
 0x3cb   : > { %v2039_v26 = vadd.f32 %v2038_v52, %v5066_v28 }
 0x3cf   : > { %4429 = vxpose.xlu1.b32.end [4/4] (short) (narrow) %v4428_v29, 32 }
 0x3d2   : > { %v2040_v24 = vpop.f32.mrf.mxu1 }
 0x3d3   : > { %v2041_v0 = vadd.f32 %v2040_v24, %v5069_v37 }
 0x3d6   : > { %v2057_v39 = vpop.f32.mrf.mxu2  ;;  %v2076_v8 = vpop.f32.mrf.mxu3 }
 0x3d7   : > { %v2058_v63 = vadd.f32 %v2057_v39, %v2039_v26  ;;  %1818 = vxpose.xlu1.b32.start [1/4] (short) (narrow) %v1750_v19, 32  ;;  %v2152_v26 = vmax.f32 %v2027_v30, 0.0 }
 0x3d9   : > { %v2077_v40 = vadd.f32 %v2076_v8, %v2058_v63 }
 0x3da   : > { %v2043_v5 = vpop.f32.mrf.mxu1 }
 0x3db   : > { %v2144_v48 = vmax.f32 %v2077_v40, 0.0 }
 0x3dd   : > { %v4450_v2 = vpack.i.bf16 %v2144_v48, %v2143_v47 }
 0x3de   : > { %v2059_v50 = vpop.f32.mrf.mxu2  ;;  %v2078_v53 = vpop.f32.mrf.mxu3 }
 0x3df   : > { %v2060_v61 = vadd.f32 %v2059_v50, %v2041_v0  ;;  %1819 = vxpose.xlu1.b32.cont [2/4] (short) (narrow) %v1751_v41, 32  ;;  %4451 = vxpose.xlu2.b32.start [1/4] (short) %v4450_v2, 128 }
 0x3e1   : > { %v2079_v55 = vadd.f32 %v2078_v53, %v2060_v61 }
 0x3e2   : > { %v2045_v4 = vpop.f32.mrf.mxu1 }
 0x3e3   : > { %v2147_v59 = vmax.f32 %v2079_v55, 0.0  ;;  %v5074_v33 = vpop.permute.xlu0 %1928  ;;  %v2046_v52 = vadd.f32 %v2045_v4, %v5076_v60 }
 0x3e4   : > { %v1987_v62 = vadd.f32 %v1986_v25, %v5074_v33  ;;  %v2044_v42 = vadd.f32 %v2043_v5, %v5074_v33  ;;  %v1753_v25 = vld [vmem:[#allocation2 + $0x13e] sm:$0xff] }
 0x3e5   : > { %v4452_v1 = vpack.i.bf16 %v2147_v59, %v2146_v35 }
 0x3e6   : > { %v2006_v13 = vadd.f32 %v2005_v15, %v1987_v62  ;;  %v2062_v45 = vpop.f32.mrf.mxu2  ;;  %v2081_v7 = vpop.f32.mrf.mxu3 }
 0x3e7   : > { %v2063_v12 = vadd.f32 %v2062_v45, %v2044_v42  ;;  %1820 = vxpose.xlu1.b32.cont [3/4] (short) (narrow) %v1752_v11, 32  ;;  %4453 = vxpose.xlu2.b32.cont [2/4] (short) %v4452_v1, 128 }
 0x3e8   : > { %v2025_v17 = vadd.f32 %v2024_v51, %v2006_v13 }
 0x3e9   : > { %v2082_v20 = vadd.f32 %v2081_v7, %v2063_v12 }
 0x3ea   : > { %v2149_v56 = vmax.f32 %v2025_v17, 0.0 }
 0x3eb   : > { %v2150_v43 = vmax.f32 %v2082_v20, 0.0 }
 0x3ed   : > { %v4454_v36 = vpack.i.bf16 %v2150_v43, %v2149_v56 }
 0x3ee   : > { %v2064_v29 = vpop.f32.mrf.mxu2  ;;  %v2083_v15 = vpop.f32.mrf.mxu3 }
 0x3ef   : > { %v2065_v10 = vadd.f32 %v2064_v29, %v2046_v52  ;;  %1821 = vxpose.xlu1.b32.end [4/4] (short) (narrow) %v1753_v25, 32  ;;  %4455 = vxpose.xlu2.b32.cont [3/4] (short) %v4454_v36, 128 }
 0x3f1   : > { %v2084_v38 = vadd.f32 %v2083_v15, %v2065_v10 }
 0x3f3   : > { %v2153_v24 = vmax.f32 %v2084_v38, 0.0 }
 0x3f5   : > { %v4456_v16 = vpack.i.bf16 %v2153_v24, %v2152_v26 }
 0x3f7   : > { %4457 = vxpose.xlu2.b32.end [4/4] (short) %v4456_v16, 128  ;;  %v4101_v16 = vunpack.i.l.bf16 %v5013_v49 }
 0x41b   : > { %v4374_v39 = vpop.trf.xlu1 }
 0x41c   : > { %v4375_v44 = vunpack.i.l.bf16 %v4374_v39  ;;  %v4378_v41 = vunpack.i.h.bf16 %v4374_v39  ;;  %v4096_v39 = vunpack.i.l.bf16 %v4993_v22  ;;  %v3840_v22 = vld [vmem:[%s6153_s5] sm:$0xff] }
 0x423   : > { %v4379_v19 = vpop.trf.xlu1 }
 0x424   : > { %v4380_v32 = vunpack.i.l.bf16 %v4379_v19  ;;  %v4383_v34 = vunpack.i.h.bf16 %v4379_v19 }
 0x426   : > { %v1888_v48 = vpack.c.bf16 %v4380_v32, %v4375_v44  ;;  %v1882_v53 = vpack.c.bf16 %v4383_v34, %v4378_v41  ;;  %v3841_v32 = vld [vmem:[%s6153_s5 + $0x8] sm:$0xff] }
 0x427   : > { %3853 = vmatpush.bf16.msra.mxu3 %v3841_v32 }
 0x42b   : > { %v4384_v46 = vpop.trf.xlu1  ;;  %3855 = vmatpush.bf16.msra.mxu3 %v3840_v22 }
 0x42c   : > { %v4385_v63 = vunpack.i.l.bf16 %v4384_v46  ;;  %v4388_v2 = vunpack.i.h.bf16 %v4384_v46  ;;  %v1855_v46 = vpack.c.bf16 %v4101_v16, %v4096_v39 }
 0x433   : > { %v4389_v8 = vpop.trf.xlu1 }
 0x434   : > { %v4390_v6 = vunpack.i.l.bf16 %v4389_v8  ;;  %v4393_v47 = vunpack.i.h.bf16 %v4389_v8  ;;  %v4091_v8 = vunpack.i.l.bf16 %v4981_v54 }
 0x436   : > { %v1891_v40 = vpack.c.bf16 %v4390_v6, %v4385_v63  ;;  %v1885_v50 = vpack.c.bf16 %v4393_v47, %v4388_v2  ;;  %v4086_v63 = vunpack.i.l.bf16 %v4957_v14 }
 0x438   : > { %2107 = vmatpush.bf16.msrb.mxu1 %v1891_v40  ;;  %v1852_v40 = vpack.c.bf16 %v4091_v8, %v4086_v63 }
 0x43b   : > { %v4402_v0 = vpop.trf.xlu1 }
 0x43c   : > { %2108 = vmatpush.bf16.msrb.mxu1 %v1888_v48  ;;  %v4406_v45 = vunpack.i.h.bf16 %v4402_v0  ;;  %v4403_v7 = vunpack.i.l.bf16 %v4402_v0 }
 0x440   : > { %2109 = vmatpush.bf16.msrb.mxu1 %v1885_v50 }
 0x443   : > { %v4407_v61 = vpop.trf.xlu1 }
 0x444   : > { %2110 = vmatpush.bf16.msrb.mxu1 %v1882_v53  ;;  %v4411_v42 = vunpack.i.h.bf16 %v4407_v61  ;;  %v4408_v13 = vunpack.i.l.bf16 %v4407_v61 }
 0x446   : > { %v1870_v57 = vpack.c.bf16 %v4408_v13, %v4403_v7  ;;  %v1876_v12 = vpack.c.bf16 %v4411_v42, %v4406_v45 }
 0x44b   : > { %v4412_v5 = vpop.trf.xlu1 }
 0x44c   : > { %v4416_v55 = vunpack.i.h.bf16 %v4412_v5  ;;  %v4413_v51 = vunpack.i.l.bf16 %v4412_v5 }
 0x453   : > { %v4417_v35 = vpop.trf.xlu1 }
 0x454   : > { %v4421_v59 = vunpack.i.h.bf16 %v4417_v35  ;;  %v4418_v62 = vunpack.i.l.bf16 %v4417_v35 }
 0x456   : > { %v1873_v11 = vpack.c.bf16 %v4418_v62, %v4413_v51  ;;  %v1879_v1 = vpack.c.bf16 %v4421_v59, %v4416_v55 }
 0x458   : > { %2086 = vmatpush.bf16.msrb.mxu0 %v1873_v11  ;;  %2111 = vmatpush.bf16.msrb.mxu1 %v1879_v1 }
 0x45b   : > { %v4430_v17 = vpop.trf.xlu1 }
 0x45c   : > { %2087 = vmatpush.bf16.msrb.mxu0 %v1870_v57  ;;  %2112 = vmatpush.bf16.msrb.mxu1 %v1876_v12  ;;  %v4431_v36 = vunpack.i.l.bf16 %v4430_v17 }
 0x45f   : > { %2113 = vmatmul.bf16.vlgmr.msrb.gmra.mxu1 %v4977_v23 }
 0x463   : > { %v4435_v20 = vpop.trf.xlu1 }
 0x464   : > { %v4436_v25 = vunpack.i.l.bf16 %v4435_v20  ;;  %v4439_v23 = vunpack.i.h.bf16 %v4435_v20 }
 0x466   : > { %v1864_v29 = vpack.c.bf16 %v4436_v25, %v4431_v36 }
 0x46b   : > { %v4440_v4 = vpop.trf.xlu1 }
 0x46c   : > { %v4441_v43 = vunpack.i.l.bf16 %v4440_v4  ;;  %v4444_v10 = vunpack.i.h.bf16 %v4440_v4 }
 0x46f   : > { %2118 = vmatmul.bf16.gmra.mxu1 %v5009_v9  ;;  %v4434_v9 = vunpack.i.h.bf16 %v4430_v17 }
 0x471   : > { %v1858_v24 = vpack.c.bf16 %v4439_v23, %v4434_v9 }
 0x473   : > { %v4445_v56 = vpop.trf.xlu1 }
 0x474   : > { %v4446_v21 = vunpack.i.l.bf16 %v4445_v56  ;;  %v4449_v15 = vunpack.i.h.bf16 %v4445_v56 }
 0x476   : > { %v1867_v27 = vpack.c.bf16 %v4446_v21, %v4441_v43  ;;  %v1861_v38 = vpack.c.bf16 %v4449_v15, %v4444_v10 }
 0x478   : > { %2088 = vmatpush.bf16.msrb.mxu0 %v1867_v27  ;;  %v5084_v52 = vpop.trf.xlu2 }
 0x479   : > { %v4459_v0 = vunpack.i.l.bf16 %v5084_v52  ;;  %v4462_v7 = vunpack.i.h.bf16 %v5084_v52 }
 0x47b   : > { %v1834_v30 = vpop.trf.xlu1 }
 0x47c   : > { %2089 = vmatpush.bf16.msrb.mxu0 %v1864_v29 }
 0x480   : > { %2090 = vmatpush.bf16.msrb.mxu0 %v1861_v38  ;;  %v5086_v26 = vpop.trf.xlu2 }
 0x481   : > { %v4464_v2 = vunpack.i.l.bf16 %v5086_v26  ;;  %v4467_v57 = vunpack.i.h.bf16 %v5086_v26 }
 0x483   : > { %v1835_v19 = vpop.trf.xlu1  ;;  %v2251_v50 = vpack.c.bf16 %v4464_v2, %v4459_v0  ;;  %v2259_v20 = vpack.c.bf16 %v4467_v57, %v4462_v7 }
 0x484   : > { %2091 = vmatpush.bf16.msrb.mxu0 %v1858_v24  ;;  %v1900_v47 = vpack.c.bf16 %v1835_v19, %v1834_v30 }
 0x488   : > { %2092 = vmatpush.bf16.msrb.mxu0 %v1855_v46  ;;  %v5092_v6 = vpop.trf.xlu2 }
 0x489   : > { %v4472_v52 = vunpack.i.h.bf16 %v5092_v6 }
 0x48b   : > { %v1836_v44 = vpop.trf.xlu1 }
 0x48c   : > { %2093 = vmatpush.bf16.msrb.mxu0 %v1852_v40 }
 0x48f   : > { %2094 = vmatmul.bf16.vlgmr.msrb.gmra.mxu0 %v4969_v58 }
 0x490   : > { %2349 = vmatpush.bf16.msra.mxu0 %v3841_v32  ;;  %v5101_v54 = vpop.trf.xlu2 }
 0x491   : > { %v4477_v15 = vunpack.i.h.bf16 %v5101_v54 }
 0x493   : > { %v1837_v14 = vpop.trf.xlu1  ;;  %v2260_v24 = vpack.c.bf16 %v4477_v15, %v4472_v52 }
 0x494   : > { %2350 = vmatpush.bf16.msra.mxu0 %v3840_v22  ;;  %v1903_v49 = vpack.c.bf16 %v1837_v14, %v1836_v44 }
 0x496   : > { %2130 = vmatpush.bf16.msra.mxu1 %v1903_v49  ;;  %3850 = vmatpush.bf16.msra.mxu2 %v1903_v49 }
 0x498   : > { %v5103_v48 = vpop.trf.xlu2 }
 0x499   : > { %v4479_v51 = vunpack.i.l.bf16 %v5103_v48  ;;  %v4482_v63 = vunpack.i.h.bf16 %v5103_v48 }
 0x49a   : > { %2131 = vmatpush.bf16.msra.mxu1 %v1900_v47  ;;  %3851 = vmatpush.bf16.msra.mxu2 %v1900_v47 }
 0x49d   : > { %3766 = vmatmul.msk.bf16.vlgmr.msra.gmra.mxu1 %vm586_vm0, %v4989_v31  ;;  %3767 = vmatmul.msk.bf16.vlgmr.msra.gmra.mxu2 %vm586_vm0, %v5022_v18  ;;  %v4469_v18 = vunpack.i.l.bf16 %v5092_v6 }
 0x49e   : > { %3852 = vmatpush.bf16.msrb.mxu2 %v3841_v32 }
 0x49f   : > { %2099 = vmatmul.bf16.gmra.mxu0 %v5004_v3  ;;  %v4474_v3 = vunpack.i.l.bf16 %v5101_v54 }
 0x4a0   : > { %v5110_v58 = vpop.trf.xlu2 }
 0x4a1   : > { %v2252_v55 = vpack.c.bf16 %v4474_v3, %v4469_v18  ;;  %v4484_v59 = vunpack.i.l.bf16 %v5110_v58  ;;  %v4487_v6 = vunpack.i.h.bf16 %v5110_v58 }
 0x4a2   : > { %3854 = vmatpush.bf16.msrb.mxu2 %v3840_v22 }
 0x4a3   : > { %v2253_v42 = vpack.c.bf16 %v4484_v59, %v4479_v51  ;;  %v2261_v44 = vpack.c.bf16 %v4487_v6, %v4482_v63 }
 0x4a8   : > { %v4488_v34 = vpop.trf.xlu2 }
 0x4a9   : > { %v4492_v41 = vunpack.i.h.bf16 %v4488_v34  ;;  %v4489_v1 = vunpack.i.l.bf16 %v4488_v34 }
 0x4af   : > { %3776 = vmatmul.msk.bf16.vlgmr.msra.gmra.mxu0 %vm586_vm0, %v2251_v50 }
 0x4b0   : > { %v4493_v53 = vpop.trf.xlu2 }
 0x4b1   : > { %v4497_v61 = vunpack.i.h.bf16 %v4493_v53  ;;  %v4494_v13 = vunpack.i.l.bf16 %v4493_v53 }
 0x4b3   : > { %v2262_v31 = vpack.c.bf16 %v4497_v61, %v4492_v41  ;;  %v2254_v12 = vpack.c.bf16 %v4494_v13, %v4489_v1  ;;  %v5146_v13 = vld [vmem:[%s6154_s6] ss:$0 sm:$0xff] }
 0x4b5   : > { %3787 = vmatmul.msk.bf16.vlgmr.msra.gmra.mxu3 %vm586_vm0, %v2262_v31 }
 0x4b8   : > { %v4498_v5 = vpop.trf.xlu2 }
 0x4b9   : > { %v4499_v43 = vunpack.i.l.bf16 %v4498_v5  ;;  %v4502_v30 = vunpack.i.h.bf16 %v4498_v5 }
 0x4bf   : > { %3777 = vmatmul.msk.bf16.gmra.mxu0 %vm586_vm0, %v2252_v55 }
 0x4c0   : > { %v4503_v35 = vpop.trf.xlu2 }
 0x4c1   : > { %v4504_v27 = vunpack.i.l.bf16 %v4503_v35  ;;  %v4507_v38 = vunpack.i.h.bf16 %v4503_v35 }
 0x4c3   : > { %v2255_v36 = vpack.c.bf16 %v4504_v27, %v4499_v43  ;;  %v2263_v16 = vpack.c.bf16 %v4507_v38, %v4502_v30 }
 0x4c5   : > { %3788 = vmatmul.msk.bf16.gmra.mxu3 %vm586_vm0, %v2263_v16 }
 0x4c8   : > { %v4508_v62 = vpop.trf.xlu2 }
 0x4c9   : > { %v4509_v39 = vunpack.i.l.bf16 %v4508_v62  ;;  %v4512_v32 = vunpack.i.h.bf16 %v4508_v62 }
 0x4cf   : > { %3778 = vmatmul.msk.bf16.gmra.mxu0 %vm586_vm0, %v2253_v42 }
 0x4d0   : > { %v4513_v11 = vpop.trf.xlu2 }
 0x4d1   : > { %v4514_v19 = vunpack.i.l.bf16 %v4513_v11  ;;  %v4517_v40 = vunpack.i.h.bf16 %v4513_v11 }
 0x4d3   : > { %v2256_v46 = vpack.c.bf16 %v4514_v19, %v4509_v39  ;;  %v2264_v22 = vpack.c.bf16 %v4517_v40, %v4512_v32 }
 0x4d5   : > { %3789 = vmatmul.msk.bf16.gmra.mxu3 %vm586_vm0, %v2264_v22 }
 0x4d8   : > { %v4518_v45 = vpop.trf.xlu2 }
 0x4d9   : > { %v4519_v17 = vunpack.i.l.bf16 %v4518_v45  ;;  %v4522_v47 = vunpack.i.h.bf16 %v4518_v45 }
 0x4dc   : > { %v2114_v9 = vpop.f32.mrf.mxu1 }
 0x4df   : > { %3779 = vmatmul.msk.bf16.gmra.mxu0 %vm586_vm0, %v2254_v12 }
 0x4e0   : > { %v4523_v4 = vpop.trf.xlu2 }
 0x4e1   : > { %v4524_v56 = vunpack.i.l.bf16 %v4523_v4  ;;  %v4527_v0 = vunpack.i.h.bf16 %v4523_v4 }
 0x4e3   : > { %v2257_v21 = vpack.c.bf16 %v4524_v56, %v4519_v17  ;;  %v2265_v48 = vpack.c.bf16 %v4527_v0, %v4522_v47 }
 0x4e4   : > { %v2116_v8 = vpop.f32.mrf.mxu1 }
 0x4e5   : > { %3782 = vmatmul.msk.bf16.vlgmr.msrb.gmra.mxu2 %vm586_vm0, %v2257_v21  ;;  %3790 = vmatmul.msk.bf16.gmra.mxu3 %vm586_vm0, %v2265_v48 }
 0x4e8   : > { %v4528_v25 = vpop.trf.xlu2 }
 0x4e9   : > { %v4529_v29 = vunpack.i.l.bf16 %v4528_v25  ;;  %v4532_v18 = vunpack.i.h.bf16 %v4528_v25 }
 0x4ec   : > { %v2119_v54 = vpop.f32.mrf.mxu1 }
 0x4ef   : > { %3780 = vmatmul.msk.bf16.gmra.mxu0 %vm586_vm0, %v2255_v36 }
 0x4f0   : > { %v4533_v10 = vpop.trf.xlu2 }
 0x4f1   : > { %v4534_v23 = vunpack.i.l.bf16 %v4533_v10  ;;  %v4537_v3 = vunpack.i.h.bf16 %v4533_v10 }
 0x4f3   : > { %v2258_v26 = vpack.c.bf16 %v4534_v23, %v4529_v29  ;;  %v2266_v11 = vpack.c.bf16 %v4537_v3, %v4532_v18 }
 0x4f4   : > { %v2121_v49 = vpop.f32.mrf.mxu1 }
 0x4f5   : > { %3783 = vmatmul.msk.bf16.gmra.mxu2 %vm586_vm0, %v2258_v26  ;;  %3791 = vmatmul.msk.bf16.gmra.mxu3 %vm586_vm0, %v2266_v11 }
 0x4ff   : > { %3781 = vmatmul.msk.bf16.gmra.mxu0 %vm586_vm0, %v2256_v46 }
 0x505   : > { %3784 = vmatmul.msk.bf16.gmra.mxu2 %vm586_vm0, %v2259_v20 }
 0x50c   : > { %v2095_v14 = vpop.f32.mrf.mxu0 }
 0x50d   : > { %v2096_v34 = vadd.f32 %v2095_v14, %v5066_v28 }
 0x50f   : > { %v2115_v58 = vadd.f32 %v2114_v9, %v2096_v34 }
 0x514   : > { %v2097_v2 = vpop.f32.mrf.mxu0 }
 0x515   : > { %3785 = vmatmul.msk.bf16.gmra.mxu2 %vm586_vm0, %v2260_v24  ;;  %v2098_v61 = vadd.f32 %v2097_v2, %v5069_v37 }
 0x517   : > { %v2117_v55 = vadd.f32 %v2116_v8, %v2098_v61 }
 0x51a   : > { %v2133_v50 = vpop.f32.mrf.mxu1 }
 0x51b   : > { %v2134_v41 = vadd.f32 %v2133_v50, %v2115_v58 }
 0x51c   : > { %v2100_v53 = vpop.f32.mrf.mxu0 }
 0x51d   : > { %v2145_v31 = vmax.f32 %v2134_v41, 0.0  ;;  %v2101_v5 = vadd.f32 %v2100_v53, %v5074_v33 }
 0x51f   : > { %2219 = vxpose.xlu0.b32.start [1/4] (short) (narrow) %v2145_v31, 32  ;;  %v2120_v62 = vadd.f32 %v2119_v54, %v2101_v5 }
 0x520   : > { %v2138_v51 = vpop.f32.mrf.mxu2 }
 0x521   : > { %v2139_v1 = vadd.f32 %v2138_v51, %v2120_v62 }
 0x522   : > { %v2135_v35 = vpop.f32.mrf.mxu1 }
 0x523   : > { %v2136_v28 = vadd.f32 %v2135_v35, %v2117_v55  ;;  %v2151_v45 = vmax.f32 %v2139_v1, 0.0 }
 0x524   : > { %v2102_v59 = vpop.f32.mrf.mxu0 }
 0x525   : > { %v2148_v42 = vmax.f32 %v2136_v28, 0.0  ;;  %3786 = vmatmul.msk.bf16.gmra.mxu2 %vm586_vm0, %v2261_v44  ;;  %v2103_v37 = vadd.f32 %v2102_v59, %v5076_v60 }
 0x527   : > { %2220 = vxpose.xlu0.b32.cont [2/4] (short) (narrow) %v2148_v42, 32  ;;  %v2122_v7 = vadd.f32 %v2121_v49, %v2103_v37 }
 0x528   : > { %v2140_v12 = vpop.f32.mrf.mxu2 }
 0x529   : > { %v2141_v4 = vadd.f32 %v2140_v12, %v2122_v7 }
 0x52b   : > { %v2154_v21 = vmax.f32 %v2141_v4, 0.0 }
 0x52c   : > { %v2352_v33 = vpop.f32.mrf.mxu0 }
 0x52d   : > { %v5150_v57 = vadd.f32 %v5146_v13, %v2352_v33 }
 0x52f   : > { %2221 = vxpose.xlu0.b32.cont [3/4] (short) (narrow) %v2151_v45, 32  ;;  %v6231_v17 = vrot.slane %v5150_v57, 2  ;;  %v6229_v20 = vrot.slane %v5150_v57, 4  ;;  %v6228_v60 = vrot.slane %v5150_v57, 6  ;;  %2670 = vst [vmem:[#allocation1] ss:$4 sm:$0xff] %v5150_v57 }
 0x531   : > { %2676 = vst [vmem:[#allocation1 + $0x3] ss:$4 sm:$0xff] %v6228_v60 }
 0x532   : > { %2672 = vst [vmem:[#allocation1 + $0x1] ss:$4 sm:$0xff] %v6231_v17 }
 0x533   : > { %2674 = vst [vmem:[#allocation1 + $0x2] ss:$4 sm:$0xff] %v6229_v20 }
 0x534   : > { %v2354_v56 = vpop.f32.mrf.mxu0 }
 0x535   : > { %v5163_v43 = vadd.f32 %v5146_v13, %v2354_v56 }
 0x537   : > { %2222 = vxpose.xlu0.b32.end [4/4] (short) (narrow) %v2154_v21, 32  ;;  %v6220_v27 = vrot.slane %v5163_v43, 2  ;;  %v6218_v25 = vrot.slane %v5163_v43, 4  ;;  %2678 = vst [vmem:[#allocation1 + $0x20] ss:$4 sm:$0xff] %v5163_v43  ;;  %v6217_v36 = vrot.slane %v5163_v43, 6 }
 0x539   : > { %2680 = vst [vmem:[#allocation1 + $0x21] ss:$4 sm:$0xff] %v6220_v27 }
 0x53a   : > { %2682 = vst [vmem:[#allocation1 + $0x22] ss:$4 sm:$0xff] %v6218_v25  ;;  %v5178_v15 = vld.sshfl [vmem:[#allocation1] sm:$0xff pattern:$0x73625140] }
 0x53b   : > { %2684 = vst [vmem:[#allocation1 + $0x23] ss:$4 sm:$0xff] %v6217_v36 }
 0x53c   : > { %v2357_v29 = vpop.f32.mrf.mxu0 }
 0x53d   : > { %v5176_v52 = vadd.f32 %v5146_v13, %v2357_v29 }
 0x53f   : > { %v6213_v30 = vrot.slane %v5176_v52, 2  ;;  %v6212_v10 = vrot.slane %v5176_v52, 4  ;;  %v6210_v38 = vrot.slane %v5176_v52, 6 }
 0x541   : > { %2687 = vst [vmem:[#allocation1] ss:$4 sm:$0xff] %v6213_v30 }
 0x542   : > { %2688 = vst [vmem:[#allocation1 + $0x1] ss:$4 sm:$0xff] %v6212_v10  ;;  %v5192_v9 = vld.sshfl [vmem:[#allocation1 + $0x20] sm:$0xff pattern:$0x73625140] }
 0x543   : > { %2689 = vst [vmem:[#allocation1 + $0x2] ss:$4 sm:$0xff] %v6210_v38 }
 0x544   : > { %v2359_v23 = vpop.f32.mrf.mxu0 }
 0x545   : > { %v5190_v26 = vadd.f32 %v5146_v13, %v2359_v23 }
 0x547   : > { %v6208_v24 = vrot.slane %v5190_v26, 2  ;;  %v6203_v16 = vrot.slane %v5190_v26, 4  ;;  %v6201_v39 = vrot.slane %v5190_v26, 6  ;;  %2690 = vst [vmem:[#allocation1 + $0x3] ss:$4 sm:$0xff] %v5190_v26 }
 0x549   : > { %2691 = vst [vmem:[#allocation1 + $0x20] ss:$4 sm:$0xff] %v6208_v24 }
 0x54a   : > { %2692 = vst [vmem:[#allocation1 + $0x21] ss:$4 sm:$0xff] %v6203_v16 }
 0x54b   : > { %2693 = vst [vmem:[#allocation1 + $0x22] ss:$4 sm:$0xff] %v6201_v39 }
 0x54c   : > { %v2362_v19 = vpop.f32.mrf.mxu0 }
 0x54d   : > { %v5205_v46 = vadd.f32 %v5146_v13, %v2362_v19 }
 0x54e   : > { %v5207_v8 = vld.sshfl [vmem:[#allocation1] sm:$0xff pattern:$0x73625140] }
 0x54f   : > { %v6198_v63 = vrot.slane %v5205_v46, 4  ;;  %v6197_v6 = vrot.slane %v5205_v46, 6  ;;  %2694 = vst [vmem:[#allocation1 + $0x23] ss:$4 sm:$0xff] %v5205_v46 }
 0x551   : > { %2697 = vst [vmem:[#allocation1] ss:$4 sm:$0xff] %v6198_v63 }
 0x552   : > { %2698 = vst [vmem:[#allocation1 + $0x1] ss:$4 sm:$0xff] %v6197_v6 }
 0x554   : > { %v2364_v32 = vpop.f32.mrf.mxu0 }
 0x555   : > { %v5217_v40 = vadd.f32 %v5146_v13, %v2364_v32  ;;  %v5307_v32 = vpop.f32.mrf.mxu3 }
 0x556   : > { %v5219_v44 = vld.sshfl [vmem:[#allocation1 + $0x20] sm:$0xff pattern:$0x73625140] }
 0x557   : > { %v6193_v22 = vrot.slane %v5217_v40, 2  ;;  %v6192_v54 = vrot.slane %v5217_v40, 4  ;;  %v6191_v14 = vrot.slane %v5217_v40, 6  ;;  %2699 = vst [vmem:[#allocation1 + $0x2] ss:$4 sm:$0xff] %v5217_v40 }
 0x559   : > { %2700 = vst [vmem:[#allocation1 + $0x3] ss:$4 sm:$0xff] %v6193_v22 }
 0x55a   : > { %2701 = vst [vmem:[#allocation1 + $0x20] ss:$4 sm:$0xff] %v6192_v54 }
 0x55b   : > { %2702 = vst [vmem:[#allocation1 + $0x21] ss:$4 sm:$0xff] %v6191_v14 }
 0x55c   : > { %v2367_v49 = vpop.f32.mrf.mxu0 }
 0x55d   : > { %v5232_v47 = vadd.f32 %v5146_v13, %v2367_v49 }
 0x55f   : > { %v6187_v0 = vrot.slane %v5232_v47, 2  ;;  %v6186_v2 = vrot.slane %v5232_v47, 6  ;;  %2703 = vst [vmem:[#allocation1 + $0x22] ss:$4 sm:$0xff] %v5232_v47 }
 0x560   : > { %v5237_v34 = vld.sshfl [vmem:[#allocation1] sm:$0xff pattern:$0x73625140] }
 0x561   : > { %2704 = vst [vmem:[#allocation1 + $0x23] ss:$4 sm:$0xff] %v6187_v0 }
 0x562   : > { %2707 = vst [vmem:[#allocation1] ss:$4 sm:$0xff] %v6186_v2 }
 0x564   : > { %v2369_v48 = vpop.f32.mrf.mxu0 }
 0x565   : > { %v5244_v58 = vadd.f32 %v5146_v13, %v2369_v48 }
 0x567   : > { %v6183_v50 = vrot.slane %v5244_v58, 2  ;;  %v6181_v41 = vrot.slane %v5244_v58, 4  ;;  %v6177_v53 = vrot.slane %v5244_v58, 6  ;;  %2708 = vst [vmem:[#allocation1 + $0x1] ss:$4 sm:$0xff] %v5244_v58 }
 0x568   : > { %v2382_v61 = vpop.f32.mrf.mxu2  ;;  %v5250_v31 = vld.sshfl [vmem:[#allocation1 + $0x20] sm:$0xff pattern:$0x73625140] }
 0x569   : > { %2709 = vst [vmem:[#allocation1 + $0x2] ss:$4 sm:$0xff] %v6183_v50  ;;  %v5293_v21 = vadd.f32 %v5146_v13, %v2382_v61 }
 0x56a   : > { %2710 = vst [vmem:[#allocation1 + $0x3] ss:$4 sm:$0xff] %v6181_v41 }
 0x56b   : > { %2711 = vst [vmem:[#allocation1 + $0x20] ss:$4 sm:$0xff] %v6177_v53  ;;  %v6164_v61 = vrot.slane %v5293_v21, 2 }
 0x56c   : > { %v2372_v18 = vpop.f32.mrf.mxu0 }
 0x56d   : > { %v5259_v3 = vadd.f32 %v5146_v13, %v2372_v18 }
 0x56f   : > { %v6176_v5 = vrot.slane %v5259_v3, 2  ;;  %v6172_v55 = vrot.slane %v5259_v3, 4  ;;  %2712 = vst [vmem:[#allocation1 + $0x21] ss:$4 sm:$0xff] %v5259_v3 }
 0x570   : > { %v2384_v35 = vpop.f32.mrf.mxu2 }
 0x571   : > { %2713 = vst [vmem:[#allocation1 + $0x22] ss:$4 sm:$0xff] %v6176_v5  ;;  %v5268_v28 = vld.sshfl [vmem:[#allocation1] sm:$0xff pattern:$0x73625140] }
 0x572   : > { %2714 = vst [vmem:[#allocation1 + $0x23] ss:$4 sm:$0xff] %v6172_v55 }
 0x574   : > { %v2374_v51 = vpop.f32.mrf.mxu0 }
 0x575   : > { %v5271_v59 = vadd.f32 %v5146_v13, %v2374_v51  ;;  %v6166_v51 = vrot.slane %v5293_v21, 4 }
 0x577   : > { %v6171_v62 = vrot.slane %v5271_v59, 2  ;;  %v6170_v42 = vrot.slane %v5271_v59, 4  ;;  %v6168_v11 = vrot.slane %v5271_v59, 6  ;;  %2717 = vst [vmem:[#allocation1] ss:$4 sm:$0xff] %v5271_v59 }
 0x578   : > { %v2387_v1 = vpop.f32.mrf.mxu2 }
 0x579   : > { %2718 = vst [vmem:[#allocation1 + $0x1] ss:$4 sm:$0xff] %v6171_v62  ;;  %v5283_v37 = vld.sshfl [vmem:[#allocation1 + $0x20] sm:$0xff pattern:$0x73625140] }
 0x57a   : > { %2719 = vst [vmem:[#allocation1 + $0x2] ss:$4 sm:$0xff] %v6170_v42 }
 0x57b   : > { %2720 = vst [vmem:[#allocation1 + $0x3] ss:$4 sm:$0xff] %v6168_v11 }
 0x57c   : > { %v2377_v33 = vpop.f32.mrf.mxu0 }
 0x57d   : > { %v5286_v45 = vadd.f32 %v5146_v13, %v2377_v33  ;;  %v6167_v33 = vrot.slane %v5293_v21, 6 }
 0x57f   : > { %v6165_v7 = vrot.slane %v5286_v45, 2  ;;  %v6161_v12 = vrot.slane %v5286_v45, 4  ;;  %2721 = vst [vmem:[#allocation1 + $0x20] ss:$4 sm:$0xff] %v5286_v45  ;;  %v6160_v56 = vrot.slane %v5286_v45, 6 }
 0x580   : > { %v2389_v4 = vpop.f32.mrf.mxu2 }
 0x581   : > { %2722 = vst [vmem:[#allocation1 + $0x21] ss:$4 sm:$0xff] %v6165_v7 }
 0x582   : > { %v5297_v29 = vld.sshfl [vmem:[#allocation1] sm:$0xff pattern:$0x73625140]  ;;  %2723 = vst [vmem:[#allocation1 + $0x22] ss:$4 sm:$0xff] %v6161_v12 }
 0x583   : > { %2730 = vst [vmem:[#allocation1 + $0x3] ss:$4 sm:$0xff] %v5293_v21 }
 0x584   : > { %2724 = vst [vmem:[#allocation1 + $0x23] ss:$4 sm:$0xff] %v6160_v56  ;;  %v2379_v23 = vpop.f32.mrf.mxu0 }
 0x585   : > { %v5305_v19 = vadd.f32 %v5146_v13, %v2379_v23  ;;  %v5319_v23 = vadd.f32 %v5146_v13, %v2384_v35 }
 0x587   : > { %v6162_v49 = vrot.slane %v5305_v19, 2  ;;  %v6163_v48 = vrot.slane %v5305_v19, 4  ;;  %v6169_v12 = vrot.slane %v5305_v19, 6 }
 0x588   : > { %v2392_v18 = vpop.f32.mrf.mxu2 }
 0x589   : > { %2727 = vst [vmem:[#allocation1] ss:$4 sm:$0xff] %v6162_v49  ;;  %v5331_v49 = vadd.f32 %v5146_v13, %v2387_v1  ;;  %v6178_v1 = vrot.slane %v5319_v23, 4 }
 0x58a   : > { %2728 = vst [vmem:[#allocation1 + $0x1] ss:$4 sm:$0xff] %v6163_v48  ;;  %v5336_v48 = vpop.f32.mrf.mxu3 }
 0x58b   : > { %v5321_v56 = vld.sshfl [vmem:[#allocation1 + $0x20] sm:$0xff pattern:$0x73625140]  ;;  %2729 = vst [vmem:[#allocation1 + $0x2] ss:$4 sm:$0xff] %v6169_v12  ;;  %v6173_v7 = vrot.slane %v5331_v49, 4  ;;  %v5460_v16 = vadd.f32 %v5146_v13, %v5336_v48 }
 0x58c   : > { %2731 = vst [vmem:[#allocation1 + $0x20] ss:$4 sm:$0xff] %v6164_v61  ;;  %v5339_v61 = vadd.f32 %v5146_v13, %v2389_v4  ;;  %v6179_v12 = vrot.slane %v5319_v23, 6  ;;  %v6180_v62 = vrot.slane %v5331_v49, 2 }
 0x58d   : > { %2732 = vst [vmem:[#allocation1 + $0x21] ss:$4 sm:$0xff] %v6166_v51  ;;  %v6174_v51 = vrot.slane %v5331_v49, 6 }
 0x58e   : > { %2733 = vst [vmem:[#allocation1 + $0x22] ss:$4 sm:$0xff] %v6167_v33  ;;  %v6175_v33 = vrot.slane %v5339_v61, 2 }
 0x58f   : > { %2734 = vst [vmem:[#allocation1 + $0x23] ss:$4 sm:$0xff] %v5319_v23 }
 0x590   : > { %v2394_v35 = vpop.f32.mrf.mxu2 }
 0x592   : > { %v5352_v4 = vld.sshfl [vmem:[#allocation1] sm:$0xff pattern:$0x73625140]  ;;  %v5358_v55 = vpop.f32.mrf.mxu3 }
 0x593   : > { %2737 = vst [vmem:[#allocation1] ss:$4 sm:$0xff] %v6178_v1  ;;  %v6188_v1 = vrot.slane %v5339_v61, 6 }
 0x594   : > { %2738 = vst [vmem:[#allocation1 + $0x1] ss:$4 sm:$0xff] %v6179_v12 }
 0x595   : > { %2739 = vst [vmem:[#allocation1 + $0x2] ss:$4 sm:$0xff] %v5331_v49 }
 0x596   : > { %v5344_v11 = vld.sshfl [vmem:[#allocation1 + $0x20] sm:$0xff pattern:$0x73625140]  ;;  %2740 = vst [vmem:[#allocation1 + $0x3] ss:$4 sm:$0xff] %v6180_v62 }
 0x597   : > { %2741 = vst [vmem:[#allocation1 + $0x20] ss:$4 sm:$0xff] %v6173_v7  ;;  %v5363_v7 = vadd.f32 %v5146_v13, %v2392_v18 }
 0x598   : > { %2742 = vst [vmem:[#allocation1 + $0x21] ss:$4 sm:$0xff] %v6174_v51  ;;  %v2397_v42 = vpop.f32.mrf.mxu2  ;;  %v5371_v51 = vadd.f32 %v5146_v13, %v2394_v35 }
 0x599   : > { %2743 = vst [vmem:[#allocation1 + $0x22] ss:$4 sm:$0xff] %v5339_v61  ;;  %v6189_v41 = vrot.slane %v5363_v7, 2  ;;  %v6190_v50 = vrot.slane %v5363_v7, 4 }
 0x59a   : > { %2744 = vst [vmem:[#allocation1 + $0x23] ss:$4 sm:$0xff] %v6175_v33  ;;  %v6182_v33 = vrot.slane %v5363_v7, 6  ;;  %v6184_v18 = vrot.slane %v5371_v51, 2  ;;  %v6185_v12 = vrot.slane %v5371_v51, 4  ;;  %v5384_v35 = vpop.f32.mrf.mxu3 }
 0x59d   : > { %v5386_v62 = vld.sshfl [vmem:[#allocation1] sm:$0xff pattern:$0x73625140] }
 0x59e   : > { %2747 = vst [vmem:[#allocation1] ss:$4 sm:$0xff] %v6188_v1 }
 0x59f   : > { %2748 = vst [vmem:[#allocation1 + $0x1] ss:$4 sm:$0xff] %v5363_v7 }
 0x5a0   : > { %v2399_v5 = vpop.f32.mrf.mxu2  ;;  %2749 = vst [vmem:[#allocation1 + $0x2] ss:$4 sm:$0xff] %v6189_v41 }
 0x5a1   : > { %v5374_v53 = vld.sshfl [vmem:[#allocation1 + $0x20] sm:$0xff pattern:$0x73625140]  ;;  %2750 = vst [vmem:[#allocation1 + $0x3] ss:$4 sm:$0xff] %v6190_v50 }
 0x5a2   : > { %2751 = vst [vmem:[#allocation1 + $0x20] ss:$4 sm:$0xff] %v6182_v33  ;;  %v5394_v33 = vadd.f32 %v5146_v13, %v2399_v5  ;;  %v5407_v5 = vadd.f32 %v5146_v13, %v2397_v42  ;;  %v2417_v41 = vpop.f32.mrf.mxu3 }
 0x5a3   : > { %2752 = vst [vmem:[#allocation1 + $0x21] ss:$4 sm:$0xff] %v5371_v51  ;;  %v5489_v30 = vadd.f32 %v5146_v13, %v2417_v41 }
 0x5a4   : > { %2753 = vst [vmem:[#allocation1 + $0x22] ss:$4 sm:$0xff] %v6184_v18  ;;  %v6195_v2 = vrot.slane %v5394_v33, 4  ;;  %v6196_v1 = vrot.slane %v5394_v33, 6  ;;  %v6199_v14 = vrot.slane %v5407_v5, 2  ;;  %v6200_v54 = vrot.slane %v5407_v5, 4 }
 0x5a5   : > { %2754 = vst [vmem:[#allocation1 + $0x23] ss:$4 sm:$0xff] %v6185_v12  ;;  %v6194_v12 = vrot.slane %v5394_v33, 2 }
 0x5a6   : > { %6256 = vst [vmem:[#allocation3_spill] sm:$0xff] %v5489_v30 }
 0x5a8   : > { %v2402_v18 = vpop.f32.mrf.mxu2  ;;  %v5415_v50 = vld.sshfl [vmem:[#allocation1] sm:$0xff pattern:$0x73625140] }
 0x5a9   : > { %2757 = vst [vmem:[#allocation1] ss:$4 sm:$0xff] %v5407_v5 }
 0x5aa   : > { %2758 = vst [vmem:[#allocation1 + $0x1] ss:$4 sm:$0xff] %v6199_v14 }
 0x5ab   : > { %2759 = vst [vmem:[#allocation1 + $0x2] ss:$4 sm:$0xff] %v6200_v54 }
 0x5ac   : > { %v5404_v0 = vld.sshfl [vmem:[#allocation1 + $0x20] sm:$0xff pattern:$0x73625140] }
 0x5ad   : > { %2761 = vst [vmem:[#allocation1 + $0x20] ss:$4 sm:$0xff] %v5394_v33 }
 0x5ae   : > { %2762 = vst [vmem:[#allocation1 + $0x21] ss:$4 sm:$0xff] %v6194_v12  ;;  %v6202_v12 = vrot.slane %v5407_v5, 6 }
 0x5af   : > { %2763 = vst [vmem:[#allocation1 + $0x22] ss:$4 sm:$0xff] %v6195_v2  ;;  %v5432_v2 = vadd.f32 %v5146_v13, %v5307_v32  ;;  %v2419_v32 = vpop.f32.mrf.mxu3 }
 0x5b0   : > { %2764 = vst [vmem:[#allocation1 + $0x23] ss:$4 sm:$0xff] %v6196_v1  ;;  %v2404_v42 = vpop.f32.mrf.mxu2  ;;  %v5437_v1 = vadd.f32 %v5146_v13, %v2402_v18 }
 0x5b1   : > { %v5423_v22 = vadd.f32 %v5146_v13, %v2404_v42  ;;  %2760 = vst [vmem:[#allocation1 + $0x3] ss:$4 sm:$0xff] %v6202_v12  ;;  %v6221_v38 = vrot.slane %v5432_v2, 6 }
 0x5b2   : > { %v6207_v54 = vrot.slane %v5437_v1, 2  ;;  %v6209_v39 = vrot.slane %v5437_v1, 4  ;;  %v6211_v18 = vrot.slane %v5437_v1, 6 }
 0x5b3   : > { %v6204_v42 = vrot.slane %v5423_v22, 2  ;;  %v6205_v6 = vrot.slane %v5423_v22, 4  ;;  %v6206_v14 = vrot.slane %v5423_v22, 6 }
 0x5b7   : > { %v5441_v63 = vld.sshfl [vmem:[#allocation1 + $0x20] sm:$0xff pattern:$0x73625140]  ;;  %v2422_v24 = vpop.f32.mrf.mxu3 }
 0x5b8   : > { %2774 = vst [vmem:[#allocation1 + $0x23] ss:$4 sm:$0xff] %v5432_v2  ;;  %v5452_v12 = vld.sshfl [vmem:[#allocation1] sm:$0xff pattern:$0x73625140] }
 0x5b9   : > { %2771 = vst [vmem:[#allocation1 + $0x20] ss:$4 sm:$0xff] %v6204_v42  ;;  %v5466_v42 = vadd.f32 %v5146_v13, %v5358_v55 }
 0x5ba   : > { %2772 = vst [vmem:[#allocation1 + $0x21] ss:$4 sm:$0xff] %v6205_v6  ;;  %v6216_v6 = vrot.slane %v5460_v16, 4 }
 0x5bb   : > { %2773 = vst [vmem:[#allocation1 + $0x22] ss:$4 sm:$0xff] %v6206_v14  ;;  %v6214_v14 = vrot.slane %v5460_v16, 6 }
 0x5bc   : > { %2767 = vst [vmem:[#allocation1] ss:$4 sm:$0xff] %v6207_v54  ;;  %v6215_v54 = vrot.slane %v5466_v42, 2 }
 0x5bd   : > { %2768 = vst [vmem:[#allocation1 + $0x1] ss:$4 sm:$0xff] %v6209_v39  ;;  %v6219_v39 = vrot.slane %v5432_v2, 4 }
 0x5be   : > { %2769 = vst [vmem:[#allocation1 + $0x2] ss:$4 sm:$0xff] %v6211_v18  ;;  %v6226_v18 = vrot.slane %v5460_v16, 2 }
 0x5bf   : > { %2770 = vst [vmem:[#allocation1 + $0x3] ss:$4 sm:$0xff] %v5423_v22  ;;  %v2424_v36 = vpop.f32.mrf.mxu3 }
 0x5c2   : > { %v5474_v48 = vld.sshfl [vmem:[#allocation1 + $0x20] sm:$0xff pattern:$0x73625140] }
 0x5c3   : > { %2781 = vst [vmem:[#allocation1 + $0x20] ss:$4 sm:$0xff] %v6216_v6  ;;  %v2235_v55 = vpop.trf.xlu0 }
 0x5c4   : > { %2782 = vst [vmem:[#allocation1 + $0x21] ss:$4 sm:$0xff] %v6214_v14  ;;  %v5498_v14 = vadd.f32 %v5146_v13, %v5384_v35 }
 0x5c5   : > { %2783 = vst [vmem:[#allocation1 + $0x22] ss:$4 sm:$0xff] %v5466_v42 }
 0x5c6   : > { %v5484_v10 = vld.sshfl [vmem:[#allocation1] sm:$0xff pattern:$0x73625140]  ;;  %2784 = vst [vmem:[#allocation1 + $0x23] ss:$4 sm:$0xff] %v6215_v54  ;;  %v6222_v54 = vrot.slane %v5489_v30, 2 }
 0x5c7   : > { %2777 = vst [vmem:[#allocation1] ss:$4 sm:$0xff] %v6219_v39  ;;  %v6223_v41 = vrot.slane %v5498_v14, 6  ;;  %v6224_v39 = vrot.slane %v5489_v30, 4  ;;  %v6227_v35 = vrot.slane %v5498_v14, 2 }
 0x5c8   : > { %2778 = vst [vmem:[#allocation1 + $0x1] ss:$4 sm:$0xff] %v6221_v38  ;;  %v6225_v38 = vrot.slane %v5466_v42, 6 }
 0x5c9   : > { %2779 = vst [vmem:[#allocation1 + $0x2] ss:$4 sm:$0xff] %v5460_v16 }
 0x5ca   : > { %6257 = vst [vmem:[#allocation4_spill] sm:$0xff] %v5498_v14 }
 0x5cb   : > { %2780 = vst [vmem:[#allocation1 + $0x3] ss:$4 sm:$0xff] %v6226_v18  ;;  %v2236_v6 = vpop.trf.xlu0  ;;  %v3848_v18 = vld [vmem:[%s6155_s7 + $0x30] sm:$0xff] }
 0x5cc   : > { %v2267_v25 = vpack.c.bf16 %v2236_v6, %v2235_v55  ;;  %v6230_v6 = vrot.slane %v5498_v14, 4 }
 0x5cd   : > { %v5505_v27 = vld.sshfl [vmem:[#allocation1 + $0x20] sm:$0xff pattern:$0x73625140] }
 0x5ce   : > { %2792 = vst [vmem:[#allocation1 + $0x21] ss:$4 sm:$0xff] %v5489_v30  ;;  %3792 = vmatmul.msk.bf16.gmra.mxu3 %vm586_vm0, %v2267_v25  ;;  %v5523_v25 = vadd.f32 %v5146_v13, %v2422_v24  ;;  %v2427_v24 = vpop.f32.mrf.mxu3 }
 0x5cf   : > { %2793 = vst [vmem:[#allocation1 + $0x22] ss:$4 sm:$0xff] %v6222_v54 }
 0x5d0   : > { %2791 = vst [vmem:[#allocation1 + $0x20] ss:$4 sm:$0xff] %v6223_v41  ;;  %v3849_v41 = vld [vmem:[%s6155_s7 + $0x38] sm:$0xff]  ;;  %v6259_v30 = vrot.slane %v5523_v25, 6 }
 0x5d1   : > { %2794 = vst [vmem:[#allocation1 + $0x23] ss:$4 sm:$0xff] %v6224_v39  ;;  %v5534_v39 = vadd.f32 %v5146_v13, %v2419_v32  ;;  %2983 = vmatpush.bf16.msrb.mxu0 %v3849_v41 }
 0x5d2   : > { %v5516_v55 = vld.sshfl [vmem:[#allocation1] sm:$0xff pattern:$0x73625140]  ;;  %6258 = vst [vmem:[#allocation5_spill] sm:$0xff] %v5523_v25 }
 0x5d3   : > { %2787 = vst [vmem:[#allocation1] ss:$4 sm:$0xff] %v6225_v38  ;;  %v2237_v54 = vpop.trf.xlu0  ;;  %v6237_v38 = vrot.slane %v5523_v25, 2  ;;  %v6239_v32 = vrot.slane %v5534_v39, 4  ;;  %v6238_v60 = vrot.slane %v5534_v39, 6 }
 0x5d4   : > { %2788 = vst [vmem:[#allocation1 + $0x1] ss:$4 sm:$0xff] %v5498_v14  ;;  %v5557_v14 = vadd.f32 %v5146_v13, %v2427_v24 }
 0x5d5   : > { %2789 = vst [vmem:[#allocation1 + $0x2] ss:$4 sm:$0xff] %v6227_v35  ;;  %v6236_v35 = vrot.slane %v5523_v25, 4  ;;  %2984 = vmatpush.bf16.msrb.mxu0 %v3848_v18  ;;  %v6261_v18 = vrot.slane %v5534_v39, 2 }
 0x5d6   : > { %2790 = vst [vmem:[#allocation1 + $0x3] ss:$4 sm:$0xff] %v6230_v6  ;;  %v2429_v24 = vpop.f32.mrf.mxu3 }
 0x5d7   : > { %6260 = vst [vmem:[#allocation6_spill] sm:$0xff] %v5557_v14 }
 0x5d8   : > { %v5542_v20 = vld.sshfl [vmem:[#allocation1 + $0x20] sm:$0xff pattern:$0x73625140] }
 0x5d9   : > { %2801 = vst [vmem:[#allocation1 + $0x20] ss:$4 sm:$0xff] %v5523_v25 }
 0x5da   : > { %2802 = vst [vmem:[#allocation1 + $0x21] ss:$4 sm:$0xff] %v6237_v38 }
 0x5db   : > { %2803 = vst [vmem:[#allocation1 + $0x22] ss:$4 sm:$0xff] %v6236_v35  ;;  %v2238_v41 = vpop.trf.xlu0  ;;  %v5568_v35 = vadd.f32 %v5146_v13, %v2424_v36 }
 0x5dc   : > { %2804 = vst [vmem:[#allocation1 + $0x23] ss:$4 sm:$0xff] %v6259_v30  ;;  %v2268_v6 = vpack.c.bf16 %v2238_v41, %v2237_v54  ;;  %v6242_v30 = vrot.slane %v5557_v14, 2  ;;  %v6240_v54 = vrot.slane %v5557_v14, 4  ;;  %v6241_v41 = vrot.slane %v5557_v14, 6 }
 0x5dd   : > { %v5551_v17 = vld.sshfl [vmem:[#allocation1] sm:$0xff pattern:$0x73625140]  ;;  %6262 = vst [vmem:[#allocation7_spill] sm:$0xff] %v5568_v35  ;;  %v6243_v36 = vrot.slane %v5568_v35, 4 }
 0x5de   : > { %2797 = vst [vmem:[#allocation1] ss:$4 sm:$0xff] %v5534_v39  ;;  %3793 = vmatmul.msk.bf16.gmra.mxu3 %vm586_vm0, %v2268_v6  ;;  %v5576_v6 = vadd.f32 %v5146_v13, %v2429_v24 }
 0x5df   : > { %2798 = vst [vmem:[#allocation1 + $0x1] ss:$4 sm:$0xff] %v6261_v18  ;;  %v6245_v18 = vrot.slane %v5568_v35, 2 }
 0x5e0   : > { %2799 = vst [vmem:[#allocation1 + $0x2] ss:$4 sm:$0xff] %v6239_v32  ;;  %v6252_v24 = vrot.slane %v5576_v6, 4 }
 0x5e1   : > { %2800 = vst [vmem:[#allocation1 + $0x3] ss:$4 sm:$0xff] %v6238_v60  ;;  %v6244_v60 = vrot.slane %v5568_v35, 6 }
 0x5e2   : > { %6263 = vst [vmem:[#allocation8_spill] sm:$0xff] %v5576_v6 }
 0x5e3   : > { %v5573_v38 = vld.sshfl [vmem:[#allocation1 + $0x20] sm:$0xff pattern:$0x73625140] }
 0x5e4   : > { %2811 = vst [vmem:[#allocation1 + $0x20] ss:$4 sm:$0xff] %v6242_v30  ;;  %v2869_v30 = vadd.f32 %v5192_v9, %v5178_v15 }
 0x5e5   : > { %2812 = vst [vmem:[#allocation1 + $0x21] ss:$4 sm:$0xff] %v6240_v54  ;;  %v6255_v54 = vrot.slane %v5576_v6, 6 }
 0x5e6   : > { %2813 = vst [vmem:[#allocation1 + $0x22] ss:$4 sm:$0xff] %v6241_v41 }
 0x5e7   : > { %2814 = vst [vmem:[#allocation1 + $0x23] ss:$4 sm:$0xff] %v5576_v6 }
 0x5e8   : > { %v5587_v32 = vld.sshfl [vmem:[#allocation1] sm:$0xff pattern:$0x73625140] }
 0x5e9   : > { %2807 = vst [vmem:[#allocation1] ss:$4 sm:$0xff] %v6245_v18 }
 0x5ea   : > { %2808 = vst [vmem:[#allocation1 + $0x1] ss:$4 sm:$0xff] %v6243_v36  ;;  %v2870_v36 = vadd.f32 %v2869_v30, %v5207_v8 }
 0x5eb   : > { %2809 = vst [vmem:[#allocation1 + $0x2] ss:$4 sm:$0xff] %v6244_v60 }
 0x5ec   : > { %2810 = vst [vmem:[#allocation1 + $0x3] ss:$4 sm:$0xff] %v5557_v14  ;;  %v2871_v60 = vadd.f32 %v2870_v36, %v5219_v44 }
 0x5ee   : > { %v2872_v18 = vadd.f32 %v2871_v60, %v5237_v34  ;;  %v3847_v60 = vld [vmem:[%s6155_s7 + $0x28] sm:$0xff]  ;;  %v3846_v34 = vld [vmem:[%s6155_s7 + $0x20] sm:$0xff] }
 0x5ef   : > { %2985 = vmatpush.bf16.msrb.mxu0 %v3847_v60 }
 0x5f0   : > { %v2873_v14 = vadd.f32 %v2872_v18, %v5250_v31  ;;  %v3842_v18 = vld [vmem:[%s6155_s7] sm:$0xff] }
 0x5f2   : > { %v2874_v35 = vadd.f32 %v2873_v14, %v5268_v28 }
 0x5f3   : > { %v5599_v41 = vld.sshfl [vmem:[#allocation1] sm:$0xff pattern:$0x73625140]  ;;  %2986 = vmatpush.bf16.msrb.mxu0 %v3846_v34 }
 0x5f4   : > { %2817 = vst [vmem:[#allocation1] ss:$4 sm:$0xff] %v6252_v24  ;;  %v2875_v25 = vadd.f32 %v2874_v35, %v5283_v37 }
 0x5f5   : > { %2818 = vst [vmem:[#allocation1 + $0x1] ss:$4 sm:$0xff] %v6255_v54 }
 0x5f6   : > { %v2876_v24 = vadd.f32 %v2875_v25, %v5297_v29 }
 0x5f8   : > { %v2877_v6 = vadd.f32 %v2876_v24, %v5321_v56  ;;  %v2816_v56 = vld.sshfl [vmem:[#allocation1 + $0x20] sm:$0xff pattern:$0x73625140] }
 0x5fa   : > { %v2878_v54 = vadd.f32 %v2877_v6, %v5352_v4 }
 0x5fc   : > { %v2879_v15 = vadd.f32 %v2878_v54, %v5344_v11 }
 0x5fe   : > { %v2880_v9 = vadd.f32 %v2879_v15, %v5386_v62 }
 0x600   : > { %v2881_v8 = vadd.f32 %v2880_v9, %v5374_v53 }
 0x602   : > { %v2882_v44 = vadd.f32 %v2881_v8, %v5415_v50 }
 0x604   : > { %v2883_v14 = vadd.f32 %v2882_v44, %v5404_v0 }
 0x606   : > { %v2884_v31 = vadd.f32 %v2883_v14, %v5452_v12  ;;  %v3844_v12 = vld [vmem:[%s6155_s7 + $0x10] sm:$0xff]  ;;  %v4589_v14 = vmov 256.0  }
 0x607   : > { %4541 = vrcp.f32 %v4589_v14 }
 0x608   : > { %v2885_v62 = vadd.f32 %v2884_v31, %v5441_v63  ;;  %v3845_v63 = vld [vmem:[%s6155_s7 + $0x18] sm:$0xff] }
 0x609   : > { %2987 = vmatpush.bf16.msrb.mxu0 %v3845_v63 }
 0x60a   : > { %v2886_v53 = vadd.f32 %v2885_v62, %v5484_v10 }
 0x60c   : > { %v2887_v10 = vadd.f32 %v2886_v53, %v5474_v48  ;;  %v3843_v48 = vld [vmem:[%s6155_s7 + $0x8] sm:$0xff] }
 0x60d   : > { %2988 = vmatpush.bf16.msrb.mxu0 %v3844_v12  ;;  %v4542_v62 = vpop.eup %4541 }
 0x60e   : > { %v2888_v4 = vadd.f32 %v2887_v10, %v5516_v55  ;;  %vm2911_vm1 = vweird.f32 %v4542_v62 }
 0x610   : > { %v2889_v6 = vadd.f32 %v2888_v4, %v5505_v27 }
 0x611   : > { %2989 = vmatpush.bf16.msrb.mxu0 %v3843_v48 }
 0x612   : > { %v2890_v55 = vadd.f32 %v2889_v6, %v5551_v17 }
 0x614   : > { %v2891_v15 = vadd.f32 %v2890_v55, %v5542_v20 }
 0x615   : > { %2990 = vmatpush.bf16.msrb.mxu0 %v3842_v18 }
 0x616   : > { %v2892_v8 = vadd.f32 %v2891_v15, %v5587_v32 }
 0x618   : > { %v2893_v44 = vadd.f32 %v2892_v8, %v5573_v38 }
 0x61a   : > { %v2894_v31 = vadd.f32 %v2893_v44, %v5599_v41 }
 0x61c   : > { %v2895_v38 = vadd.f32 %v2894_v31, %v2816_v56  ;;  %v4539_v31 = vld [vmem:[%s6156_s8] ss:$0 sm:$0xff] }
 0x651   : > { %v2432_v28 = vpop.f32.mrf.mxu3 }
 0x652   : > { %v5630_v11 = vadd.f32 %v5146_v13, %v2432_v28 }
 0x654   : > { %v2564_v37 = vrot.slane %v5630_v11, 2  ;;  %v2565_v50 = vrot.slane %v5630_v11, 4  ;;  %v2566_v0 = vrot.slane %v5630_v11, 6  ;;  %2819 = vst [vmem:[#allocation1 + $0x2] ss:$4 sm:$0xff] %v5630_v11 }
 0x656   : > { %2820 = vst [vmem:[#allocation1 + $0x3] ss:$4 sm:$0xff] %v2564_v37 }
 0x657   : > { %2821 = vst [vmem:[#allocation1 + $0x20] ss:$4 sm:$0xff] %v2565_v50 }
 0x658   : > { %2822 = vst [vmem:[#allocation1 + $0x21] ss:$4 sm:$0xff] %v2566_v0 }
 0x659   : > { %v2434_v29 = vpop.f32.mrf.mxu3 }
 0x65a   : > { %v5652_v35 = vadd.f32 %v5146_v13, %v2434_v29 }
 0x65c   : > { %v2567_v25 = vrot.slane %v5652_v35, 2  ;;  %v2568_v30 = vrot.slane %v5652_v35, 6  ;;  %2823 = vst [vmem:[#allocation1 + $0x22] ss:$4 sm:$0xff] %v5652_v35 }
 0x65d   : > { %v2825_v54 = vld.sshfl [vmem:[#allocation1] sm:$0xff pattern:$0x73625140] }
 0x65e   : > { %2824 = vst [vmem:[#allocation1 + $0x23] ss:$4 sm:$0xff] %v2567_v25  ;;  %v2896_v53 = vadd.f32 %v2895_v38, %v2825_v54  ;;  %v2998_v54 = vld [vmem:[%s6157_s9] sm:$0xf] }
 0x65f   : > { %2827 = vst [vmem:[#allocation1] ss:$4 sm:$0xff] %v2568_v30 }
 0x661   : > { %v2437_v36 = vpop.f32.mrf.mxu3 }
 0x662   : > { %v5670_v24 = vadd.f32 %v5146_v13, %v2437_v36 }
 0x664   : > { %v2569_v27 = vrot.slane %v5670_v24, 2  ;;  %v2570_v9 = vrot.slane %v5670_v24, 4  ;;  %v2571_v60 = vrot.slane %v5670_v24, 6  ;;  %2828 = vst [vmem:[#allocation1 + $0x1] ss:$4 sm:$0xff] %v5670_v24 }
 0x665   : > { %v2826_v17 = vld.sshfl [vmem:[#allocation1 + $0x20] sm:$0xff pattern:$0x73625140] }
 0x666   : > { %2829 = vst [vmem:[#allocation1 + $0x2] ss:$4 sm:$0xff] %v2569_v27  ;;  %v2897_v10 = vadd.f32 %v2896_v53, %v2826_v17  ;;  %v3009_v17 = vsel %vm3007_vm2, %v2998_v54, 0 }
 0x667   : > { %2830 = vst [vmem:[#allocation1 + $0x3] ss:$4 sm:$0xff] %v2570_v9  ;;  %3018 = vmatpush.bf16.msrb.mxu1 %v3009_v17 }
 0x668   : > { %2831 = vst [vmem:[#allocation1 + $0x20] ss:$4 sm:$0xff] %v2571_v60 }
 0x669   : > { %v2439_v20 = vpop.f32.mrf.mxu3 }
 0x66a   : > { %v5686_v34 = vadd.f32 %v5146_v13, %v2439_v20  ;;  %v2907_v13 = vmul.f32 256.0, %v4542_v62 }
 0x66c   : > { %v2572_v32 = vrot.slane %v5686_v34, 2  ;;  %v2573_v28 = vrot.slane %v5686_v34, 4  ;;  %2832 = vst [vmem:[#allocation1 + $0x21] ss:$4 sm:$0xff] %v5686_v34  ;;  %v2908_v29 = vsub.f32 1.0, %v2907_v13 }
 0x66e   : > { %2833 = vst [vmem:[#allocation1 + $0x22] ss:$4 sm:$0xff] %v2572_v32  ;;  %v2835_v63 = vld.sshfl [vmem:[#allocation1] sm:$0xff pattern:$0x73625140]  ;;  %v2909_v6 = vmul.f32 %v4542_v62, %v2908_v29 }
 0x66f   : > { %2834 = vst [vmem:[#allocation1 + $0x23] ss:$4 sm:$0xff] %v2573_v28  ;;  %v2898_v12 = vadd.f32 %v2897_v10, %v2835_v63  ;;  %v4540_v10 = vld [vmem:[%s6158_s10] ss:$0 sm:$0xff] }
 0x670   : > { %v2910_v36 = vadd.f32 %v4542_v62, %v2909_v6 }
 0x672   : > { %v2912_v20 = vsel %vm2911_vm1, %v4542_v62, %v2910_v36 }
 0x676   : > { %v2836_v41 = vld.sshfl [vmem:[#allocation1 + $0x20] sm:$0xff pattern:$0x73625140] }
 0x677   : > { %v2899_v4 = vadd.f32 %v2898_v12, %v2836_v41 }
 0x679   : > { %v2900_v48 = vrot.slane %v2899_v4, 4 }
 0x67b   : > { %v2901_v55 = vadd.f32 %v2900_v48, %v2899_v4 }
 0x67d   : > { %v2902_v18 = vrot.slane %v2901_v55, 2 }
 0x67f   : > { %v2903_v15 = vadd.f32 %v2902_v18, %v2901_v55 }
 0x681   : > { %v2904_v8 = vrot.slane %v2903_v15, 1 }
 0x683   : > { %v2905_v44 = vadd.f32 %v2904_v8, %v2903_v15 }
 0x685   : > { %v2913_v14 = vmul.f32 %v2912_v20, %v2905_v44 }
 0x687   : > { %v2914_v56 = vpack.c.bf16 %v2913_v14, %v2913_v14 }
 0x689   : > { %2991 = vmatmul.bf16.vlgmr.msrb.gmra.mxu0 %v2914_v56 }
 0x706   : > { %v2992_v38 = vpop.f32.mrf.mxu0 }
 0x707   : > { %v2993_v53 = vadd.f32 %v4539_v31, %v2992_v38 }
 0x709   : > { %v2996_v63 = vmax.f32 %v2993_v53, 0.0 }
 0x70b   : > { %v2997_v62 = vpack.c.bf16 %v2996_v63, %v2996_v63 }
 0x70d   : > { %3826 = vmatmul.msk.bf16.vlgmr.msrb.gmra.mxu1 %vm3003_vm3, %v2997_v62 }
 0x70e   : > { %v2994_v13 = vpop.f32.mrf.mxu0 }
 0x70f   : > { %v6264_v13 = vrot.slane %v5150_v57, 2 }
 0x78a   : > { %v3020_v12 = vpop.f32.mrf.mxu1 }
 0x78b   : > { %v3021_v41 = vadd.f32 %v4540_v10, %v3020_v12  ;;  %v6265_v12 = vrot.slane %v5150_v57, 4 }
 0x78d   : > { %v3827_v29 = vmul.f32 -1.442695, %v3021_v41 }
 0x78f   : > { %4543 = vpow2.f32 %v3827_v29  ;;  %v6266_v29 = vrot.slane %v5150_v57, 6 }
 0x792   : > { %v3022_v4 = vpop.f32.mrf.mxu1 }
 0x795   : > { %v4544_v48 = vpop.eup %4543 }
 0x796   : > { %v3027_v6 = vadd.f32 1.0, %v4544_v48  ;;  %v6267_v48 = vrot.slane %v5163_v43, 2 }
 0x798   : > { %4545 = vrcp.f32 %v3027_v6  ;;  %v3039_v15 = vand.u32 2147483648, %v3027_v6  ;;  %v3037_v20 = vand.u32 2147483647, %v3027_v6  ;;  %vm3033_vm5 = vweird.f32 %v3027_v6 }
 0x79a   : > { %v3040_v14 = vor.u32 1.1754944e-38, %v3039_v15  ;;  %vm3038_vm7 = vcmp.eq.f32.partialorder %v3037_v20, 8.507059e+37 }
 0x79e   : > { %v4546_v55 = vpop.eup %4545 }
 0x79f   : > { %v3029_v18 = vmul.f32 %v4546_v55, %v3027_v6  ;;  %vm3034_vm4 = vweird.f32 %v4546_v55 }
 0x7a0   : > { %vm3035_vm6 = vmor %vm3033_vm5, %vm3034_vm4 }
 0x7a1   : > { %v3030_v36 = vsub.f32 1.0, %v3029_v18 }
 0x7a3   : > { %v3031_v8 = vmul.f32 %v4546_v55, %v3030_v36  ;;  %v6269_v36 = vrot.slane %v5163_v43, 6 }
 0x7a5   : > { %v3032_v44 = vadd.f32 %v4546_v55, %v3031_v8 }
 0x7a7   : > { %v3036_v56 = vsel %vm3035_vm6, %v4546_v55, %v3032_v44  ;;  %v6268_v55 = vrot.slane %v5163_v43, 4  ;;  %v6271_v44 = vrot.slane %v5176_v52, 4 }
 0x7a8   : > { %v3041_v54 = vsel %vm3038_vm7, %v3040_v14, %v3036_v56  ;;  %v6272_v56 = vrot.slane %v5176_v52, 6 }
 0x7a9   : > { %v5705_v17 = vperm.slane %v3041_v54, 0 }
 0x7ab   : > { %v3051_v31 = vmul.f32 %v5705_v17, %v5150_v57  ;;  %v3055_v38 = vmul.f32 %v5705_v17, %v5163_v43  ;;  %v5712_v53 = vrot.slane %v5705_v17, 2  ;;  %v5715_v63 = vrot.slane %v5705_v17, 4 }
 0x7ac   : > { %v5718_v62 = vrot.slane %v5705_v17, 6  ;;  %v6270_v57 = vrot.slane %v5176_v52, 2  ;;  %v6275_v52 = vrot.slane %v5190_v26, 6 }
 0x7ad   : > { %3307 = vst [vmem:[#allocation1] ss:$4 sm:$0xff] %v3051_v31  ;;  %v3052_v10 = vmul.f32 %v5712_v53, %v6264_v13  ;;  %v3053_v41 = vmul.f32 %v5715_v63, %v6265_v12  ;;  %v3056_v6 = vmul.f32 %v5712_v53, %v6267_v48  ;;  %v3057_v18 = vmul.f32 %v5715_v63, %v6268_v55 }
 0x7ae   : > { %3315 = vst [vmem:[#allocation1 + $0x20] ss:$4 sm:$0xff] %v3055_v38  ;;  %v3054_v4 = vmul.f32 %v5718_v62, %v6266_v29  ;;  %v3058_v15 = vmul.f32 %v5718_v62, %v6269_v36  ;;  %v3059_v8 = vmul.f32 %v5705_v17, %v6270_v57  ;;  %v3060_v14 = vmul.f32 %v5712_v53, %v6271_v44 }
 0x7af   : > { %3309 = vst [vmem:[#allocation1 + $0x1] ss:$4 sm:$0xff] %v3052_v10  ;;  %v3061_v43 = vmul.f32 %v5715_v63, %v6272_v56  ;;  %v3062_v54 = vmul.f32 %v5718_v62, %v5190_v26  ;;  %v6273_v38 = vrot.slane %v5190_v26, 2  ;;  %v6274_v10 = vrot.slane %v5190_v26, 4 }
 0x7b0   : > { %3311 = vst [vmem:[#allocation1 + $0x2] ss:$4 sm:$0xff] %v3053_v41  ;;  %v3065_v41 = vmul.f32 %v5715_v63, %v6275_v52  ;;  %v3066_v29 = vmul.f32 %v5718_v62, %v5205_v46  ;;  %v3069_v26 = vmul.f32 %v5715_v63, %v5217_v40  ;;  %v6278_v36 = vrot.slane %v5217_v40, 2 }
 0x7b1   : > { %3313 = vst [vmem:[#allocation1 + $0x3] ss:$4 sm:$0xff] %v3054_v4  ;;  %v3063_v13 = vmul.f32 %v5705_v17, %v6273_v38  ;;  %v3064_v12 = vmul.f32 %v5712_v53, %v6274_v10  ;;  %v6276_v4 = vrot.slane %v5205_v46, 4  ;;  %v6279_v57 = vrot.slane %v5217_v40, 4 }
 0x7b2   : > { %3317 = vst [vmem:[#allocation1 + $0x21] ss:$4 sm:$0xff] %v3056_v6  ;;  %v6277_v6 = vrot.slane %v5205_v46, 6  ;;  %v6280_v46 = vrot.slane %v5217_v40, 6  ;;  %v6281_v56 = vrot.slane %v5232_v47, 2  ;;  %v3076_v40 = vmul.f32 %v5712_v53, %v5244_v58 }
 0x7b3   : > { %3319 = vst [vmem:[#allocation1 + $0x22] ss:$4 sm:$0xff] %v3057_v18  ;;  %v3067_v48 = vmul.f32 %v5705_v17, %v6276_v4 }
 0x7b4   : > { %3321 = vst [vmem:[#allocation1 + $0x23] ss:$4 sm:$0xff] %v3058_v15  ;;  %v3068_v55 = vmul.f32 %v5712_v53, %v6277_v6  ;;  %v3070_v15 = vmul.f32 %v5718_v62, %v6278_v36 }
 0x7b8   : > { %v3322_v20 = vld.sshfl [vmem:[#allocation1] sm:$0xff pattern:$0x73625140] }
 0x7b9   : > { %3506 = vxpose.xlu2.b32.start [1/16] %v3322_v20, 128  ;;  %3324 = vst [vmem:[#allocation1] ss:$4 sm:$0xff] %v3059_v8  ;;  %v3071_v8 = vmul.f32 %v5705_v17, %v6279_v57  ;;  %v3072_v20 = vmul.f32 %v5712_v53, %v6280_v46  ;;  %v6289_v57 = vrot.slane %v5271_v59, 4 }
 0x7ba   : > { %3325 = vst [vmem:[#allocation1 + $0x1] ss:$4 sm:$0xff] %v3060_v14  ;;  %v3073_v14 = vmul.f32 %v5715_v63, %v5232_v47 }
 0x7bb   : > { %v3323_v31 = vld.sshfl [vmem:[#allocation1 + $0x20] sm:$0xff pattern:$0x73625140]  ;;  %3326 = vst [vmem:[#allocation1 + $0x2] ss:$4 sm:$0xff] %v3061_v43  ;;  %v3074_v43 = vmul.f32 %v5718_v62, %v6281_v56 }
 0x7bc   : > { %3327 = vst [vmem:[#allocation1 + $0x3] ss:$4 sm:$0xff] %v3062_v54  ;;  %v6282_v54 = vrot.slane %v5232_v47, 6  ;;  %v6285_v47 = vrot.slane %v5244_v58, 6 }
 0x7bd   : > { %3328 = vst [vmem:[#allocation1 + $0x20] ss:$4 sm:$0xff] %v3063_v13  ;;  %v6283_v13 = vrot.slane %v5244_v58, 2 }
 0x7be   : > { %3329 = vst [vmem:[#allocation1 + $0x21] ss:$4 sm:$0xff] %v3064_v12  ;;  %v6284_v12 = vrot.slane %v5244_v58, 4  ;;  %v3083_v58 = vmul.f32 %v5705_v17, %v5271_v59 }
 0x7bf   : > { %3330 = vst [vmem:[#allocation1 + $0x22] ss:$4 sm:$0xff] %v3065_v41  ;;  %v3077_v10 = vmul.f32 %v5715_v63, %v6283_v13  ;;  %v3079_v41 = vmul.f32 %v5705_v17, %v6285_v47  ;;  %v6295_v13 = vrot.slane %v5305_v19, 4 }
 0x7c0   : > { %3331 = vst [vmem:[#allocation1 + $0x23] ss:$4 sm:$0xff] %v3066_v29  ;;  %v3078_v52 = vmul.f32 %v5718_v62, %v6284_v12  ;;  %v3080_v29 = vmul.f32 %v5712_v53, %v5259_v3 }
 0x7c1   : > { %3507 = vxpose.xlu2.b32.cont [2/16] %v3323_v31, 128  ;;  %v3075_v31 = vmul.f32 %v5705_v17, %v6282_v54 }
 0x7c3   : > { %v3332_v18 = vld.sshfl [vmem:[#allocation1] sm:$0xff pattern:$0x73625140] }
 0x7c4   : > { %3334 = vst [vmem:[#allocation1] ss:$4 sm:$0xff] %v3067_v48  ;;  %v6286_v48 = vrot.slane %v5259_v3, 2 }
 0x7c5   : > { %3335 = vst [vmem:[#allocation1 + $0x1] ss:$4 sm:$0xff] %v3068_v55  ;;  %v6287_v55 = vrot.slane %v5259_v3, 4  ;;  %v6290_v3 = vrot.slane %v5271_v59, 6 }
 0x7c6   : > { %3336 = vst [vmem:[#allocation1 + $0x2] ss:$4 sm:$0xff] %v3069_v26  ;;  %v3081_v6 = vmul.f32 %v5715_v63, %v6286_v48  ;;  %v6288_v26 = vrot.slane %v5271_v59, 2  ;;  %v6293_v59 = vrot.slane %v5286_v45, 6 }
 0x7c7   : > { %3337 = vst [vmem:[#allocation1 + $0x3] ss:$4 sm:$0xff] %v3070_v15  ;;  %v3333_v44 = vld.sshfl [vmem:[#allocation1 + $0x20] sm:$0xff pattern:$0x73625140]  ;;  %v3086_v46 = vmul.f32 %v5718_v62, %v6290_v3 }
 0x7c8   : > { %3338 = vst [vmem:[#allocation1 + $0x20] ss:$4 sm:$0xff] %v3071_v8  ;;  %v3084_v36 = vmul.f32 %v5712_v53, %v6288_v26  ;;  %v3085_v8 = vmul.f32 %v5715_v63, %v6289_v57 }
 0x7c9   : > { %3508 = vxpose.xlu2.b32.cont [3/16] %v3332_v18, 128  ;;  %3339 = vst [vmem:[#allocation1 + $0x21] ss:$4 sm:$0xff] %v3072_v20  ;;  %v3082_v18 = vmul.f32 %v5718_v62, %v6287_v55  ;;  %v3087_v20 = vmul.f32 %v5705_v17, %v5286_v45 }
 0x7ca   : > { %3340 = vst [vmem:[#allocation1 + $0x22] ss:$4 sm:$0xff] %v3073_v14 }
 0x7cb   : > { %3341 = vst [vmem:[#allocation1 + $0x23] ss:$4 sm:$0xff] %v3074_v43  ;;  %v6292_v43 = vrot.slane %v5286_v45, 4 }
 0x7cd   : > { %v3089_v54 = vmul.f32 %v5715_v63, %v6292_v43  ;;  %v6305_v43 = vrot.slane %v5339_v61, 2 }
 0x7ce   : > { %v3342_v38 = vld.sshfl [vmem:[#allocation1] sm:$0xff pattern:$0x73625140] }
 0x7cf   : > { %3344 = vst [vmem:[#allocation1] ss:$4 sm:$0xff] %v3075_v31  ;;  %v3090_v31 = vmul.f32 %v5718_v62, %v6293_v59  ;;  %v6306_v59 = vrot.slane %v5339_v61, 6 }
 0x7d0   : > { %3345 = vst [vmem:[#allocation1 + $0x1] ss:$4 sm:$0xff] %v3076_v40  ;;  %v6294_v40 = vrot.slane %v5305_v19, 2 }
 0x7d1   : > { %3509 = vxpose.xlu2.b32.cont [4/16] %v3333_v44, 128  ;;  %3346 = vst [vmem:[#allocation1 + $0x2] ss:$4 sm:$0xff] %v3077_v10  ;;  %v6291_v44 = vrot.slane %v5286_v45, 2  ;;  %v3092_v10 = vmul.f32 %v5712_v53, %v6295_v13  ;;  %v3094_v45 = vmul.f32 %v5718_v62, %v5293_v21 }
 0x7d2   : > { %3347 = vst [vmem:[#allocation1 + $0x3] ss:$4 sm:$0xff] %v3078_v52  ;;  %v3343_v4 = vld.sshfl [vmem:[#allocation1 + $0x20] sm:$0xff pattern:$0x73625140]  ;;  %v6296_v52 = vrot.slane %v5305_v19, 6 }
 0x7d3   : > { %3348 = vst [vmem:[#allocation1 + $0x20] ss:$4 sm:$0xff] %v3079_v41  ;;  %v3088_v14 = vmul.f32 %v5712_v53, %v6291_v44  ;;  %v6297_v41 = vrot.slane %v5293_v21, 2  ;;  %v6299_v19 = vrot.slane %v5293_v21, 6 }
 0x7d4   : > { %3349 = vst [vmem:[#allocation1 + $0x21] ss:$4 sm:$0xff] %v3080_v29  ;;  %v3093_v47 = vmul.f32 %v5715_v63, %v6296_v52 }
 0x7d5   : > { %3350 = vst [vmem:[#allocation1 + $0x22] ss:$4 sm:$0xff] %v3081_v6  ;;  %v3095_v29 = vmul.f32 %v5705_v17, %v6297_v41  ;;  %v3097_v55 = vmul.f32 %v5715_v63, %v6299_v19  ;;  %v6310_v41 = vrot.slane %v5371_v51, 2  ;;  %v6312_v19 = vrot.slane %v5407_v5, 2 }
 0x7d6   : > { %3351 = vst [vmem:[#allocation1 + $0x23] ss:$4 sm:$0xff] %v3082_v18  ;;  %v3098_v18 = vmul.f32 %v5718_v62, %v5319_v23 }
 0x7d9   : > { %3510 = vxpose.xlu2.b32.cont [5/16] %v3342_v38, 128  ;;  %v3352_v15 = vld.sshfl [vmem:[#allocation1] sm:$0xff pattern:$0x73625140]  ;;  %v3091_v38 = vmul.f32 %v5705_v17, %v6294_v40 }
 0x7da   : > { %3354 = vst [vmem:[#allocation1] ss:$4 sm:$0xff] %v3083_v58  ;;  %v6300_v58 = vrot.slane %v5319_v23, 4 }
 0x7db   : > { %3355 = vst [vmem:[#allocation1 + $0x1] ss:$4 sm:$0xff] %v3084_v36  ;;  %v6301_v36 = vrot.slane %v5319_v23, 6  ;;  %v6304_v23 = vrot.slane %v5331_v49, 6 }
 0x7dc   : > { %3356 = vst [vmem:[#allocation1 + $0x2] ss:$4 sm:$0xff] %v3085_v8  ;;  %v3099_v26 = vmul.f32 %v5705_v17, %v6300_v58  ;;  %v6302_v8 = vrot.slane %v5331_v49, 2  ;;  %v6313_v58 = vrot.slane %v5407_v5, 4 }
 0x7dd   : > { %3357 = vst [vmem:[#allocation1 + $0x3] ss:$4 sm:$0xff] %v3086_v46  ;;  %v3353_v56 = vld.sshfl [vmem:[#allocation1 + $0x20] sm:$0xff pattern:$0x73625140]  ;;  %v6303_v46 = vrot.slane %v5331_v49, 4  ;;  %v3104_v44 = vmul.f32 %v5712_v53, %v6304_v23 }
 0x7de   : > { %3358 = vst [vmem:[#allocation1 + $0x20] ss:$4 sm:$0xff] %v3087_v20  ;;  %v3102_v3 = vmul.f32 %v5718_v62, %v6302_v8 }
 0x7df   : > { %3359 = vst [vmem:[#allocation1 + $0x21] ss:$4 sm:$0xff] %v3088_v14  ;;  %v3103_v20 = vmul.f32 %v5705_v17, %v6303_v46 }
 0x7e0   : > { %3360 = vst [vmem:[#allocation1 + $0x22] ss:$4 sm:$0xff] %v3089_v54  ;;  %v3106_v54 = vmul.f32 %v5718_v62, %v6305_v43 }
 0x7e1   : > { %3511 = vxpose.xlu2.b32.cont [6/16] %v3343_v4, 128  ;;  %3361 = vst [vmem:[#allocation1 + $0x23] ss:$4 sm:$0xff] %v3090_v31  ;;  %v6298_v4 = vrot.slane %v5293_v21, 4  ;;  %v3101_v21 = vmul.f32 %v5715_v63, %v5331_v49  ;;  %v3107_v31 = vmul.f32 %v5705_v17, %v6306_v59  ;;  %v3108_v49 = vmul.f32 %v5712_v53, %v5363_v7 }
 0x7e3   : > { %v3096_v48 = vmul.f32 %v5712_v53, %v6298_v4  ;;  %v6311_v4 = vrot.slane %v5371_v51, 4 }
 0x7e4   : > { %v3362_v12 = vld.sshfl [vmem:[#allocation1] sm:$0xff pattern:$0x73625140] }
 0x7e5   : > { %3364 = vst [vmem:[#allocation1] ss:$4 sm:$0xff] %v3091_v38  ;;  %v6307_v38 = vrot.slane %v5363_v7, 2 }
 0x7e6   : > { %3365 = vst [vmem:[#allocation1 + $0x1] ss:$4 sm:$0xff] %v3092_v10  ;;  %v6308_v10 = vrot.slane %v5363_v7, 4 }
 0x7e7   : > { %3366 = vst [vmem:[#allocation1 + $0x2] ss:$4 sm:$0xff] %v3093_v47  ;;  %v3109_v13 = vmul.f32 %v5715_v63, %v6307_v38  ;;  %v3112_v47 = vmul.f32 %v5712_v53, %v5371_v51  ;;  %v6314_v51 = vrot.slane %v5407_v5, 6  ;;  %v6322_v38 = vrot.slane %v5423_v22, 4 }
 0x7e8   : > { %3367 = vst [vmem:[#allocation1 + $0x3] ss:$4 sm:$0xff] %v3094_v45  ;;  %v3363_v6 = vld.sshfl [vmem:[#allocation1 + $0x20] sm:$0xff pattern:$0x73625140]  ;;  %v3110_v52 = vmul.f32 %v5718_v62, %v6308_v10 }
 0x7e9   : > { %3512 = vxpose.xlu2.b32.cont [7/16] %v3352_v15, 128  ;;  %3368 = vst [vmem:[#allocation1 + $0x20] ss:$4 sm:$0xff] %v3095_v29  ;;  %v3100_v15 = vmul.f32 %v5712_v53, %v6301_v36  ;;  %v3113_v29 = vmul.f32 %v5715_v63, %v6310_v41  ;;  %v3119_v36 = vmul.f32 %v5705_v17, %v5394_v33 }
 0x7ea   : > { %3369 = vst [vmem:[#allocation1 + $0x21] ss:$4 sm:$0xff] %v3096_v48  ;;  %v3114_v48 = vmul.f32 %v5718_v62, %v6311_v4  ;;  %v6326_v4 = vrot.slane %v5460_v16, 2 }
 0x7eb   : > { %3370 = vst [vmem:[#allocation1 + $0x22] ss:$4 sm:$0xff] %v3097_v55  ;;  %v3116_v55 = vmul.f32 %v5712_v53, %v6312_v19 }
 0x7ec   : > { %3371 = vst [vmem:[#allocation1 + $0x23] ss:$4 sm:$0xff] %v3098_v18 }
 0x7ef   : > { %v3372_v57 = vld.sshfl [vmem:[#allocation1] sm:$0xff pattern:$0x73625140] }
 0x7f0   : > { %3374 = vst [vmem:[#allocation1] ss:$4 sm:$0xff] %v3099_v26  ;;  %v3118_v26 = vmul.f32 %v5718_v62, %v6314_v51 }
 0x7f1   : > { %3513 = vxpose.xlu2.b32.cont [8/16] %v3353_v56, 128  ;;  %3375 = vst [vmem:[#allocation1 + $0x1] ss:$4 sm:$0xff] %v3100_v15  ;;  %v3105_v56 = vmul.f32 %v5715_v63, %v5339_v61  ;;  %v6315_v15 = vrot.slane %v5394_v33, 2 }
 0x7f2   : > { %3376 = vst [vmem:[#allocation1 + $0x2] ss:$4 sm:$0xff] %v3101_v21 }
 0x7f3   : > { %3377 = vst [vmem:[#allocation1 + $0x3] ss:$4 sm:$0xff] %v3102_v3  ;;  %v3373_v14 = vld.sshfl [vmem:[#allocation1 + $0x20] sm:$0xff pattern:$0x73625140]  ;;  %v3120_v21 = vmul.f32 %v5712_v53, %v6315_v15  ;;  %v6316_v3 = vrot.slane %v5394_v33, 4 }
 0x7f4   : > { %3378 = vst [vmem:[#allocation1 + $0x20] ss:$4 sm:$0xff] %v3103_v20 }
 0x7f5   : > { %3379 = vst [vmem:[#allocation1 + $0x21] ss:$4 sm:$0xff] %v3104_v44  ;;  %v3121_v46 = vmul.f32 %v5715_v63, %v6316_v3  ;;  %v6319_v44 = vrot.slane %v5437_v1, 4 }
 0x7f6   : > { %3380 = vst [vmem:[#allocation1 + $0x22] ss:$4 sm:$0xff] %v3105_v56 }
 0x7f7   : > { %3381 = vst [vmem:[#allocation1 + $0x23] ss:$4 sm:$0xff] %v3106_v54  ;;  %v3124_v56 = vmul.f32 %v5712_v53, %v6319_v44  ;;  %v6320_v54 = vrot.slane %v5437_v1, 6 }
 0x7f9   : > { %3514 = vxpose.xlu2.b32.cont [9/16] %v3362_v12, 128  ;;  %v6309_v12 = vrot.slane %v5363_v7, 6  ;;  %v3115_v7 = vmul.f32 %v5705_v17, %v5407_v5  ;;  %v6317_v5 = vrot.slane %v5394_v33, 6  ;;  %v3125_v59 = vmul.f32 %v5715_v63, %v6320_v54 }
 0x7fa   : > { %v3382_v40 = vld.sshfl [vmem:[#allocation1] sm:$0xff pattern:$0x73625140]  ;;  %v3126_v33 = vmul.f32 %v5718_v62, %v5423_v22 }
 0x7fb   : > { %3384 = vst [vmem:[#allocation1] ss:$4 sm:$0xff] %v3107_v31  ;;  %v3111_v61 = vmul.f32 %v5705_v17, %v6309_v12  ;;  %v3122_v20 = vmul.f32 %v5718_v62, %v6317_v5  ;;  %v6321_v31 = vrot.slane %v5423_v22, 2  ;;  %v6324_v12 = vrot.slane %v5432_v2, 4 }
 0x7fc   : > { %3385 = vst [vmem:[#allocation1 + $0x1] ss:$4 sm:$0xff] %v3108_v49 }
 0x7fd   : > { %3386 = vst [vmem:[#allocation1 + $0x2] ss:$4 sm:$0xff] %v3109_v13  ;;  %v3127_v49 = vmul.f32 %v5705_v17, %v6321_v31 }
 0x7fe   : > { %3387 = vst [vmem:[#allocation1 + $0x3] ss:$4 sm:$0xff] %v3110_v52  ;;  %v3383_v45 = vld.sshfl [vmem:[#allocation1 + $0x20] sm:$0xff pattern:$0x73625140]  ;;  %v3130_v52 = vmul.f32 %v5718_v62, %v5432_v2 }
 0x7ff   : > { %3388 = vst [vmem:[#allocation1 + $0x20] ss:$4 sm:$0xff] %v3111_v61  ;;  %v3131_v61 = vmul.f32 %v5705_v17, %v6324_v12 }
 0x800   : > { %3389 = vst [vmem:[#allocation1 + $0x21] ss:$4 sm:$0xff] %v3112_v47  ;;  %v6325_v47 = vrot.slane %v5432_v2, 6  ;;  %v6328_v2 = vrot.slane %v5460_v16, 6 }
 0x801   : > { %3515 = vxpose.xlu2.b32.cont [10/16] %v3363_v6, 128  ;;  %3390 = vst [vmem:[#allocation1 + $0x22] ss:$4 sm:$0xff] %v3113_v29  ;;  %v3117_v6 = vmul.f32 %v5715_v63, %v6313_v58  ;;  %v3133_v29 = vmul.f32 %v5715_v63, %v5460_v16  ;;  %v3137_v58 = vmul.f32 %v5715_v63, %v5466_v42 }
 0x802   : > { %3391 = vst [vmem:[#allocation1 + $0x23] ss:$4 sm:$0xff] %v3114_v48  ;;  %v3132_v41 = vmul.f32 %v5712_v53, %v6325_v47  ;;  %v3134_v48 = vmul.f32 %v5718_v62, %v6326_v4  ;;  %v3136_v19 = vmul.f32 %v5712_v53, %v6328_v2 }
 0x805   : > { %v5897_v18 = vld.sshfl [vmem:[#allocation1] sm:$0xff pattern:$0x73625140] }
 0x806   : > { %3394 = vst [vmem:[#allocation1] ss:$4 sm:$0xff] %v3115_v7 }
 0x807   : > { %3395 = vst [vmem:[#allocation1 + $0x1] ss:$4 sm:$0xff] %v3116_v55 }
 0x808   : > { %3396 = vst [vmem:[#allocation1 + $0x2] ss:$4 sm:$0xff] %v3117_v6  ;;  %v6329_v6 = vrot.slane %v5466_v42, 2 }
 0x809   : > { %3516 = vxpose.xlu2.b32.cont [11/16] %v3372_v57, 128  ;;  %3397 = vst [vmem:[#allocation1 + $0x3] ss:$4 sm:$0xff] %v3118_v26  ;;  %v5910_v8 = vld.sshfl [vmem:[#allocation1 + $0x20] sm:$0xff pattern:$0x73625140]  ;;  %v6318_v57 = vrot.slane %v5437_v1, 2 }
 0x80a   : > { %3398 = vst [vmem:[#allocation1 + $0x20] ss:$4 sm:$0xff] %v3119_v36  ;;  %v6323_v1 = vrot.slane %v5423_v22, 6  ;;  %v3138_v51 = vmul.f32 %v5718_v62, %v6329_v6  ;;  %v6330_v26 = vrot.slane %v5466_v42, 6  ;;  %v6331_v36 = vld [vmem:[#allocation4_spill] sm:$0xff] }
 0x80b   : > { %3399 = vst [vmem:[#allocation1 + $0x21] ss:$4 sm:$0xff] %v3120_v21  ;;  %v3123_v23 = vmul.f32 %v5705_v17, %v6318_v57  ;;  %v3140_v15 = vmul.f32 %v5712_v53, %v6331_v36  ;;  %v6332_v21 = vrot.slane %v6331_v36, 2  ;;  %v6334_v42 = vrot.slane %v6331_v36, 6  ;;  %v6335_v57 = vld [vmem:[#allocation3_spill] sm:$0xff] }
 0x80c   : > { %3400 = vst [vmem:[#allocation1 + $0x22] ss:$4 sm:$0xff] %v3121_v46  ;;  %v3129_v10 = vmul.f32 %v5715_v63, %v6323_v1  ;;  %v6333_v46 = vrot.slane %v6331_v36, 4  ;;  %v6337_v54 = vrot.slane %v6335_v57, 4 }
 0x80d   : > { %3401 = vst [vmem:[#allocation1 + $0x23] ss:$4 sm:$0xff] %v3122_v20  ;;  %v3141_v3 = vmul.f32 %v5715_v63, %v6332_v21  ;;  %v3143_v20 = vmul.f32 %v5705_v17, %v6334_v42 }
 0x80e   : > { %v3142_v5 = vmul.f32 %v5718_v62, %v6333_v46 }
 0x810   : > { %v3402_v43 = vld.sshfl [vmem:[#allocation1] sm:$0xff pattern:$0x73625140] }
 0x811   : > { %3517 = vxpose.xlu2.b32.cont [12/16] %v3373_v14, 128  ;;  %3538 = vxpose.xlu1.b32.start [1/16] %v3402_v43, 128  ;;  %3404 = vst [vmem:[#allocation1] ss:$4 sm:$0xff] %v3123_v23  ;;  %v3128_v14 = vmul.f32 %v5712_v53, %v6322_v38  ;;  %v3144_v23 = vmul.f32 %v5712_v53, %v6335_v57  ;;  %v6339_v38 = vrot.slane %v5534_v39, 4 }
 0x812   : > { %3405 = vst [vmem:[#allocation1 + $0x1] ss:$4 sm:$0xff] %v3124_v56  ;;  %v6336_v56 = vrot.slane %v6335_v57, 2 }
 0x813   : > { %3406 = vst [vmem:[#allocation1 + $0x2] ss:$4 sm:$0xff] %v3125_v59  ;;  %v3147_v59 = vmul.f32 %v5705_v17, %v5534_v39 }
 0x814   : > { %3407 = vst [vmem:[#allocation1 + $0x3] ss:$4 sm:$0xff] %v3126_v33  ;;  %v3403_v13 = vld.sshfl [vmem:[#allocation1 + $0x20] sm:$0xff pattern:$0x73625140]  ;;  %v3145_v43 = vmul.f32 %v5715_v63, %v6336_v56  ;;  %v6338_v33 = vrot.slane %v5534_v39, 2  ;;  %v3166_v56 = vmul.f32 %v5718_v62, %v2564_v37  ;;  %v3170_v37 = vmul.f32 %v5718_v62, %v2567_v25 }
 0x815   : > { %3408 = vst [vmem:[#allocation1 + $0x20] ss:$4 sm:$0xff] %v3127_v49  ;;  %v3174_v25 = vmul.f32 %v5718_v62, %v2570_v9  ;;  %v3178_v9 = vmul.f32 %v5718_v62, %v2573_v28 }
 0x816   : > { %3409 = vst [vmem:[#allocation1 + $0x21] ss:$4 sm:$0xff] %v3128_v14  ;;  %v3148_v31 = vmul.f32 %v5712_v53, %v6338_v33  ;;  %v3149_v14 = vmul.f32 %v5715_v63, %v6339_v38  ;;  %v3173_v33 = vmul.f32 %v5715_v63, %v2569_v27  ;;  %v3177_v27 = vmul.f32 %v5715_v63, %v2572_v32 }
 0x817   : > { %3410 = vst [vmem:[#allocation1 + $0x22] ss:$4 sm:$0xff] %v3129_v10  ;;  %v6341_v10 = vld [vmem:[#allocation5_spill] sm:$0xff] }
 0x818   : > { %3411 = vst [vmem:[#allocation1 + $0x23] ss:$4 sm:$0xff] %v3130_v52  ;;  %v6342_v52 = vrot.slane %v6341_v10, 2  ;;  %v6343_v47 = vrot.slane %v6341_v10, 4 }
 0x819   : > { %3518 = vxpose.xlu2.b32.cont [13/16] %v3382_v40, 128  ;;  %3539 = vxpose.xlu1.b32.cont [2/16] %v3403_v13, 128  ;;  %v6327_v40 = vrot.slane %v5460_v16, 4  ;;  %v3139_v16 = vmul.f32 %v5705_v17, %v6330_v26  ;;  %v6340_v13 = vrot.slane %v5534_v39, 6  ;;  %v6344_v39 = vrot.slane %v6341_v10, 6 }
 0x81a   : > { %v3152_v12 = vmul.f32 %v5712_v53, %v6342_v52 }
 0x81b   : > { %v3412_v22 = vld.sshfl [vmem:[#allocation1] sm:$0xff pattern:$0x73625140]  ;;  %v3135_v7 = vmul.f32 %v5705_v17, %v6327_v40  ;;  %v3150_v1 = vmul.f32 %v5718_v62, %v6340_v13 }
 0x81c   : > { %3414 = vst [vmem:[#allocation1] ss:$4 sm:$0xff] %v3131_v61 }
 0x81d   : > { %3415 = vst [vmem:[#allocation1 + $0x1] ss:$4 sm:$0xff] %v3132_v41  ;;  %v3153_v41 = vmul.f32 %v5715_v63, %v6343_v47  ;;  %v4551_v47 = vld [vmem:[%s4666_s22 + $0x40] sm:$0xff] }
 0x81e   : > { %3416 = vst [vmem:[#allocation1 + $0x2] ss:$4 sm:$0xff] %v3133_v29  ;;  %v6345_v29 = vld [vmem:[#allocation7_spill] sm:$0xff] }
 0x81f   : > { %3417 = vst [vmem:[#allocation1 + $0x3] ss:$4 sm:$0xff] %v3134_v48  ;;  %v3413_v55 = vld.sshfl [vmem:[#allocation1 + $0x20] sm:$0xff pattern:$0x73625140]  ;;  %v6346_v4 = vrot.slane %v6345_v29, 2 }
 0x820   : > { %3418 = vst [vmem:[#allocation1 + $0x20] ss:$4 sm:$0xff] %v3135_v7  ;;  %v6347_v40 = vrot.slane %v6345_v29, 4 }
 0x821   : > { %3519 = vxpose.xlu2.b32.cont [14/16] %v3383_v45, 128  ;;  %3540 = vxpose.xlu1.b32.cont [3/16] %v3412_v22, 128  ;;  %3419 = vst [vmem:[#allocation1 + $0x21] ss:$4 sm:$0xff] %v3136_v19  ;;  %v3154_v22 = vmul.f32 %v5718_v62, %v6344_v39  ;;  %v3155_v48 = vmul.f32 %v5705_v17, %v6346_v4  ;;  %v6348_v19 = vrot.slane %v6345_v29, 6  ;;  %v4552_v29 = vld [vmem:[%s4666_s22 + $0x8] sm:$0xff] }
 0x822   : > { %3420 = vst [vmem:[#allocation1 + $0x22] ss:$4 sm:$0xff] %v3137_v58  ;;  %v3156_v7 = vmul.f32 %v5712_v53, %v6347_v40  ;;  %v6349_v58 = vld [vmem:[#allocation6_spill] sm:$0xff] }
 0x823   : > { %3421 = vst [vmem:[#allocation1 + $0x23] ss:$4 sm:$0xff] %v3138_v51  ;;  %v3158_v6 = vmul.f32 %v5718_v62, %v6349_v58  ;;  %v6350_v51 = vrot.slane %v6349_v58, 2 }
 0x825   : > { %v3159_v26 = vmul.f32 %v5705_v17, %v6350_v51 }
 0x826   : > { %v3422_v45 = vld.sshfl [vmem:[#allocation1] sm:$0xff pattern:$0x73625140] }
 0x827   : > { %3424 = vst [vmem:[#allocation1] ss:$4 sm:$0xff] %v3139_v16  ;;  %v6351_v16 = vrot.slane %v6349_v58, 4 }
 0x828   : > { %3425 = vst [vmem:[#allocation1 + $0x1] ss:$4 sm:$0xff] %v3140_v15 }
 0x829   : > { %3520 = vxpose.xlu2.b32.cont [15/16] %v5897_v18, 128  ;;  %3541 = vxpose.xlu1.b32.cont [4/16] %v3413_v55, 128  ;;  %3426 = vst [vmem:[#allocation1 + $0x2] ss:$4 sm:$0xff] %v3141_v3  ;;  %v3146_v18 = vmul.f32 %v5718_v62, %v6337_v54  ;;  %v3157_v55 = vmul.f32 %v5715_v63, %v6348_v19  ;;  %v6353_v3 = vld [vmem:[#allocation8_spill] sm:$0xff] }
 0x82a   : > { %3427 = vst [vmem:[#allocation1 + $0x3] ss:$4 sm:$0xff] %v3142_v5  ;;  %v3423_v44 = vld.sshfl [vmem:[#allocation1 + $0x20] sm:$0xff pattern:$0x73625140]  ;;  %v3160_v36 = vmul.f32 %v5712_v53, %v6351_v16  ;;  %v3162_v46 = vmul.f32 %v5718_v62, %v6353_v3  ;;  %v6354_v5 = vrot.slane %v6353_v3, 4  ;;  %v3168_v54 = vmul.f32 %v5712_v53, %v2566_v0 }
 0x82b   : > { %3428 = vst [vmem:[#allocation1 + $0x20] ss:$4 sm:$0xff] %v3143_v20  ;;  %v6355_v20 = vrot.slane %v6353_v3, 6  ;;  %v4555_v16 = vld [vmem:[%s4666_s22 + $0x60] sm:$0xff] }
 0x82c   : > { %3429 = vst [vmem:[#allocation1 + $0x21] ss:$4 sm:$0xff] %v3144_v23  ;;  %v3163_v42 = vmul.f32 %v5705_v17, %v6354_v5 }
 0x82d   : > { %3430 = vst [vmem:[#allocation1 + $0x22] ss:$4 sm:$0xff] %v3145_v43  ;;  %v3164_v57 = vmul.f32 %v5712_v53, %v6355_v20  ;;  %v3167_v43 = vmul.f32 %v5705_v17, %v2565_v50  ;;  %v3171_v50 = vmul.f32 %v5705_v17, %v2568_v30  ;;  %v3176_v30 = vmul.f32 %v5712_v53, %v5686_v34 }
 0x82e   : > { %3431 = vst [vmem:[#allocation1 + $0x23] ss:$4 sm:$0xff] %v3146_v18 }
 0x831   : > { %3521 = vxpose.xlu2.b32.end [16/16] %v5910_v8, 128  ;;  %3542 = vxpose.xlu1.b32.cont [5/16] %v3422_v45, 128  ;;  %v3432_v49 = vld.sshfl [vmem:[#allocation1] sm:$0xff pattern:$0x73625140]  ;;  %v3151_v8 = vmul.f32 %v5705_v17, %v6341_v10  ;;  %v6352_v45 = vrot.slane %v6349_v58, 6  ;;  %v4554_v58 = vld [vmem:[%s4666_s22 + $0x18] sm:$0xff] }
 0x832   : > { %3434 = vst [vmem:[#allocation1] ss:$4 sm:$0xff] %v3147_v59  ;;  %v3169_v59 = vmul.f32 %v5715_v63, %v5652_v35  ;;  %v3175_v35 = vmul.f32 %v5705_v17, %v2571_v60  ;;  %v4547_v60 = vld [vmem:[%s4666_s22] sm:$0xff] }
 0x833   : > { %3435 = vst [vmem:[#allocation1 + $0x1] ss:$4 sm:$0xff] %v3148_v31  ;;  %v3161_v21 = vmul.f32 %v5715_v63, %v6352_v45 }
 0x834   : > { %3436 = vst [vmem:[#allocation1 + $0x2] ss:$4 sm:$0xff] %v3149_v14  ;;  %v4549_v14 = vld [vmem:[%s4666_s22 + $0x20] sm:$0xff] }
 0x835   : > { %3437 = vst [vmem:[#allocation1 + $0x3] ss:$4 sm:$0xff] %v3150_v1  ;;  %v3433_v61 = vld.sshfl [vmem:[#allocation1 + $0x20] sm:$0xff pattern:$0x73625140] }
 0x836   : > { %3438 = vst [vmem:[#allocation1 + $0x20] ss:$4 sm:$0xff] %v3151_v8  ;;  %v4550_v8 = vld [vmem:[%s4666_s22 + $0x30] sm:$0xff] }
 0x837   : > { %3439 = vst [vmem:[#allocation1 + $0x21] ss:$4 sm:$0xff] %v3152_v12 }
 0x838   : > { %3440 = vst [vmem:[#allocation1 + $0x22] ss:$4 sm:$0xff] %v3153_v41 }
 0x839   : > { %3543 = vxpose.xlu1.b32.cont [6/16] %v3423_v44, 128  ;;  %3441 = vst [vmem:[#allocation1 + $0x23] ss:$4 sm:$0xff] %v3154_v22  ;;  %v3165_v44 = vmul.f32 %v5715_v63, %v5630_v11  ;;  %v3172_v11 = vmul.f32 %v5712_v53, %v5670_v24  ;;  %v4548_v63 = vld [vmem:[%s4666_s22 + $0x10] sm:$0xff] }
 0x83c   : > { %v3442_v2 = vld.sshfl [vmem:[#allocation1] sm:$0xff pattern:$0x73625140] }
 0x83d   : > { %3444 = vst [vmem:[#allocation1] ss:$4 sm:$0xff] %v3155_v48 }
 0x83e   : > { %3445 = vst [vmem:[#allocation1 + $0x1] ss:$4 sm:$0xff] %v3156_v7  ;;  %v4553_v7 = vld [vmem:[%s4666_s22 + $0x50] sm:$0xff] }
 0x83f   : > { %3446 = vst [vmem:[#allocation1 + $0x2] ss:$4 sm:$0xff] %v3157_v55 }
 0x840   : > { %3447 = vst [vmem:[#allocation1 + $0x3] ss:$4 sm:$0xff] %v3158_v6  ;;  %v3443_v15 = vld.sshfl [vmem:[#allocation1 + $0x20] sm:$0xff pattern:$0x73625140] }
 0x841   : > { %3544 = vxpose.xlu1.b32.cont [7/16] %v3432_v49, 128  ;;  %3448 = vst [vmem:[#allocation1 + $0x20] ss:$4 sm:$0xff] %v3159_v26 }
 0x842   : > { %3449 = vst [vmem:[#allocation1 + $0x21] ss:$4 sm:$0xff] %v3160_v36 }
 0x843   : > { %3450 = vst [vmem:[#allocation1 + $0x22] ss:$4 sm:$0xff] %v3161_v21  ;;  %v4556_v21 = vld [vmem:[%s4666_s22 + $0x28] sm:$0xff] }
 0x844   : > { %3451 = vst [vmem:[#allocation1 + $0x23] ss:$4 sm:$0xff] %v3162_v46 }
 0x847   : > { %v3452_v23 = vld.sshfl [vmem:[#allocation1] sm:$0xff pattern:$0x73625140] }
 0x848   : > { %3454 = vst [vmem:[#allocation1] ss:$4 sm:$0xff] %v3163_v42  ;;  %v4557_v42 = vld [vmem:[%s4666_s22 + $0x70] sm:$0xff] }
 0x849   : > { %3545 = vxpose.xlu1.b32.cont [8/16] %v3433_v61, 128  ;;  %3455 = vst [vmem:[#allocation1 + $0x1] ss:$4 sm:$0xff] %v3164_v57 }
 0x84a   : > { %3456 = vst [vmem:[#allocation1 + $0x2] ss:$4 sm:$0xff] %v3165_v44  ;;  %v4558_v44 = vld [vmem:[%s4666_s22 + $0x38] sm:$0xff] }
 0x84b   : > { %3457 = vst [vmem:[#allocation1 + $0x3] ss:$4 sm:$0xff] %v3166_v56  ;;  %v3453_v18 = vld.sshfl [vmem:[#allocation1 + $0x20] sm:$0xff pattern:$0x73625140] }
 0x84c   : > { %3458 = vst [vmem:[#allocation1 + $0x20] ss:$4 sm:$0xff] %v3167_v43 }
 0x84d   : > { %3459 = vst [vmem:[#allocation1 + $0x21] ss:$4 sm:$0xff] %v3168_v54 }
 0x84e   : > { %3460 = vst [vmem:[#allocation1 + $0x22] ss:$4 sm:$0xff] %v3169_v59 }
 0x84f   : > { %3461 = vst [vmem:[#allocation1 + $0x23] ss:$4 sm:$0xff] %v3170_v37 }
 0x851   : > { %3546 = vxpose.xlu1.b32.cont [9/16] %v3442_v2, 128 }
 0x852   : > { %v3462_v0 = vld.sshfl [vmem:[#allocation1] sm:$0xff pattern:$0x73625140]  ;;  %v3522_v24 = vpop.trf.xlu2 }
 0x853   : > { %3464 = vst [vmem:[#allocation1] ss:$4 sm:$0xff] %v3171_v50  ;;  %v3570_v17 = vadd.f32 %v4547_v60, %v3522_v24 }
 0x854   : > { %3465 = vst [vmem:[#allocation1 + $0x1] ss:$4 sm:$0xff] %v3172_v11  ;;  %v4560_v11 = vld [vmem:[%s4666_s22 + $0x48] sm:$0xff] }
 0x855   : > { %3466 = vst [vmem:[#allocation1 + $0x2] ss:$4 sm:$0xff] %v3173_v33  ;;  %v3602_v34 = vmax.f32 %v3570_v17, 0.0 }
 0x856   : > { %3467 = vst [vmem:[#allocation1 + $0x3] ss:$4 sm:$0xff] %v3174_v25  ;;  %v3463_v31 = vld.sshfl [vmem:[#allocation1 + $0x20] sm:$0xff pattern:$0x73625140] }
 0x857   : > { %3468 = vst [vmem:[#allocation1 + $0x20] ss:$4 sm:$0xff] %v3175_v35  ;;  %v4561_v35 = vld [vmem:[%s4666_s22 + $0x90] sm:$0xff] }
 0x858   : > { %3469 = vst [vmem:[#allocation1 + $0x21] ss:$4 sm:$0xff] %v3176_v30 }
 0x859   : > { %3547 = vxpose.xlu1.b32.cont [10/16] %v3443_v15, 128  ;;  %3470 = vst [vmem:[#allocation1 + $0x22] ss:$4 sm:$0xff] %v3177_v27 }
 0x85a   : > { %3471 = vst [vmem:[#allocation1 + $0x23] ss:$4 sm:$0xff] %v3178_v9  ;;  %v3523_v53 = vpop.trf.xlu2  ;;  %v4562_v9 = vld [vmem:[%s4666_s22 + $0x58] sm:$0xff] }
 0x85b   : > { %3634 = vst [vmem:[%s6080_s21] sm:$0xff] %v3602_v34  ;;  %v3572_v62 = vadd.f32 %v4548_v63, %v3523_v53  ;;  %v4563_v34 = vld [vmem:[%s4666_s22 + $0xa0] sm:$0xff]  ;;  %v4564_v63 = vld [vmem:[%s4666_s22 + $0x68] sm:$0xff] }
 0x85d   : > { %v3472_v32 = vld.sshfl [vmem:[#allocation1] sm:$0xff pattern:$0x73625140]  ;;  %v3604_v49 = vmax.f32 %v3572_v62, 0.0 }
 0x85f   : > { %3636 = vst [vmem:[%s6080_s21 + $0x10] sm:$0xff] %v3604_v49 }
 0x861   : > { %3548 = vxpose.xlu1.b32.cont [11/16] %v3452_v23, 128  ;;  %v3473_v28 = vld.sshfl [vmem:[#allocation1 + $0x20] sm:$0xff pattern:$0x73625140] }
 0x862   : > { %v3524_v38 = vpop.trf.xlu2 }
 0x863   : > { %v3574_v13 = vadd.f32 %v4549_v14, %v3524_v38  ;;  %v4565_v14 = vld [vmem:[%s4666_s22 + $0xb0] sm:$0xff] }
 0x865   : > { %v3606_v1 = vmax.f32 %v3574_v13, 0.0 }
 0x867   : > { %3638 = vst [vmem:[%s6080_s21 + $0x20] sm:$0xff] %v3606_v1 }
 0x869   : > { %3549 = vxpose.xlu1.b32.cont [12/16] %v3453_v18, 128  ;;  %v4559_v18 = vld [vmem:[%s4666_s22 + $0x80] sm:$0xff] }
 0x86a   : > { %v3525_v10 = vpop.trf.xlu2 }
 0x86b   : > { %v3576_v52 = vadd.f32 %v4550_v8, %v3525_v10  ;;  %v4566_v8 = vld [vmem:[%s4666_s22 + $0x78] sm:$0xff] }
 0x86d   : > { %v3608_v12 = vmax.f32 %v3576_v52, 0.0 }
 0x86f   : > { %3640 = vst [vmem:[%s6080_s21 + $0x30] sm:$0xff] %v3608_v12 }
 0x871   : > { %3550 = vxpose.xlu1.b32.cont [13/16] %v3462_v0, 128 }
 0x872   : > { %v3526_v61 = vpop.trf.xlu2 }
 0x873   : > { %v3578_v41 = vadd.f32 %v4551_v47, %v3526_v61  ;;  %v4567_v47 = vld [vmem:[%s4666_s22 + $0xc0] sm:$0xff] }
 0x875   : > { %v3610_v22 = vmax.f32 %v3578_v41, 0.0 }
 0x877   : > { %3642 = vst [vmem:[%s6080_s21 + $0x40] sm:$0xff] %v3610_v22 }
 0x879   : > { %3551 = vxpose.xlu1.b32.cont [14/16] %v3463_v31, 128 }
 0x87a   : > { %v3527_v40 = vpop.trf.xlu2 }
 0x87b   : > { %v3580_v2 = vadd.f32 %v4553_v7, %v3527_v40  ;;  %v4569_v7 = vld [vmem:[%s4666_s22 + $0xd0] sm:$0xff] }
 0x87d   : > { %v3612_v55 = vmax.f32 %v3580_v2, 0.0 }
 0x87f   : > { %3644 = vst [vmem:[%s6080_s21 + $0x50] sm:$0xff] %v3612_v55 }
 0x881   : > { %3552 = vxpose.xlu1.b32.cont [15/16] %v3472_v32, 128 }
 0x882   : > { %v3528_v26 = vpop.trf.xlu2 }
 0x883   : > { %v3582_v36 = vadd.f32 %v4555_v16, %v3528_v26  ;;  %v4571_v16 = vld [vmem:[%s4666_s22 + $0xe0] sm:$0xff] }
 0x885   : > { %v3614_v45 = vmax.f32 %v3582_v36, 0.0 }
 0x887   : > { %3646 = vst [vmem:[%s6080_s21 + $0x60] sm:$0xff] %v3614_v45 }
 0x889   : > { %3553 = vxpose.xlu1.b32.end [16/16] %v3473_v28, 128 }
 0x88a   : > { %v3529_v5 = vpop.trf.xlu2 }
 0x88b   : > { %v3584_v20 = vadd.f32 %v4557_v42, %v3529_v5  ;;  %v4573_v42 = vld [vmem:[%s4666_s22 + $0xf0] sm:$0xff] }
 0x88d   : > { %v3616_v23 = vmax.f32 %v3584_v20, 0.0 }
 0x88f   : > { %3648 = vst [vmem:[%s6080_s21 + $0x70] sm:$0xff] %v3616_v23 }
 0x892   : > { %v3530_v54 = vpop.trf.xlu2 }
 0x893   : > { %v3586_v59 = vadd.f32 %v4559_v18, %v3530_v54  ;;  %v4575_v18 = vld [vmem:[%s4666_s22 + $0xc8] sm:$0xff] }
 0x895   : > { %v3618_v50 = vmax.f32 %v3586_v59, 0.0 }
 0x897   : > { %3650 = vst [vmem:[%s6080_s21 + $0x80] sm:$0xff] %v3618_v50 }
 0x89a   : > { %v3531_v25 = vpop.trf.xlu2 }
 0x89b   : > { %v3588_v30 = vadd.f32 %v4561_v35, %v3531_v25  ;;  %v4577_v35 = vld [vmem:[%s4666_s22 + $0xe8] sm:$0xff] }
 0x89d   : > { %v3620_v27 = vmax.f32 %v3588_v30, 0.0 }
 0x89f   : > { %3652 = vst [vmem:[%s6080_s21 + $0x90] sm:$0xff] %v3620_v27 }
 0x8a2   : > { %v3532_v17 = vpop.trf.xlu2 }
 0x8a3   : > { %v3590_v32 = vadd.f32 %v4563_v34, %v3532_v17 }
 0x8a5   : > { %v3622_v53 = vmax.f32 %v3590_v32, 0.0 }
 0x8a7   : > { %3654 = vst [vmem:[%s6080_s21 + $0xa0] sm:$0xff] %v3622_v53 }
 0x8aa   : > { %v3533_v38 = vpop.trf.xlu2 }
 0x8ab   : > { %v3592_v13 = vadd.f32 %v4565_v14, %v3533_v38 }
 0x8ad   : > { %v3624_v10 = vmax.f32 %v3592_v13, 0.0 }
 0x8af   : > { %3656 = vst [vmem:[%s6080_s21 + $0xb0] sm:$0xff] %v3624_v10 }
 0x8b2   : > { %v3534_v61 = vpop.trf.xlu2 }
 0x8b3   : > { %v3594_v41 = vadd.f32 %v4567_v47, %v3534_v61 }
 0x8b5   : > { %v3554_v39 = vpop.trf.xlu1  ;;  %v3626_v22 = vmax.f32 %v3594_v41, 0.0 }
 0x8b6   : > { %v3571_v4 = vadd.f32 %v4552_v29, %v3554_v39  ;;  %v4568_v29 = vld [vmem:[%s4666_s22 + $0x88] sm:$0xff] }
 0x8b7   : > { %3658 = vst [vmem:[%s6080_s21 + $0xc0] sm:$0xff] %v3626_v22 }
 0x8b8   : > { %v3603_v48 = vmax.f32 %v3571_v4, 0.0 }
 0x8ba   : > { %3635 = vst [vmem:[%s6080_s21 + $0x8] sm:$0xff] %v3603_v48  ;;  %v3535_v40 = vpop.trf.xlu2 }
 0x8bb   : > { %v3596_v2 = vadd.f32 %v4569_v7, %v3535_v40 }
 0x8bd   : > { %v3555_v19 = vpop.trf.xlu1  ;;  %v3628_v55 = vmax.f32 %v3596_v2, 0.0 }
 0x8be   : > { %v3573_v6 = vadd.f32 %v4554_v58, %v3555_v19  ;;  %v4570_v58 = vld [vmem:[%s4666_s22 + $0x98] sm:$0xff] }
 0x8bf   : > { %3660 = vst [vmem:[%s6080_s21 + $0xd0] sm:$0xff] %v3628_v55 }
 0x8c0   : > { %v3605_v51 = vmax.f32 %v3573_v6, 0.0 }
 0x8c2   : > { %3637 = vst [vmem:[%s6080_s21 + $0x18] sm:$0xff] %v3605_v51  ;;  %v3536_v26 = vpop.trf.xlu2 }
 0x8c3   : > { %v3598_v36 = vadd.f32 %v4571_v16, %v3536_v26 }
 0x8c5   : > { %v3556_v15 = vpop.trf.xlu1  ;;  %v3630_v45 = vmax.f32 %v3598_v36, 0.0 }
 0x8c6   : > { %v3575_v3 = vadd.f32 %v4556_v21, %v3556_v15  ;;  %v4572_v21 = vld [vmem:[%s4666_s22 + $0xa8] sm:$0xff] }
 0x8c7   : > { %3662 = vst [vmem:[%s6080_s21 + $0xe0] sm:$0xff] %v3630_v45 }
 0x8c8   : > { %v3607_v46 = vmax.f32 %v3575_v3, 0.0 }
 0x8ca   : > { %3639 = vst [vmem:[%s6080_s21 + $0x28] sm:$0xff] %v3607_v46  ;;  %v3537_v5 = vpop.trf.xlu2 }
 0x8cb   : > { %v3600_v20 = vadd.f32 %v4573_v42, %v3537_v5 }
 0x8cd   : > { %v3557_v57 = vpop.trf.xlu1  ;;  %v3632_v23 = vmax.f32 %v3600_v20, 0.0 }
 0x8ce   : > { %v3577_v56 = vadd.f32 %v4558_v44, %v3557_v57  ;;  %v4574_v44 = vld [vmem:[%s4666_s22 + $0xb8] sm:$0xff] }
 0x8cf   : > { %3664 = vst [vmem:[%s6080_s21 + $0xf0] sm:$0xff] %v3632_v23 }
 0x8d0   : > { %v3609_v43 = vmax.f32 %v3577_v56, 0.0 }
 0x8d2   : > { %3641 = vst [vmem:[%s6080_s21 + $0x38] sm:$0xff] %v3609_v43 }
 0x8d5   : > { %v3558_v37 = vpop.trf.xlu1 }
 0x8d6   : > { %v3579_v0 = vadd.f32 %v4560_v11, %v3558_v37  ;;  %v4576_v11 = vld [vmem:[%s4666_s22 + $0xd8] sm:$0xff] }
 0x8d8   : > { %v3611_v33 = vmax.f32 %v3579_v0, 0.0 }
 0x8da   : > { %3643 = vst [vmem:[%s6080_s21 + $0x48] sm:$0xff] %v3611_v33 }
 0x8dd   : > { %v3559_v31 = vpop.trf.xlu1 }
 0x8de   : > { %v3581_v24 = vadd.f32 %v4562_v9, %v3559_v31  ;;  %v4578_v9 = vld [vmem:[%s4666_s22 + $0xf8] sm:$0xff] }
 0x8e0   : > { %v3613_v60 = vmax.f32 %v3581_v24, 0.0 }
 0x8e2   : > { %3645 = vst [vmem:[%s6080_s21 + $0x58] sm:$0xff] %v3613_v60 }
 0x8e5   : > { %v3560_v28 = vpop.trf.xlu1 }
 0x8e6   : > { %v3583_v62 = vadd.f32 %v4564_v63, %v3560_v28 }
 0x8e8   : > { %v3615_v49 = vmax.f32 %v3583_v62, 0.0 }
 0x8ea   : > { %3647 = vst [vmem:[%s6080_s21 + $0x68] sm:$0xff] %v3615_v49 }
 0x8ed   : > { %v3561_v1 = vpop.trf.xlu1 }
 0x8ee   : > { %v3585_v52 = vadd.f32 %v4566_v8, %v3561_v1 }
 0x8f0   : > { %v3617_v12 = vmax.f32 %v3585_v52, 0.0 }
 0x8f2   : > { %3649 = vst [vmem:[%s6080_s21 + $0x78] sm:$0xff] %v3617_v12 }
 0x8f5   : > { %v3562_v39 = vpop.trf.xlu1 }
 0x8f6   : > { %v3587_v4 = vadd.f32 %v4568_v29, %v3562_v39 }
 0x8f8   : > { %v3619_v48 = vmax.f32 %v3587_v4, 0.0 }
 0x8fa   : > { %3651 = vst [vmem:[%s6080_s21 + $0x88] sm:$0xff] %v3619_v48 }
 0x8fd   : > { %v3563_v19 = vpop.trf.xlu1 }
 0x8fe   : > { %v3589_v6 = vadd.f32 %v4570_v58, %v3563_v19 }
 0x900   : > { %v3621_v51 = vmax.f32 %v3589_v6, 0.0 }
 0x902   : > { %3653 = vst [vmem:[%s6080_s21 + $0x98] sm:$0xff] %v3621_v51 }
 0x905   : > { %v3564_v15 = vpop.trf.xlu1 }
 0x906   : > { %v3591_v3 = vadd.f32 %v4572_v21, %v3564_v15 }
 0x908   : > { %v3623_v46 = vmax.f32 %v3591_v3, 0.0 }
 0x90a   : > { %3655 = vst [vmem:[%s6080_s21 + $0xa8] sm:$0xff] %v3623_v46 }
 0x90d   : > { %v3565_v57 = vpop.trf.xlu1 }
 0x90e   : > { %v3593_v56 = vadd.f32 %v4574_v44, %v3565_v57 }
 0x910   : > { %v3625_v43 = vmax.f32 %v3593_v56, 0.0 }
 0x912   : > { %3657 = vst [vmem:[%s6080_s21 + $0xb8] sm:$0xff] %v3625_v43 }
 0x915   : > { %v3566_v54 = vpop.trf.xlu1 }
 0x916   : > { %v3595_v59 = vadd.f32 %v4575_v18, %v3566_v54 }
 0x918   : > { %v3627_v37 = vmax.f32 %v3595_v59, 0.0 }
 0x91a   : > { %3659 = vst [vmem:[%s6080_s21 + $0xc8] sm:$0xff] %v3627_v37 }
 0x91d   : > { %v3567_v50 = vpop.trf.xlu1 }
 0x91e   : > { %v3597_v0 = vadd.f32 %v4576_v11, %v3567_v50 }
 0x920   : > { %v3629_v33 = vmax.f32 %v3597_v0, 0.0 }
 0x922   : > { %3661 = vst [vmem:[%s6080_s21 + $0xd8] sm:$0xff] %v3629_v33 }
 0x925   : > { %v3568_v25 = vpop.trf.xlu1 }
 0x926   : > { %v3599_v30 = vadd.f32 %v4577_v35, %v3568_v25 }
 0x928   : > { %v3631_v31 = vmax.f32 %v3599_v30, 0.0 }
 0x92a   : > { %3663 = vst [vmem:[%s6080_s21 + $0xe8] sm:$0xff] %v3631_v31 }
 0x92d   : > { %v3569_v27 = vpop.trf.xlu1 }
 0x92e   : > { %v3601_v24 = vadd.f32 %v4578_v9, %v3569_v27 }
 0x930   : > { %v3633_v60 = vmax.f32 %v3601_v24, 0.0 }
 0x932   : > { %3665 = vst [vmem:[%s6080_s21 + $0xf8] sm:$0xff] %v3633_v60 }
 0x933 PF: > { %s21_s17 = sadd.s32 1, %s4585_s17  }
 0x934   : > { %p18_p4 = scmp.ge.s32.totalorder %s21_s17, 4  }
 0x936   :  { %20 = sbr.rel (!%p18_p4) target bundleno = 1 (0x1), region = 108 }

</bundles_post_ra>
